<compile_context>
chip_gen: v7x
topology: tpu7x:2x2x1
jax: 0.10.0
libtpu: 0.0.40
codegen_flags: <defaults>
</compile_context>

<pallas_src>
import jax
import jax.numpy as jnp
from jax.experimental import pallas as pl
from jax.experimental.pallas import tpu as pltpu

BN_EPS = 1e-5          # nn.BatchNorm2d default
_LANE = 128
_SUBLANE = 8
_VMEM_LIMIT = 32 * 1024 * 1024   # explicit budget; actual use is a few MiB


def _round_up(x, m):
    return ((x + m - 1) // m) * m


def _fused_block_kernel(x_ref, w1_ref, w2_ref, pooled_ref, stats_ref,
                        h1pad_ref, h2_ref):
    """conv3x3+ReLU -> conv3x3+ReLU -> maxpool2x2, plus BN partial sums.

    One grid step == one image.  h1 (with zero halo) and h2 stay in VMEM scratch.
      x_ref      : (1, H+2, W+2, Cin_p)   padded input tile
      w1_ref     : (9, Cin_p, Cp)         resident (constant index_map)
      w2_ref     : (9, Cp, Cp)            resident
      pooled_ref : (1, Hp*Wp, Cp)         un-normalized pooled output
      stats_ref  : (1, 2, Cp)             per-image [sum, sum_sq] over rows
      h1pad_ref  : (H+2, W+2, Cp) scratch
      h2_ref     : (H*W, Cp)      scratch
    """
    hp2, wp2, cin_p = x_ref.shape[1], x_ref.shape[2], x_ref.shape[3]
    h, w = hp2 - 2, wp2 - 2
    cp = w1_ref.shape[2]
    hw = h * w
    hp, wp = h // 2, w // 2

    # ---- conv1 + ReLU: 9 shifted taps -> MXU dots, f32 accumulate ----
    acc1 = jnp.zeros((hw, cp), jnp.float32)
    t = 0
    for ky in range(3):
        for kx in range(3):
            tap = x_ref[0, ky:ky + h, kx:kx + w, :].reshape(hw, cin_p)
            acc1 = acc1 + jnp.dot(tap, w1_ref[t],
                                  preferred_element_type=jnp.float32)
            t += 1
    h1 = jnp.maximum(acc1, 0.0)

    # ---- stage h1 with a zero halo in VMEM; it never touches HBM ----
    h1pad_ref[...] = jnp.zeros(h1pad_ref.shape, h1pad_ref.dtype)
    h1pad_ref[1:h + 1, 1:w + 1, :] = h1.reshape(h, w, cp).astype(h1pad_ref.dtype)

    # ---- conv2 + ReLU ----
    acc2 = jnp.zeros((hw, cp), jnp.float32)
    t = 0
    for ky in range(3):
        for kx in range(3):
            tap = h1pad_ref[ky:ky + h, kx:kx + w, :].reshape(hw, cp)
            acc2 = acc2 + jnp.dot(tap, w2_ref[t],
                                  preferred_element_type=jnp.float32)
            t += 1
    h2_ref[...] = jnp.maximum(acc2, 0.0)

    # ---- 2x2 / stride-2 max pool, fully in VMEM ----
    # h2_ref rows are ordered (h, w) with w fastest; W is even => row parity == w parity.
    ev = h2_ref[pl.ds(0, hw // 2, 2), :]     # even-w phase, rows ordered (h, wp)
    od = h2_ref[pl.ds(1, hw // 2, 2), :]     # odd-w phase
    mw = jnp.maximum(ev, od)                 # (H*Wp, Cp)
    m4 = mw.reshape(h, wp, cp).reshape(hp, 2, wp, cp)
    pooled = jnp.maximum(m4[:, 0], m4[:, 1])           # (Hp, Wp, Cp)
    pf = pooled.reshape(hp * wp, cp)
    pooled_ref[0] = pf.astype(pooled_ref.dtype)

    # ---- per-image BatchNorm partials (reduced across the batch in the wrapper) ----
    stats_ref[0, 0:1, :] = jnp.sum(pf, axis=0, keepdims=True)
    stats_ref[0, 1:2, :] = jnp.sum(pf * pf, axis=0, keepdims=True)


def _bn_affine_kernel(x_ref, scale_ref, shift_ref, o_ref):
    # out = pooled * scale + shift  (gamma/beta and batch mean/var folded into scale/shift)
    o_ref[...] = (x_ref[...].astype(jnp.float32) * scale_ref[...]
                  + shift_ref[...]).astype(o_ref.dtype)


def simple_block_forward(x_nchw, params, *, compute_dtype=jnp.float32):
    """Pallas equivalent of SimpleBlock.forward. Input/output are NCHW (PyTorch layout).

    compute_dtype=jnp.bfloat16 halves matmul/DMA bytes (f32 accumulation is kept);
    default float32 matches the PyTorch module's numerics.
    """
    w1, w2 = params["w1"], params["w2"]
    gamma, beta = params["gamma"], params["beta"]
    n, cin, h, w = x_nchw.shape
    cout = w1.shape[-1]
    assert h % 2 == 0 and w % 2 == 0, "even spatial dims required (MaxPool2d(2,2))"

    cin_p = _round_up(cin, _SUBLANE)
    cp = _round_up(cout, _LANE)          # lane-dense channel dim (unmasked 128-wide stores)
    hp, wp = h // 2, w // 2

    # --- glue: NCHW -> NHWC, halo + channel padding, weight repack (HWIO -> (9,Ci,Co)) ---
    x = jnp.transpose(x_nchw, (0, 2, 3, 1))
    xp = jnp.pad(x, ((0, 0), (1, 1), (1, 1), (0, cin_p - cin))).astype(compute_dtype)
    w1p = jnp.pad(w1, ((0, 0), (0, 0), (0, cin_p - cin), (0, cp - cout)))
    w1p = w1p.reshape(9, cin_p, cp).astype(compute_dtype)
    w2p = jnp.pad(w2, ((0, 0), (0, 0), (0, cp - cout), (0, cp - cout)))
    w2p = w2p.reshape(9, cp, cp).astype(compute_dtype)

    # --- fused conv1 -> conv2 -> pool (+ BN partial sums), grid over batch ---
    grid_spec = pltpu.PrefetchScalarGridSpec(
        num_scalar_prefetch=0,
        grid=(n,),
        in_specs=[
            pl.BlockSpec((1, h + 2, w + 2, cin_p), lambda b: (b, 0, 0, 0)),
            pl.BlockSpec((9, cin_p, cp), lambda b: (0, 0, 0)),   # weights stay resident
            pl.BlockSpec((9, cp, cp), lambda b: (0, 0, 0)),
        ],
        out_specs=[
            pl.BlockSpec((1, hp * wp, cp), lambda b: (b, 0, 0)),
            pl.BlockSpec((1, 2, cp), lambda b: (b, 0, 0)),
        ],
        scratch_shapes=[
            pltpu.VMEM((h + 2, w + 2, cp), compute_dtype),   # h1 with halo
            pltpu.VMEM((h * w, cp), jnp.float32),            # h2
        ],
    )
    pooled, stats = pl.pallas_call(
        _fused_block_kernel,
        out_shape=(jax.ShapeDtypeStruct((n, hp * wp, cp), jnp.float32),
                   jax.ShapeDtypeStruct((n, 2, cp), jnp.float32)),
        grid_spec=grid_spec,
        compiler_params=pltpu.CompilerParams(
            dimension_semantics=("parallel",),
            vmem_limit_bytes=_VMEM_LIMIT),
    )(xp, w1p, w2p)

    # --- tiny per-channel BN stats math (glue): biased variance, training-mode BN ---
    count = float(n * hp * wp)
    s1 = jnp.sum(stats[:, 0, :], axis=0)
    s2 = jnp.sum(stats[:, 1, :], axis=0)
    mean = s1 / count
    var = jnp.maximum(s2 / count - mean * mean, 0.0)
    gamma_p = jnp.pad(gamma.astype(jnp.float32), (0, cp - cout))
    beta_p = jnp.pad(beta.astype(jnp.float32), (0, cp - cout))
    scale = gamma_p * jax.lax.rsqrt(var + BN_EPS)
    shift = beta_p - mean * scale

    # --- BN normalize: gridded, pipelined, lane-dense elementwise affine ---
    rows = n * hp * wp
    pooled2d = pooled.reshape(rows, cp)
    tm = rows if rows < 512 else 512
    normed = pl.pallas_call(
        _bn_affine_kernel,
        out_shape=jax.ShapeDtypeStruct((rows, cp), x_nchw.dtype),
        grid_spec=pltpu.PrefetchScalarGridSpec(
            num_scalar_prefetch=0,
            grid=(pl.cdiv(rows, tm),),
            in_specs=[
                pl.BlockSpec((tm, cp), lambda i: (i, 0)),
                pl.BlockSpec((1, cp), lambda i: (0, 0)),   # scale fetched once
                pl.BlockSpec((1, cp), lambda i: (0, 0)),   # shift fetched once
            ],
            out_specs=pl.BlockSpec((tm, cp), lambda i: (i, 0)),
        ),
        compiler_params=pltpu.CompilerParams(
            dimension_semantics=("parallel",),
            vmem_limit_bytes=_VMEM_LIMIT),
    )(pooled2d, scale.reshape(1, cp), shift.reshape(1, cp))

    out = normed.reshape(n, hp, wp, cp)[:, :, :, :cout]
    return jnp.transpose(out, (0, 3, 1, 2))   # NHWC -> NCHW


def init_params(key, in_channels, out_channels, dtype=jnp.float32):
    # Deterministic synthetic parameters (shapes match the PyTorch module).
    k1, k2 = jax.random.split(key)
    w1 = jax.random.normal(k1, (3, 3, in_channels, out_channels), dtype) * 0.1   # HWIO
    w2 = jax.random.normal(k2, (3, 3, out_channels, out_channels), dtype) * 0.1  # HWIO
    gamma = jnp.ones((out_channels,), dtype)   # nn.BatchNorm2d default affine weight
    beta = jnp.zeros((out_channels,), dtype)   # nn.BatchNorm2d default affine bias
    return {"w1": w1, "w2": w2, "gamma": gamma, "beta": beta}


if __name__ == "__main__":
    N, CIN, COUT, H, W = 2, 4, 8, 16, 16
    key = jax.random.PRNGKey(0)
    kx, kp = jax.random.split(key)
    x = jax.random.normal(kx, (N, CIN, H, W), jnp.float32)   # NCHW, as PyTorch would take
    params = init_params(kp, CIN, COUT)

    out = jax.jit(simple_block_forward)(x, params)
    out = jax.block_until_ready(out)
    assert out.shape == (N, COUT, H // 2, W // 2), out.shape
    assert bool(jnp.all(jnp.isfinite(out)))
    print("KERNEL_OK")
</pallas_src>

<mosaic_0001>
module attributes {stable_mosaic.version = 11 : i64} {
  func.func @_bn_affine_kernel(%arg0: i32, %arg1: memref<128x128xf32, #tpu.memory_space<vmem>>, %arg2: memref<1x128xf32, #tpu.memory_space<vmem>>, %arg3: memref<1x128xf32, #tpu.memory_space<vmem>>, %arg4: memref<128x128xf32, #tpu.memory_space<vmem>>) attributes {dimension_semantics = [#tpu.dimension_semantics<parallel>], iteration_bounds = array<i64: 1>, scalar_prefetch = 0 : i64, scratch_operands = 0 : i64, tpu.core_type = #tpu.core_type<tc>, window_params = [{transform_indices = @transform_0, window_bounds = array<i64: 128, 128>}, {pipeline_mode = #tpu.pipeline_mode<synchronous>, transform_indices = @transform_1, window_bounds = array<i64: 1, 128>}, {pipeline_mode = #tpu.pipeline_mode<synchronous>, transform_indices = @transform_2, window_bounds = array<i64: 1, 128>}, {transform_indices = @transform_3, window_bounds = array<i64: 128, 128>}]} {
    %c0 = arith.constant 0 : index
    %c0_0 = arith.constant 0 : index
    %0 = vector.load %arg1[%c0, %c0_0] : memref<128x128xf32, #tpu.memory_space<vmem>>, vector<128x128xf32>
    %c0_1 = arith.constant 0 : index
    %c0_2 = arith.constant 0 : index
    %1 = vector.load %arg2[%c0_1, %c0_2] : memref<1x128xf32, #tpu.memory_space<vmem>>, vector<1x128xf32>
    %2 = vector.broadcast %1 : vector<1x128xf32> to vector<128x128xf32>
    %3 = arith.mulf %0, %2 : vector<128x128xf32>
    %c0_3 = arith.constant 0 : index
    %c0_4 = arith.constant 0 : index
    %4 = vector.load %arg3[%c0_3, %c0_4] : memref<1x128xf32, #tpu.memory_space<vmem>>, vector<1x128xf32>
    %5 = vector.broadcast %4 : vector<1x128xf32> to vector<128x128xf32>
    %6 = arith.addf %3, %5 : vector<128x128xf32>
    %c0_5 = arith.constant 0 : index
    %c0_6 = arith.constant 0 : index
    %7 = vector.load %arg4[%c0_5, %c0_6] : memref<128x128xf32, #tpu.memory_space<vmem>>, vector<128x128xf32>
    tpu.vector_store %arg4[%c0_5, %c0_6], %6 {strides = array<i32>} : memref<128x128xf32, #tpu.memory_space<vmem>>, vector<128x128xf32>,
    return
  }
  func.func @transform_0(%arg0: i32) -> (i32, i32) {
    %c0_i32 = arith.constant 0 : i32
    %c0_i32_0 = arith.constant 0 : i32
    return %arg0, %c0_i32 : i32, i32
  }
  func.func @transform_1(%arg0: i32) -> (i32, i32) {
    %c0_i32 = arith.constant 0 : i32
    %c0_i32_0 = arith.constant 0 : i32
    %c0_i32_1 = arith.constant 0 : i32
    return %c0_i32, %c0_i32_0 : i32, i32
  }
  func.func @transform_2(%arg0: i32) -> (i32, i32) {
    %c0_i32 = arith.constant 0 : i32
    %c0_i32_0 = arith.constant 0 : i32
    %c0_i32_1 = arith.constant 0 : i32
    return %c0_i32, %c0_i32_0 : i32, i32
  }
  func.func @transform_3(%arg0: i32) -> (i32, i32) {
    %c0_i32 = arith.constant 0 : i32
    %c0_i32_0 = arith.constant 0 : i32
    return %arg0, %c0_i32 : i32, i32
  }
}

module attributes {stable_mosaic.version = 11 : i64} {
  func.func @_fused_block_kernel(%arg0: i32, %arg1: memref<1x18x18x8xf32, #tpu.memory_space<vmem>>, %arg2: memref<9x8x128xf32, #tpu.memory_space<vmem>>, %arg3: memref<9x128x128xf32, #tpu.memory_space<vmem>>, %arg4: memref<1x64x128xf32, #tpu.memory_space<vmem>>, %arg5: memref<1x2x128xf32, #tpu.memory_space<vmem>>, %arg6: memref<18x18x128xf32, #tpu.memory_space<vmem>>, %arg7: memref<256x128xf32, #tpu.memory_space<vmem>>) attributes {dimension_semantics = [#tpu.dimension_semantics<parallel>], iteration_bounds = array<i64: 2>, scalar_prefetch = 0 : i64, scratch_operands = 2 : i64, tpu.core_type = #tpu.core_type<tc>, window_params = [{transform_indices = @transform_0, window_bounds = array<i64: 1, 18, 18, 8>}, {pipeline_mode = #tpu.pipeline_mode<synchronous>, transform_indices = @transform_1, window_bounds = array<i64: 9, 8, 128>}, {pipeline_mode = #tpu.pipeline_mode<synchronous>, transform_indices = @transform_2, window_bounds = array<i64: 9, 128, 128>}, {transform_indices = @transform_3, window_bounds = array<i64: 1, 64, 128>}, {transform_indices = @transform_4, window_bounds = array<i64: 1, 2, 128>}]} {
    %cst = arith.constant 0.000000e+00 : f32
    %0 = vector.broadcast %cst : f32 to vector<256x128xf32>
    %c0 = arith.constant 0 : index
    %c0_0 = arith.constant 0 : index
    %c0_1 = arith.constant 0 : index
    %c0_2 = arith.constant 0 : index
    %1 = vector.load %arg1[%c0, %c0_0, %c0_1, %c0_2] : memref<1x18x18x8xf32, #tpu.memory_space<vmem>>, vector<1x16x16x8xf32>
    %2 = vector.shape_cast %1 : vector<1x16x16x8xf32> to vector<16x16x8xf32>
    %3 = vector.shape_cast %2 : vector<16x16x8xf32> to vector<256x8xf32>
    %c0_3 = arith.constant 0 : index
    %c0_4 = arith.constant 0 : index
    %c0_5 = arith.constant 0 : index
    %4 = vector.load %arg2[%c0_3, %c0_4, %c0_5] : memref<9x8x128xf32, #tpu.memory_space<vmem>>, vector<1x8x128xf32>
    %5 = vector.shape_cast %4 : vector<1x8x128xf32> to vector<8x128xf32>
    %cst_6 = arith.constant dense<0.000000e+00> : vector<256x128xf32>
    %6 = tpu.matmul %3, %5, %cst_6 {dimension_numbers = #tpu.dot_dimension_numbers<[1], [0], [0], [1], [0, 0, 1, 1], [], []>} : vector<256x8xf32>, vector<8x128xf32>, vector<256x128xf32> -> vector<256x128xf32>
    %7 = arith.addf %0, %6 : vector<256x128xf32>
    %c0_7 = arith.constant 0 : index
    %c0_8 = arith.constant 0 : index
    %c1 = arith.constant 1 : index
    %c0_9 = arith.constant 0 : index
    %8 = vector.load %arg1[%c0_7, %c0_8, %c1, %c0_9] : memref<1x18x18x8xf32, #tpu.memory_space<vmem>>, vector<1x16x16x8xf32>
    %9 = vector.shape_cast %8 : vector<1x16x16x8xf32> to vector<16x16x8xf32>
    %10 = vector.shape_cast %9 : vector<16x16x8xf32> to vector<256x8xf32>
    %c1_10 = arith.constant 1 : index
    %c0_11 = arith.constant 0 : index
    %c0_12 = arith.constant 0 : index
    %11 = vector.load %arg2[%c1_10, %c0_11, %c0_12] : memref<9x8x128xf32, #tpu.memory_space<vmem>>, vector<1x8x128xf32>
    %12 = vector.shape_cast %11 : vector<1x8x128xf32> to vector<8x128xf32>
    %cst_13 = arith.constant dense<0.000000e+00> : vector<256x128xf32>
    %13 = tpu.matmul %10, %12, %cst_13 {dimension_numbers = #tpu.dot_dimension_numbers<[1], [0], [0], [1], [0, 0, 1, 1], [], []>} : vector<256x8xf32>, vector<8x128xf32>, vector<256x128xf32> -> vector<256x128xf32>
    %14 = arith.addf %7, %13 : vector<256x128xf32>
    %c0_14 = arith.constant 0 : index
    %c0_15 = arith.constant 0 : index
    %c2 = arith.constant 2 : index
    %c0_16 = arith.constant 0 : index
    %15 = vector.load %arg1[%c0_14, %c0_15, %c2, %c0_16] : memref<1x18x18x8xf32, #tpu.memory_space<vmem>>, vector<1x16x16x8xf32>
    %16 = vector.shape_cast %15 : vector<1x16x16x8xf32> to vector<16x16x8xf32>
    %17 = vector.shape_cast %16 : vector<16x16x8xf32> to vector<256x8xf32>
    %c2_17 = arith.constant 2 : index
    %c0_18 = arith.constant 0 : index
    %c0_19 = arith.constant 0 : index
    %18 = vector.load %arg2[%c2_17, %c0_18, %c0_19] : memref<9x8x128xf32, #tpu.memory_space<vmem>>, vector<1x8x128xf32>
    %19 = vector.shape_cast %18 : vector<1x8x128xf32> to vector<8x128xf32>
    %cst_20 = arith.constant dense<0.000000e+00> : vector<256x128xf32>
    %20 = tpu.matmul %17, %19, %cst_20 {dimension_numbers = #tpu.dot_dimension_numbers<[1], [0], [0], [1], [0, 0, 1, 1], [], []>} : vector<256x8xf32>, vector<8x128xf32>, vector<256x128xf32> -> vector<256x128xf32>
    %21 = arith.addf %14, %20 : vector<256x128xf32>
    %c0_21 = arith.constant 0 : index
    %c1_22 = arith.constant 1 : index
    %c0_23 = arith.constant 0 : index
    %c0_24 = arith.constant 0 : index
    %22 = vector.load %arg1[%c0_21, %c1_22, %c0_23, %c0_24] : memref<1x18x18x8xf32, #tpu.memory_space<vmem>>, vector<1x16x16x8xf32>
    %23 = vector.shape_cast %22 : vector<1x16x16x8xf32> to vector<16x16x8xf32>
    %24 = vector.shape_cast %23 : vector<16x16x8xf32> to vector<256x8xf32>
    %c3 = arith.constant 3 : index
    %c0_25 = arith.constant 0 : index
    %c0_26 = arith.constant 0 : index
    %25 = vector.load %arg2[%c3, %c0_25, %c0_26] : memref<9x8x128xf32, #tpu.memory_space<vmem>>, vector<1x8x128xf32>
    %26 = vector.shape_cast %25 : vector<1x8x128xf32> to vector<8x128xf32>
    %cst_27 = arith.constant dense<0.000000e+00> : vector<256x128xf32>
    %27 = tpu.matmul %24, %26, %cst_27 {dimension_numbers = #tpu.dot_dimension_numbers<[1], [0], [0], [1], [0, 0, 1, 1], [], []>} : vector<256x8xf32>, vector<8x128xf32>, vector<256x128xf32> -> vector<256x128xf32>
    %28 = arith.addf %21, %27 : vector<256x128xf32>
    %c0_28 = arith.constant 0 : index
    %c1_29 = arith.constant 1 : index
    %c1_30 = arith.constant 1 : index
    %c0_31 = arith.constant 0 : index
    %29 = vector.load %arg1[%c0_28, %c1_29, %c1_30, %c0_31] : memref<1x18x18x8xf32, #tpu.memory_space<vmem>>, vector<1x16x16x8xf32>
    %30 = vector.shape_cast %29 : vector<1x16x16x8xf32> to vector<16x16x8xf32>
    %31 = vector.shape_cast %30 : vector<16x16x8xf32> to vector<256x8xf32>
    %c4 = arith.constant 4 : index
    %c0_32 = arith.constant 0 : index
    %c0_33 = arith.constant 0 : index
    %32 = vector.load %arg2[%c4, %c0_32, %c0_33] : memref<9x8x128xf32, #tpu.memory_space<vmem>>, vector<1x8x128xf32>
    %33 = vector.shape_cast %32 : vector<1x8x128xf32> to vector<8x128xf32>
    %cst_34 = arith.constant dense<0.000000e+00> : vector<256x128xf32>
    %34 = tpu.matmul %31, %33, %cst_34 {dimension_numbers = #tpu.dot_dimension_numbers<[1], [0], [0], [1], [0, 0, 1, 1], [], []>} : vector<256x8xf32>, vector<8x128xf32>, vector<256x128xf32> -> vector<256x128xf32>
    %35 = arith.addf %28, %34 : vector<256x128xf32>
    %c0_35 = arith.constant 0 : index
    %c1_36 = arith.constant 1 : index
    %c2_37 = arith.constant 2 : index
    %c0_38 = arith.constant 0 : index
    %36 = vector.load %arg1[%c0_35, %c1_36, %c2_37, %c0_38] : memref<1x18x18x8xf32, #tpu.memory_space<vmem>>, vector<1x16x16x8xf32>
    %37 = vector.shape_cast %36 : vector<1x16x16x8xf32> to vector<16x16x8xf32>
    %38 = vector.shape_cast %37 : vector<16x16x8xf32> to vector<256x8xf32>
    %c5 = arith.constant 5 : index
    %c0_39 = arith.constant 0 : index
    %c0_40 = arith.constant 0 : index
    %39 = vector.load %arg2[%c5, %c0_39, %c0_40] : memref<9x8x128xf32, #tpu.memory_space<vmem>>, vector<1x8x128xf32>
    %40 = vector.shape_cast %39 : vector<1x8x128xf32> to vector<8x128xf32>
    %cst_41 = arith.constant dense<0.000000e+00> : vector<256x128xf32>
    %41 = tpu.matmul %38, %40, %cst_41 {dimension_numbers = #tpu.dot_dimension_numbers<[1], [0], [0], [1], [0, 0, 1, 1], [], []>} : vector<256x8xf32>, vector<8x128xf32>, vector<256x128xf32> -> vector<256x128xf32>
    %42 = arith.addf %35, %41 : vector<256x128xf32>
    %c0_42 = arith.constant 0 : index
    %c2_43 = arith.constant 2 : index
    %c0_44 = arith.constant 0 : index
    %c0_45 = arith.constant 0 : index
    %43 = vector.load %arg1[%c0_42, %c2_43, %c0_44, %c0_45] : memref<1x18x18x8xf32, #tpu.memory_space<vmem>>, vector<1x16x16x8xf32>
    %44 = vector.shape_cast %43 : vector<1x16x16x8xf32> to vector<16x16x8xf32>
    %45 = vector.shape_cast %44 : vector<16x16x8xf32> to vector<256x8xf32>
    %c6 = arith.constant 6 : index
    %c0_46 = arith.constant 0 : index
    %c0_47 = arith.constant 0 : index
    %46 = vector.load %arg2[%c6, %c0_46, %c0_47] : memref<9x8x128xf32, #tpu.memory_space<vmem>>, vector<1x8x128xf32>
    %47 = vector.shape_cast %46 : vector<1x8x128xf32> to vector<8x128xf32>
    %cst_48 = arith.constant dense<0.000000e+00> : vector<256x128xf32>
    %48 = tpu.matmul %45, %47, %cst_48 {dimension_numbers = #tpu.dot_dimension_numbers<[1], [0], [0], [1], [0, 0, 1, 1], [], []>} : vector<256x8xf32>, vector<8x128xf32>, vector<256x128xf32> -> vector<256x128xf32>
    %49 = arith.addf %42, %48 : vector<256x128xf32>
    %c0_49 = arith.constant 0 : index
    %c2_50 = arith.constant 2 : index
    %c1_51 = arith.constant 1 : index
    %c0_52 = arith.constant 0 : index
    %50 = vector.load %arg1[%c0_49, %c2_50, %c1_51, %c0_52] : memref<1x18x18x8xf32, #tpu.memory_space<vmem>>, vector<1x16x16x8xf32>
    %51 = vector.shape_cast %50 : vector<1x16x16x8xf32> to vector<16x16x8xf32>
    %52 = vector.shape_cast %51 : vector<16x16x8xf32> to vector<256x8xf32>
    %c7 = arith.constant 7 : index
    %c0_53 = arith.constant 0 : index
    %c0_54 = arith.constant 0 : index
    %53 = vector.load %arg2[%c7, %c0_53, %c0_54] : memref<9x8x128xf32, #tpu.memory_space<vmem>>, vector<1x8x128xf32>
    %54 = vector.shape_cast %53 : vector<1x8x128xf32> to vector<8x128xf32>
    %cst_55 = arith.constant dense<0.000000e+00> : vector<256x128xf32>
    %55 = tpu.matmul %52, %54, %cst_55 {dimension_numbers = #tpu.dot_dimension_numbers<[1], [0], [0], [1], [0, 0, 1, 1], [], []>} : vector<256x8xf32>, vector<8x128xf32>, vector<256x128xf32> -> vector<256x128xf32>
    %56 = arith.addf %49, %55 : vector<256x128xf32>
    %c0_56 = arith.constant 0 : index
    %c2_57 = arith.constant 2 : index
    %c2_58 = arith.constant 2 : index
    %c0_59 = arith.constant 0 : index
    %57 = vector.load %arg1[%c0_56, %c2_57, %c2_58, %c0_59] : memref<1x18x18x8xf32, #tpu.memory_space<vmem>>, vector<1x16x16x8xf32>
    %58 = vector.shape_cast %57 : vector<1x16x16x8xf32> to vector<16x16x8xf32>
    %59 = vector.shape_cast %58 : vector<16x16x8xf32> to vector<256x8xf32>
    %c8 = arith.constant 8 : index
    %c0_60 = arith.constant 0 : index
    %c0_61 = arith.constant 0 : index
    %60 = vector.load %arg2[%c8, %c0_60, %c0_61] : memref<9x8x128xf32, #tpu.memory_space<vmem>>, vector<1x8x128xf32>
    %61 = vector.shape_cast %60 : vector<1x8x128xf32> to vector<8x128xf32>
    %cst_62 = arith.constant dense<0.000000e+00> : vector<256x128xf32>
    %62 = tpu.matmul %59, %61, %cst_62 {dimension_numbers = #tpu.dot_dimension_numbers<[1], [0], [0], [1], [0, 0, 1, 1], [], []>} : vector<256x8xf32>, vector<8x128xf32>, vector<256x128xf32> -> vector<256x128xf32>
    %63 = arith.addf %56, %62 : vector<256x128xf32>
    %cst_63 = arith.constant 0.000000e+00 : f32
    %64 = vector.broadcast %cst_63 : f32 to vector<256x128xf32>
    %65 = arith.maximumf %63, %64 : vector<256x128xf32>
    %cst_64 = arith.constant 0.000000e+00 : f32
    %66 = vector.broadcast %cst_64 : f32 to vector<18x18x128xf32>
    %c0_65 = arith.constant 0 : index
    %c0_66 = arith.constant 0 : index
    %c0_67 = arith.constant 0 : index
    %67 = vector.load %arg6[%c0_65, %c0_66, %c0_67] : memref<18x18x128xf32, #tpu.memory_space<vmem>>, vector<18x18x128xf32>
    tpu.vector_store %arg6[%c0_65, %c0_66, %c0_67], %66 {strides = array<i32>} : memref<18x18x128xf32, #tpu.memory_space<vmem>>, vector<18x18x128xf32>,
    %68 = vector.shape_cast %65 : vector<256x128xf32> to vector<16x16x128xf32>
    %c1_68 = arith.constant 1 : index
    %c1_69 = arith.constant 1 : index
    %c0_70 = arith.constant 0 : index
    %69 = vector.load %arg6[%c1_68, %c1_69, %c0_70] : memref<18x18x128xf32, #tpu.memory_space<vmem>>, vector<16x16x128xf32>
    tpu.vector_store %arg6[%c1_68, %c1_69, %c0_70], %68 {strides = array<i32>} : memref<18x18x128xf32, #tpu.memory_space<vmem>>, vector<16x16x128xf32>,
    %cst_71 = arith.constant 0.000000e+00 : f32
    %70 = vector.broadcast %cst_71 : f32 to vector<256x128xf32>
    %c0_72 = arith.constant 0 : index
    %c0_73 = arith.constant 0 : index
    %c0_74 = arith.constant 0 : index
    %71 = vector.load %arg6[%c0_72, %c0_73, %c0_74] : memref<18x18x128xf32, #tpu.memory_space<vmem>>, vector<16x16x128xf32>
    %72 = vector.shape_cast %71 : vector<16x16x128xf32> to vector<256x128xf32>
    %c0_75 = arith.constant 0 : index
    %c0_76 = arith.constant 0 : index
    %c0_77 = arith.constant 0 : index
    %73 = vector.load %arg3[%c0_75, %c0_76, %c0_77] : memref<9x128x128xf32, #tpu.memory_space<vmem>>, vector<1x128x128xf32>
    %74 = vector.shape_cast %73 : vector<1x128x128xf32> to vector<128x128xf32>
    %cst_78 = arith.constant dense<0.000000e+00> : vector<256x128xf32>
    %75 = tpu.matmul %72, %74, %cst_78 {dimension_numbers = #tpu.dot_dimension_numbers<[1], [0], [0], [1], [0, 0, 1, 1], [], []>} : vector<256x128xf32>, vector<128x128xf32>, vector<256x128xf32> -> vector<256x128xf32>
    %76 = arith.addf %70, %75 : vector<256x128xf32>
    %c0_79 = arith.constant 0 : index
    %c1_80 = arith.constant 1 : index
    %c0_81 = arith.constant 0 : index
    %77 = vector.load %arg6[%c0_79, %c1_80, %c0_81] : memref<18x18x128xf32, #tpu.memory_space<vmem>>, vector<16x16x128xf32>
    %78 = vector.shape_cast %77 : vector<16x16x128xf32> to vector<256x128xf32>
    %c1_82 = arith.constant 1 : index
    %c0_83 = arith.constant 0 : index
    %c0_84 = arith.constant 0 : index
    %79 = vector.load %arg3[%c1_82, %c0_83, %c0_84] : memref<9x128x128xf32, #tpu.memory_space<vmem>>, vector<1x128x128xf32>
    %80 = vector.shape_cast %79 : vector<1x128x128xf32> to vector<128x128xf32>
    %cst_85 = arith.constant dense<0.000000e+00> : vector<256x128xf32>
    %81 = tpu.matmul %78, %80, %cst_85 {dimension_numbers = #tpu.dot_dimension_numbers<[1], [0], [0], [1], [0, 0, 1, 1], [], []>} : vector<256x128xf32>, vector<128x128xf32>, vector<256x128xf32> -> vector<256x128xf32>
    %82 = arith.addf %76, %81 : vector<256x128xf32>
    %c0_86 = arith.constant 0 : index
    %c2_87 = arith.constant 2 : index
    %c0_88 = arith.constant 0 : index
    %83 = vector.load %arg6[%c0_86, %c2_87, %c0_88] : memref<18x18x128xf32, #tpu.memory_space<vmem>>, vector<16x16x128xf32>
    %84 = vector.shape_cast %83 : vector<16x16x128xf32> to vector<256x128xf32>
    %c2_89 = arith.constant 2 : index
    %c0_90 = arith.constant 0 : index
    %c0_91 = arith.constant 0 : index
    %85 = vector.load %arg3[%c2_89, %c0_90, %c0_91] : memref<9x128x128xf32, #tpu.memory_space<vmem>>, vector<1x128x128xf32>
    %86 = vector.shape_cast %85 : vector<1x128x128xf32> to vector<128x128xf32>
    %cst_92 = arith.constant dense<0.000000e+00> : vector<256x128xf32>
    %87 = tpu.matmul %84, %86, %cst_92 {dimension_numbers = #tpu.dot_dimension_numbers<[1], [0], [0], [1], [0, 0, 1, 1], [], []>} : vector<256x128xf32>, vector<128x128xf32>, vector<256x128xf32> -> vector<256x128xf32>
    %88 = arith.addf %82, %87 : vector<256x128xf32>
    %c1_93 = arith.constant 1 : index
    %c0_94 = arith.constant 0 : index
    %c0_95 = arith.constant 0 : index
    %89 = vector.load %arg6[%c1_93, %c0_94, %c0_95] : memref<18x18x128xf32, #tpu.memory_space<vmem>>, vector<16x16x128xf32>
    %90 = vector.shape_cast %89 : vector<16x16x128xf32> to vector<256x128xf32>
    %c3_96 = arith.constant 3 : index
    %c0_97 = arith.constant 0 : index
    %c0_98 = arith.constant 0 : index
    %91 = vector.load %arg3[%c3_96, %c0_97, %c0_98] : memref<9x128x128xf32, #tpu.memory_space<vmem>>, vector<1x128x128xf32>
    %92 = vector.shape_cast %91 : vector<1x128x128xf32> to vector<128x128xf32>
    %cst_99 = arith.constant dense<0.000000e+00> : vector<256x128xf32>
    %93 = tpu.matmul %90, %92, %cst_99 {dimension_numbers = #tpu.dot_dimension_numbers<[1], [0], [0], [1], [0, 0, 1, 1], [], []>} : vector<256x128xf32>, vector<128x128xf32>, vector<256x128xf32> -> vector<256x128xf32>
    %94 = arith.addf %88, %93 : vector<256x128xf32>
    %c1_100 = arith.constant 1 : index
    %c1_101 = arith.constant 1 : index
    %c0_102 = arith.constant 0 : index
    %95 = vector.load %arg6[%c1_100, %c1_101, %c0_102] : memref<18x18x128xf32, #tpu.memory_space<vmem>>, vector<16x16x128xf32>
    %96 = vector.shape_cast %95 : vector<16x16x128xf32> to vector<256x128xf32>
    %c4_103 = arith.constant 4 : index
    %c0_104 = arith.constant 0 : index
    %c0_105 = arith.constant 0 : index
    %97 = vector.load %arg3[%c4_103, %c0_104, %c0_105] : memref<9x128x128xf32, #tpu.memory_space<vmem>>, vector<1x128x128xf32>
    %98 = vector.shape_cast %97 : vector<1x128x128xf32> to vector<128x128xf32>
    %cst_106 = arith.constant dense<0.000000e+00> : vector<256x128xf32>
    %99 = tpu.matmul %96, %98, %cst_106 {dimension_numbers = #tpu.dot_dimension_numbers<[1], [0], [0], [1], [0, 0, 1, 1], [], []>} : vector<256x128xf32>, vector<128x128xf32>, vector<256x128xf32> -> vector<256x128xf32>
    %100 = arith.addf %94, %99 : vector<256x128xf32>
    %c1_107 = arith.constant 1 : index
    %c2_108 = arith.constant 2 : index
    %c0_109 = arith.constant 0 : index
    %101 = vector.load %arg6[%c1_107, %c2_108, %c0_109] : memref<18x18x128xf32, #tpu.memory_space<vmem>>, vector<16x16x128xf32>
    %102 = vector.shape_cast %101 : vector<16x16x128xf32> to vector<256x128xf32>
    %c5_110 = arith.constant 5 : index
    %c0_111 = arith.constant 0 : index
    %c0_112 = arith.constant 0 : index
    %103 = vector.load %arg3[%c5_110, %c0_111, %c0_112] : memref<9x128x128xf32, #tpu.memory_space<vmem>>, vector<1x128x128xf32>
    %104 = vector.shape_cast %103 : vector<1x128x128xf32> to vector<128x128xf32>
    %cst_113 = arith.constant dense<0.000000e+00> : vector<256x128xf32>
    %105 = tpu.matmul %102, %104, %cst_113 {dimension_numbers = #tpu.dot_dimension_numbers<[1], [0], [0], [1], [0, 0, 1, 1], [], []>} : vector<256x128xf32>, vector<128x128xf32>, vector<256x128xf32> -> vector<256x128xf32>
    %106 = arith.addf %100, %105 : vector<256x128xf32>
    %c2_114 = arith.constant 2 : index
    %c0_115 = arith.constant 0 : index
    %c0_116 = arith.constant 0 : index
    %107 = vector.load %arg6[%c2_114, %c0_115, %c0_116] : memref<18x18x128xf32, #tpu.memory_space<vmem>>, vector<16x16x128xf32>
    %108 = vector.shape_cast %107 : vector<16x16x128xf32> to vector<256x128xf32>
    %c6_117 = arith.constant 6 : index
    %c0_118 = arith.constant 0 : index
    %c0_119 = arith.constant 0 : index
    %109 = vector.load %arg3[%c6_117, %c0_118, %c0_119] : memref<9x128x128xf32, #tpu.memory_space<vmem>>, vector<1x128x128xf32>
    %110 = vector.shape_cast %109 : vector<1x128x128xf32> to vector<128x128xf32>
    %cst_120 = arith.constant dense<0.000000e+00> : vector<256x128xf32>
    %111 = tpu.matmul %108, %110, %cst_120 {dimension_numbers = #tpu.dot_dimension_numbers<[1], [0], [0], [1], [0, 0, 1, 1], [], []>} : vector<256x128xf32>, vector<128x128xf32>, vector<256x128xf32> -> vector<256x128xf32>
    %112 = arith.addf %106, %111 : vector<256x128xf32>
    %c2_121 = arith.constant 2 : index
    %c1_122 = arith.constant 1 : index
    %c0_123 = arith.constant 0 : index
    %113 = vector.load %arg6[%c2_121, %c1_122, %c0_123] : memref<18x18x128xf32, #tpu.memory_space<vmem>>, vector<16x16x128xf32>
    %114 = vector.shape_cast %113 : vector<16x16x128xf32> to vector<256x128xf32>
    %c7_124 = arith.constant 7 : index
    %c0_125 = arith.constant 0 : index
    %c0_126 = arith.constant 0 : index
    %115 = vector.load %arg3[%c7_124, %c0_125, %c0_126] : memref<9x128x128xf32, #tpu.memory_space<vmem>>, vector<1x128x128xf32>
    %116 = vector.shape_cast %115 : vector<1x128x128xf32> to vector<128x128xf32>
    %cst_127 = arith.constant dense<0.000000e+00> : vector<256x128xf32>
    %117 = tpu.matmul %114, %116, %cst_127 {dimension_numbers = #tpu.dot_dimension_numbers<[1], [0], [0], [1], [0, 0, 1, 1], [], []>} : vector<256x128xf32>, vector<128x128xf32>, vector<256x128xf32> -> vector<256x128xf32>
    %118 = arith.addf %112, %117 : vector<256x128xf32>
    %c2_128 = arith.constant 2 : index
    %c2_129 = arith.constant 2 : index
    %c0_130 = arith.constant 0 : index
    %119 = vector.load %arg6[%c2_128, %c2_129, %c0_130] : memref<18x18x128xf32, #tpu.memory_space<vmem>>, vector<16x16x128xf32>
    %120 = vector.shape_cast %119 : vector<16x16x128xf32> to vector<256x128xf32>
    %c8_131 = arith.constant 8 : index
    %c0_132 = arith.constant 0 : index
    %c0_133 = arith.constant 0 : index
    %121 = vector.load %arg3[%c8_131, %c0_132, %c0_133] : memref<9x128x128xf32, #tpu.memory_space<vmem>>, vector<1x128x128xf32>
    %122 = vector.shape_cast %121 : vector<1x128x128xf32> to vector<128x128xf32>
    %cst_134 = arith.constant dense<0.000000e+00> : vector<256x128xf32>
    %123 = tpu.matmul %120, %122, %cst_134 {dimension_numbers = #tpu.dot_dimension_numbers<[1], [0], [0], [1], [0, 0, 1, 1], [], []>} : vector<256x128xf32>, vector<128x128xf32>, vector<256x128xf32> -> vector<256x128xf32>
    %124 = arith.addf %118, %123 : vector<256x128xf32>
    %cst_135 = arith.constant 0.000000e+00 : f32
    %125 = vector.broadcast %cst_135 : f32 to vector<256x128xf32>
    %126 = arith.maximumf %124, %125 : vector<256x128xf32>
    %c0_136 = arith.constant 0 : index
    %c0_137 = arith.constant 0 : index
    %127 = vector.load %arg7[%c0_136, %c0_137] : memref<256x128xf32, #tpu.memory_space<vmem>>, vector<256x128xf32>
    tpu.vector_store %arg7[%c0_136, %c0_137], %126 {strides = array<i32>} : memref<256x128xf32, #tpu.memory_space<vmem>>, vector<256x128xf32>,
    %c0_138 = arith.constant 0 : index
    %c0_139 = arith.constant 0 : index
    %128 = tpu.strided_load %arg7[%c0_138, %c0_139] {strides = array<i32: 2, 1>} : memref<256x128xf32, #tpu.memory_space<vmem>>, vector<128x128xf32>
    %c1_140 = arith.constant 1 : index
    %c0_141 = arith.constant 0 : index
    %129 = tpu.strided_load %arg7[%c1_140, %c0_141] {strides = array<i32: 2, 1>} : memref<256x128xf32, #tpu.memory_space<vmem>>, vector<128x128xf32>
    %130 = arith.maximumf %128, %129 : vector<128x128xf32>
    %131 = vector.shape_cast %130 : vector<128x128xf32> to vector<16x8x128xf32>
    %132 = vector.shape_cast %131 : vector<16x8x128xf32> to vector<8x2x8x128xf32>
    %133 = vector.extract_strided_slice %132 {offsets = [0, 0, 0, 0], sizes = [8, 1, 8, 128], strides = [1, 1, 1, 1]} : vector<8x2x8x128xf32> to vector<8x1x8x128xf32>
    %134 = vector.shape_cast %133 : vector<8x1x8x128xf32> to vector<8x8x128xf32>
    %135 = vector.extract_strided_slice %132 {offsets = [0, 1, 0, 0], sizes = [8, 1, 8, 128], strides = [1, 1, 1, 1]} : vector<8x2x8x128xf32> to vector<8x1x8x128xf32>
    %136 = vector.shape_cast %135 : vector<8x1x8x128xf32> to vector<8x8x128xf32>
    %137 = arith.maximumf %134, %136 : vector<8x8x128xf32>
    %138 = vector.shape_cast %137 : vector<8x8x128xf32> to vector<64x128xf32>
    %c0_142 = arith.constant 0 : index
    %c0_143 = arith.constant 0 : index
    %c0_144 = arith.constant 0 : index
    %139 = vector.load %arg4[%c0_142, %c0_143, %c0_144] : memref<1x64x128xf32, #tpu.memory_space<vmem>>, vector<1x64x128xf32>
    %140 = vector.shape_cast %139 : vector<1x64x128xf32> to vector<64x128xf32>
    %141 = vector.shape_cast %138 : vector<64x128xf32> to vector<1x64x128xf32>
    tpu.vector_store %arg4[%c0_142, %c0_143, %c0_144], %141 {strides = array<i32>} : memref<1x64x128xf32, #tpu.memory_space<vmem>>, vector<1x64x128xf32>,
    %cst_145 = arith.constant dense<0.000000e+00> : vector<128xf32>
    %142 = vector.multi_reduction <add>, %138, %cst_145 [0] : vector<64x128xf32> to vector<128xf32>
    %143 = vector.shape_cast %142 : vector<128xf32> to vector<1x128xf32>
    %c0_146 = arith.constant 0 : index
    %c0_147 = arith.constant 0 : index
    %c0_148 = arith.constant 0 : index
    %144 = vector.load %arg5[%c0_146, %c0_147, %c0_148] : memref<1x2x128xf32, #tpu.memory_space<vmem>>, vector<1x1x128xf32>
    %145 = vector.shape_cast %144 : vector<1x1x128xf32> to vector<1x128xf32>
    %146 = vector.shape_cast %143 : vector<1x128xf32> to vector<1x1x128xf32>
    tpu.vector_store %arg5[%c0_146, %c0_147, %c0_148], %146 {strides = array<i32>} : memref<1x2x128xf32, #tpu.memory_space<vmem>>, vector<1x1x128xf32>,
    %147 = arith.mulf %138, %138 : vector<64x128xf32>
    %cst_149 = arith.constant dense<0.000000e+00> : vector<128xf32>
    %148 = vector.multi_reduction <add>, %147, %cst_149 [0] : vector<64x128xf32> to vector<128xf32>
    %149 = vector.shape_cast %148 : vector<128xf32> to vector<1x128xf32>
    %c0_150 = arith.constant 0 : index
    %c1_151 = arith.constant 1 : index
    %c0_152 = arith.constant 0 : index
    %150 = vector.load %arg5[%c0_150, %c1_151, %c0_152] : memref<1x2x128xf32, #tpu.memory_space<vmem>>, vector<1x1x128xf32>
    %151 = vector.shape_cast %150 : vector<1x1x128xf32> to vector<1x128xf32>
    %152 = vector.shape_cast %149 : vector<1x128xf32> to vector<1x1x128xf32>
    tpu.vector_store %arg5[%c0_150, %c1_151, %c0_152], %152 {strides = array<i32>} : memref<1x2x128xf32, #tpu.memory_space<vmem>>, vector<1x1x128xf32>,
    return
  }
  func.func @transform_0(%arg0: i32) -> (i32, i32, i32, i32) {
    %c0_i32 = arith.constant 0 : i32
    %c0_i32_0 = arith.constant 0 : i32
    %c0_i32_1 = arith.constant 0 : i32
    %c0_i32_2 = arith.constant 0 : i32
    return %arg0, %c0_i32, %c0_i32_0, %c0_i32_1 : i32, i32, i32, i32
  }
  func.func @transform_1(%arg0: i32) -> (i32, i32, i32) {
    %c0_i32 = arith.constant 0 : i32
    %c0_i32_0 = arith.constant 0 : i32
    %c0_i32_1 = arith.constant 0 : i32
    %c0_i32_2 = arith.constant 0 : i32
    return %c0_i32, %c0_i32_0, %c0_i32_1 : i32, i32, i32
  }
  func.func @transform_2(%arg0: i32) -> (i32, i32, i32) {
    %c0_i32 = arith.constant 0 : i32
    %c0_i32_0 = arith.constant 0 : i32
    %c0_i32_1 = arith.constant 0 : i32
    %c0_i32_2 = arith.constant 0 : i32
    return %c0_i32, %c0_i32_0, %c0_i32_1 : i32, i32, i32
  }
  func.func @transform_3(%arg0: i32) -> (i32, i32, i32) {
    %c0_i32 = arith.constant 0 : i32
    %c0_i32_0 = arith.constant 0 : i32
    %c0_i32_1 = arith.constant 0 : i32
    return %arg0, %c0_i32, %c0_i32_0 : i32, i32, i32
  }
  func.func @transform_4(%arg0: i32) -> (i32, i32, i32) {
    %c0_i32 = arith.constant 0 : i32
    %c0_i32_0 = arith.constant 0 : i32
    %c0_i32_1 = arith.constant 0 : i32
    return %arg0, %c0_i32, %c0_i32_0 : i32, i32, i32
  }
}

</mosaic_0001>

<bundles_post_ra>
// kernel: simple_block_forward.3
= control target key start
LH: loop header
LB: loop body
LE: loop exit
PB: predicated region body
PF: predicated region fallthrough
CT: control target
= control target key end

     0   :  { %s220_s0 = inlined_call_operand.vmem [shape: f32[128,128], index: 0, kind: input, shape index: {}]   ;;  %s221_s1 = inlined_call_operand.vmem [shape: f32[1,128], index: 1, kind: input, shape index: {}]   ;;  %s222_s2 = inlined_call_operand.vmem [shape: f32[1,128], index: 2, kind: input, shape index: {}]   ;;  %s223_s3 = inlined_call_operand.vmem [shape: f32[128,128], index: 3, kind: output, shape index: {}]  }
   0x1   :  { %v14_v0 = vld [vmem:[%s220_s0] sm:$0xff]  ;;  %v15_v4 = vld [vmem:[%s220_s0 + $0x8] sm:$0xff]  ;;  %v16_v5 = vld [vmem:[%s220_s0 + $0x10] sm:$0xff] }
   0x2   :  { %v96_v1 = vld [vmem:[%s221_s1] ss:$0 sm:$0xff]  ;;  %v17_v6 = vld [vmem:[%s220_s0 + $0x18] sm:$0xff]  ;;  %v19_v11 = vld [vmem:[%s220_s0 + $0x28] sm:$0xff] }
   0x3   :  { %v97_v2 = vld [vmem:[%s222_s2] ss:$0 sm:$0xff]  ;;  %v37_v3 = vmul.f32 %v96_v1, %v14_v0  ;;  %v38_v7 = vmul.f32 %v96_v1, %v15_v4  ;;  %v39_v8 = vmul.f32 %v96_v1, %v16_v5  ;;  %v40_v9 = vmul.f32 %v96_v1, %v17_v6  ;;  %v20_v12 = vld [vmem:[%s220_s0 + $0x30] sm:$0xff]  ;;  %v21_v17 = vld [vmem:[%s220_s0 + $0x38] sm:$0xff] }
   0x4   :  { %v18_v10 = vld [vmem:[%s220_s0 + $0x20] sm:$0xff]  ;;  %v42_v15 = vmul.f32 %v96_v1, %v19_v11  ;;  %v43_v16 = vmul.f32 %v96_v1, %v20_v12  ;;  %v23_v19 = vld [vmem:[%s220_s0 + $0x48] sm:$0xff]  ;;  %v44_v23 = vmul.f32 %v96_v1, %v21_v17  ;;  %v24_v24 = vld [vmem:[%s220_s0 + $0x50] sm:$0xff] }
   0x5   :  { %v60_v13 = vadd.f32 %v97_v2, %v37_v3  ;;  %v41_v14 = vmul.f32 %v96_v1, %v18_v10  ;;  %v22_v18 = vld [vmem:[%s220_s0 + $0x40] sm:$0xff]  ;;  %v61_v20 = vadd.f32 %v97_v2, %v38_v7  ;;  %v62_v21 = vadd.f32 %v97_v2, %v39_v8  ;;  %v25_v25 = vld [vmem:[%s220_s0 + $0x58] sm:$0xff]  ;;  %v27_v31 = vld [vmem:[%s220_s0 + $0x68] sm:$0xff] }
   0x6   :  { %v63_v22 = vadd.f32 %v97_v2, %v40_v9  ;;  %v26_v26 = vld [vmem:[%s220_s0 + $0x60] sm:$0xff]  ;;  %v65_v28 = vadd.f32 %v97_v2, %v42_v15  ;;  %v66_v29 = vadd.f32 %v97_v2, %v43_v16  ;;  %v45_v30 = vmul.f32 %v96_v1, %v22_v18  ;;  %v28_v32 = vld [vmem:[%s220_s0 + $0x70] sm:$0xff]  ;;  %v29_v33 = vld [vmem:[%s220_s0 + $0x78] sm:$0xff] }
   0x7   :  { %76 = vst [vmem:[%s223_s3] sm:$0xff] %v60_v13  ;;  %v64_v27 = vadd.f32 %v97_v2, %v41_v14  ;;  %77 = vst [vmem:[%s223_s3 + $0x8] sm:$0xff] %v61_v20  ;;  %v67_v34 = vadd.f32 %v97_v2, %v44_v23  ;;  %v46_v35 = vmul.f32 %v96_v1, %v23_v19 }
   0x8   :  { %78 = vst [vmem:[%s223_s3 + $0x10] sm:$0xff] %v62_v21  ;;  %79 = vst [vmem:[%s223_s3 + $0x18] sm:$0xff] %v63_v22  ;;  %v47_v36 = vmul.f32 %v96_v1, %v24_v24  ;;  %v48_v37 = vmul.f32 %v96_v1, %v25_v25  ;;  %v68_v38 = vadd.f32 %v97_v2, %v45_v30 }
   0x9   :  { %80 = vst [vmem:[%s223_s3 + $0x20] sm:$0xff] %v64_v27  ;;  %81 = vst [vmem:[%s223_s3 + $0x28] sm:$0xff] %v65_v28  ;;  %v49_v39 = vmul.f32 %v96_v1, %v26_v26  ;;  %v50_v40 = vmul.f32 %v96_v1, %v27_v31  ;;  %v51_v41 = vmul.f32 %v96_v1, %v28_v32 }
   0xa   :  { %82 = vst [vmem:[%s223_s3 + $0x30] sm:$0xff] %v66_v29  ;;  %83 = vst [vmem:[%s223_s3 + $0x38] sm:$0xff] %v67_v34  ;;  %v69_v42 = vadd.f32 %v97_v2, %v46_v35  ;;  %v70_v43 = vadd.f32 %v97_v2, %v47_v36  ;;  %v71_v44 = vadd.f32 %v97_v2, %v48_v37 }
   0xb   :  { %v52_v45 = vmul.f32 %v96_v1, %v29_v33  ;;  %84 = vst [vmem:[%s223_s3 + $0x40] sm:$0xff] %v68_v38  ;;  %v72_v46 = vadd.f32 %v97_v2, %v49_v39  ;;  %v73_v47 = vadd.f32 %v97_v2, %v50_v40  ;;  %v74_v48 = vadd.f32 %v97_v2, %v51_v41 }
   0xc   :  { %85 = vst [vmem:[%s223_s3 + $0x48] sm:$0xff] %v69_v42  ;;  %86 = vst [vmem:[%s223_s3 + $0x50] sm:$0xff] %v70_v43 }
   0xd   :  { %87 = vst [vmem:[%s223_s3 + $0x58] sm:$0xff] %v71_v44  ;;  %v75_v49 = vadd.f32 %v97_v2, %v52_v45  ;;  %88 = vst [vmem:[%s223_s3 + $0x60] sm:$0xff] %v72_v46 }
   0xe   :  { %89 = vst [vmem:[%s223_s3 + $0x68] sm:$0xff] %v73_v47  ;;  %90 = vst [vmem:[%s223_s3 + $0x70] sm:$0xff] %v74_v48 }
   0xf   :  { %91 = vst [vmem:[%s223_s3 + $0x78] sm:$0xff] %v75_v49 }

// kernel: simple_block_forward.2
= control target key start
LH: loop header
LB: loop body
LE: loop exit
PB: predicated region body
PF: predicated region fallthrough
CT: control target
= control target key end

     0   :  { %s10108_s15 = smov 0   ;;  %s11993_s0 = inlined_call_operand.vmem [shape: f32[2,18,18,8], index: 0, kind: input, shape index: {}]   ;;  %s11994_s1 = inlined_call_operand.vmem [shape: f32[9,8,128], index: 1, kind: input, shape index: {}]   ;;  %s11995_s2 = inlined_call_operand.vmem [shape: f32[9,128,128], index: 2, kind: input, shape index: {}]   ;;  %s11996_s3 = inlined_call_operand.vmem [shape: f32[2,64,128], index: 3, kind: output, shape index: {0}]   ;;  %s11997_s4 = inlined_call_operand.vmem [shape: f32[2,2,128], index: 4, kind: output, shape index: {1}]  }
   0x1 LB: > { %s6720_s16 = sadd.s32 4294967295, %s10080_s15   ;;  %p6724_p0 = scmp.ge.s32.totalorder %s10080_s15, 1  ;;  %s10080_s15 = sphi %s10108_s15, %s15_s15  }
   0x2   : > { %p165_p1 = scmp.lt.s32.totalorder %s10080_s15, 3 }
   0x4   : > { %p166_p2 = pnand %p6724_p0, %p165_p1 }
   0x6   : > { %169 = sbr.rel (%p166_p2) target bundleno = 1561 (0x619), region = 32 }
   0xd   : > { %v6729_v0 = vld [vmem:[%s11994_s1 + $0x8] sm:$0xff]  ;;  %p195_p3 = scmp.lt.s32.totalorder %s6720_s16, 1  ;;  %v241_v1 = vld [vmem:[%s11994_s1] sm:$0xff]  ;;  %vm276_vm0 = vcmask 64512   ;;  %v10139_v5 = vld [vmem:[%s11994_s1 + $0x10] sm:$0xff] }
   0xe   : > { %8077 = vmatprep.subr.mxu0 %v6729_v0  ;;  %v10299_v38 = vld [vmem:[%s11994_s1 + $0x18] sm:$0xff] }
   0xf   : > { %8078 = vmatpush3.msra.mxu0 %v6729_v0  ;;  %s12239_s16 = smov (!%p195_p3, %s6720_s16), 1 }
  0x10   : > { %8127 = vmatprep.subr.mxu0 %v241_v1  ;;  %s10063_s21 = smul.u32 432, %s12239_s16  ;;  %s7347_s14 = sshll.u32 %s12239_s16, 6 }
  0x11   : > { %s11952_s19 = scalar_lea.vmem %s11996_s3, %s7347_s14 }
  0x12   : > { %s10128_s24 = scalar_lea.vmem %s11993_s0, %s10063_s21 }
  0x13   : > { %v242_v2 = vld [vmem:[%s10128_s24 + $0x1] sm:$0xff]  ;;  %v243_v3 = vld [vmem:[%s10128_s24 + $0x9] sm:$0xff]  ;;  %v10133_v4 = vld [vmem:[%s10128_s24 + $0x19] sm:$0xff] }
  0x14   : > { %8079 = vmatprep.mubr.msk.f32.mxu0 %vm276_vm0, %v242_v2  ;;  %v10145_v6 = vld [vmem:[%s10128_s24 + $0x21] sm:$0xff]  ;;  %v10148_v7 = vld [vmem:[%s10128_s24 + $0x31] sm:$0xff]  ;;  %v10156_v8 = vld [vmem:[%s10128_s24 + $0x39] sm:$0xff] }
  0x15   : > { %8080 = vmatmul.mubr.msk.f32.vlgmr.msra.gmra.mrb[0].mxu0 %vm276_vm0, %v243_v3  ;;  %v10159_v9 = vld [vmem:[%s10128_s24 + $0x49] sm:$0xff]  ;;  %v10166_v10 = vld [vmem:[%s10128_s24 + $0x51] sm:$0xff]  ;;  %v10169_v11 = vld [vmem:[%s10128_s24 + $0x61] sm:$0xff] }
  0x16   : > { %8128 = vmatpush3.msra.mxu0 %v241_v1  ;;  %8082 = vmatprep.mubr.msk.f32.mxu0 %vm276_vm0, %v10133_v4  ;;  %v10176_v12 = vld [vmem:[%s10128_s24 + $0x69] sm:$0xff]  ;;  %v10179_v13 = vld [vmem:[%s10128_s24 + $0x79] sm:$0xff]  ;;  %v10186_v14 = vld [vmem:[%s10128_s24 + $0x81] sm:$0xff] }
  0x17   : > { %8177 = vmatprep.subr.mxu0 %v10139_v5  ;;  %v10189_v15 = vld [vmem:[%s10128_s24 + $0x91] sm:$0xff]  ;;  %v10196_v16 = vld [vmem:[%s10128_s24 + $0x99] sm:$0xff]  ;;  %v10199_v17 = vld [vmem:[%s10128_s24 + $0xa9] sm:$0xff] }
  0x18   : > { %v10206_v18 = vld [vmem:[%s10128_s24 + $0xb1] sm:$0xff]  ;;  %v10209_v19 = vld [vmem:[%s10128_s24 + $0xc1] sm:$0xff]  ;;  %v10216_v20 = vld [vmem:[%s10128_s24 + $0xc9] sm:$0xff] }
  0x19   : > { %8083 = vmatmul.mubr.msk.f32.gmra.mrb[2].mxu0 %vm276_vm0, %v10145_v6  ;;  %v10219_v21 = vld [vmem:[%s10128_s24 + $0xd9] sm:$0xff]  ;;  %v10226_v22 = vld [vmem:[%s10128_s24 + $0xe1] sm:$0xff]  ;;  %v10229_v23 = vld [vmem:[%s10128_s24 + $0xf1] sm:$0xff] }
  0x1a   : > { %8085 = vmatprep.mubr.msk.f32.mxu0 %vm276_vm0, %v10148_v7  ;;  %v10236_v24 = vld [vmem:[%s10128_s24 + $0xf9] sm:$0xff]  ;;  %v10239_v25 = vld [vmem:[%s10128_s24 + $0x109] sm:$0xff]  ;;  %v10246_v26 = vld [vmem:[%s10128_s24 + $0x111] sm:$0xff] }
  0x1b   : > { %v10249_v27 = vld [vmem:[%s10128_s24 + $0x121] sm:$0xff]  ;;  %v10256_v28 = vld [vmem:[%s10128_s24 + $0x129] sm:$0xff]  ;;  %v10259_v29 = vld [vmem:[%s10128_s24 + $0x139] sm:$0xff] }
  0x1c   : > { %12088 = vst [vmem:[#allocation4_spill] sm:$0xff] %v10249_v27  ;;  %12089 = vst [vmem:[#allocation5_spill] sm:$0xff] %v10256_v28  ;;  %v10266_v30 = vld [vmem:[%s10128_s24 + $0x141] sm:$0xff]  ;;  %v10269_v31 = vld [vmem:[%s10128_s24 + $0x151] sm:$0xff] }
  0x1d   : > { %8086 = vmatmul.mubr.msk.f32.gmra.mrb[4].mxu0 %vm276_vm0, %v10156_v8  ;;  %12090 = vst [vmem:[#allocation6_spill] sm:$0xff] %v10259_v29  ;;  %12091 = vst [vmem:[#allocation7_spill] sm:$0xff] %v10266_v30  ;;  %v10276_v32 = vld [vmem:[%s10128_s24 + $0x159] sm:$0xff]  ;;  %v10279_v33 = vld [vmem:[%s10128_s24 + $0x169] sm:$0xff] }
  0x1e   : > { %8088 = vmatprep.mubr.msk.f32.mxu0 %vm276_vm0, %v10159_v9  ;;  %12092 = vst [vmem:[#allocation8_spill] sm:$0xff] %v10269_v31  ;;  %12093 = vst [vmem:[#allocation9_spill] sm:$0xff] %v10276_v32  ;;  %v10286_v34 = vld [vmem:[%s10128_s24 + $0x171] sm:$0xff]  ;;  %v209_v35 = vld [vmem:[%s10128_s24] sm:$0xff] }
  0x1f   : > { %12094 = vst [vmem:[#allocation10_spill] sm:$0xff] %v10279_v33  ;;  %12095 = vst [vmem:[#allocation11_spill] sm:$0xff] %v10286_v34  ;;  %v210_v36 = vld [vmem:[%s10128_s24 + $0x8] sm:$0xff]  ;;  %v10294_v37 = vld [vmem:[%s10128_s24 + $0x18] sm:$0xff] }
  0x20   : > { %v10306_v39 = vld [vmem:[%s10128_s24 + $0x20] sm:$0xff]  ;;  %v10309_v40 = vld [vmem:[%s10128_s24 + $0x30] sm:$0xff]  ;;  %v10317_v41 = vld [vmem:[%s10128_s24 + $0x38] sm:$0xff] }
  0x21   : > { %8089 = vmatmul.mubr.msk.f32.gmra.mrb[6].mxu0 %vm276_vm0, %v10166_v10  ;;  %v10320_v42 = vld [vmem:[%s10128_s24 + $0x48] sm:$0xff]  ;;  %v10327_v43 = vld [vmem:[%s10128_s24 + $0x50] sm:$0xff]  ;;  %v10330_v44 = vld [vmem:[%s10128_s24 + $0x60] sm:$0xff] }
  0x22   : > { %8091 = vmatprep.mubr.msk.f32.mxu0 %vm276_vm0, %v10169_v11  ;;  %v10337_v45 = vld [vmem:[%s10128_s24 + $0x68] sm:$0xff]  ;;  %v10340_v46 = vld [vmem:[%s10128_s24 + $0x78] sm:$0xff]  ;;  %v10347_v47 = vld [vmem:[%s10128_s24 + $0x80] sm:$0xff] }
  0x23   : > { %v10350_v48 = vld [vmem:[%s10128_s24 + $0x90] sm:$0xff]  ;;  %v10357_v49 = vld [vmem:[%s10128_s24 + $0x98] sm:$0xff]  ;;  %v10360_v50 = vld [vmem:[%s10128_s24 + $0xa8] sm:$0xff] }
  0x24   : > { %v10367_v51 = vld [vmem:[%s10128_s24 + $0xb0] sm:$0xff]  ;;  %v10370_v52 = vld [vmem:[%s10128_s24 + $0xc0] sm:$0xff]  ;;  %v10377_v53 = vld [vmem:[%s10128_s24 + $0xc8] sm:$0xff] }
  0x25   : > { %8092 = vmatmul.mubr.msk.f32.gmra.mrb[8].mxu0 %vm276_vm0, %v10176_v12  ;;  %v10380_v54 = vld [vmem:[%s10128_s24 + $0xd8] sm:$0xff]  ;;  %v10387_v55 = vld [vmem:[%s10128_s24 + $0xe0] sm:$0xff]  ;;  %v10390_v56 = vld [vmem:[%s10128_s24 + $0xf0] sm:$0xff] }
  0x26   : > { %8094 = vmatprep.mubr.msk.f32.mxu0 %vm276_vm0, %v10179_v13  ;;  %v10397_v57 = vld [vmem:[%s10128_s24 + $0xf8] sm:$0xff]  ;;  %v10400_v58 = vld [vmem:[%s10128_s24 + $0x108] sm:$0xff]  ;;  %v10407_v59 = vld [vmem:[%s10128_s24 + $0x110] sm:$0xff] }
  0x27   : > { %v10410_v60 = vld [vmem:[%s10128_s24 + $0x120] sm:$0xff]  ;;  %v10417_v61 = vld [vmem:[%s10128_s24 + $0x128] sm:$0xff]  ;;  %v10420_v62 = vld [vmem:[%s10128_s24 + $0x138] sm:$0xff] }
  0x28   : > { %v10427_v63 = vld [vmem:[%s10128_s24 + $0x140] sm:$0xff]  ;;  %v10430_v0 = vld [vmem:[%s10128_s24 + $0x150] sm:$0xff]  ;;  %v10437_v1 = vld [vmem:[%s10128_s24 + $0x158] sm:$0xff] }
  0x29   : > { %8095 = vmatmul.mubr.msk.f32.gmra.mrb[10].mxu0 %vm276_vm0, %v10186_v14  ;;  %v10440_v2 = vld [vmem:[%s10128_s24 + $0x168] sm:$0xff]  ;;  %v10447_v3 = vld [vmem:[%s10128_s24 + $0x170] sm:$0xff] }
  0x2a   : > { %8097 = vmatprep.mubr.msk.f32.mxu0 %vm276_vm0, %v10189_v15 }
  0x2d   : > { %8098 = vmatmul.mubr.msk.f32.gmra.mrb[12].mxu0 %vm276_vm0, %v10196_v16 }
  0x2e   : > { %8100 = vmatprep.mubr.msk.f32.mxu0 %vm276_vm0, %v10199_v17 }
  0x31   : > { %8101 = vmatmul.mubr.msk.f32.gmra.mrb[14].mxu0 %vm276_vm0, %v10206_v18 }
  0x32   : > { %8103 = vmatprep.mubr.msk.f32.mxu0 %vm276_vm0, %v10209_v19 }
  0x35   : > { %8104 = vmatmul.mubr.msk.f32.gmra.mrb[16].mxu0 %vm276_vm0, %v10216_v20 }
  0x36   : > { %8106 = vmatprep.mubr.msk.f32.mxu0 %vm276_vm0, %v10219_v21 }
  0x39   : > { %8107 = vmatmul.mubr.msk.f32.gmra.mrb[18].mxu0 %vm276_vm0, %v10226_v22 }
  0x3a   : > { %8109 = vmatprep.mubr.msk.f32.mxu0 %vm276_vm0, %v10229_v23 }
  0x3d   : > { %8110 = vmatmul.mubr.msk.f32.gmra.mrb[20].mxu0 %vm276_vm0, %v10236_v24 }
  0x3e   : > { %8112 = vmatprep.mubr.msk.f32.mxu0 %vm276_vm0, %v10239_v25 }
  0x41   : > { %8113 = vmatmul.mubr.msk.f32.gmra.mrb[22].mxu0 %vm276_vm0, %v10246_v26 }
  0x42   : > { %8115 = vmatprep.mubr.msk.f32.mxu0 %vm276_vm0, %v10249_v27 }
  0x45   : > { %8116 = vmatmul.mubr.msk.f32.gmra.mrb[24].mxu0 %vm276_vm0, %v10256_v28 }
  0x46   : > { %8118 = vmatprep.mubr.msk.f32.mxu0 %vm276_vm0, %v10259_v29 }
  0x49   : > { %8119 = vmatmul.mubr.msk.f32.gmra.mrb[26].mxu0 %vm276_vm0, %v10266_v30 }
  0x4a   : > { %8121 = vmatprep.mubr.msk.f32.mxu0 %vm276_vm0, %v10269_v31 }
  0x4d   : > { %8122 = vmatmul.mubr.msk.f32.gmra.mrb[28].mxu0 %vm276_vm0, %v10276_v32  ;;  %v10491_v32 = vld [vmem:[%s10128_s24 + $0x62] sm:$0xff] }
  0x4e   : > { %8124 = vmatprep.mubr.msk.f32.mxu0 %vm276_vm0, %v10279_v33  ;;  %v10470_v33 = vld [vmem:[%s10128_s24 + $0x32] sm:$0xff]  ;;  %12102 = vst [vmem:[#allocation18_spill] sm:$0xff] %v10491_v32 }
  0x4f   : > { %12098 = vst [vmem:[#allocation14_spill] sm:$0xff] %v10470_v33 }
  0x51   : > { %8125 = vmatmul.mubr.msk.f32.gmra.mrb[30].mxu0 %vm276_vm0, %v10286_v34  ;;  %v10460_v34 = vld [vmem:[%s11994_s1 + $0x20] sm:$0xff] }
  0x52   : > { %8129 = vmatprep.mubr.msk.f32.mxu0 %vm276_vm0, %v209_v35  ;;  %v920_v35 = vld [vmem:[%s10128_s24 + $0xa] sm:$0xff] }
  0x55   : > { %8130 = vmatmul.mubr.msk.f32.vlgmr.msra.gmra.mrb[0].mxu0 %vm276_vm0, %v210_v36  ;;  %v10455_v36 = vld [vmem:[%s10128_s24 + $0x1a] sm:$0xff] }
  0x56   : > { %8178 = vmatpush3.msra.mxu0 %v10139_v5  ;;  %8132 = vmatprep.mubr.msk.f32.mxu0 %vm276_vm0, %v10294_v37  ;;  %v919_v5 = vld [vmem:[%s10128_s24 + $0x2] sm:$0xff]  ;;  %12096 = vst [vmem:[#allocation12_spill] sm:$0xff] %v10455_v36 }
  0x57   : > { %8227 = vmatprep.subr.mxu0 %v10299_v38 }
  0x59   : > { %8133 = vmatmul.mubr.msk.f32.gmra.mrb[2].mxu0 %vm276_vm0, %v10306_v39 }
  0x5a   : > { %8135 = vmatprep.mubr.msk.f32.mxu0 %vm276_vm0, %v10309_v40 }
  0x5d   : > { %8136 = vmatmul.mubr.msk.f32.gmra.mrb[4].mxu0 %vm276_vm0, %v10317_v41 }
  0x5e   : > { %8138 = vmatprep.mubr.msk.f32.mxu0 %vm276_vm0, %v10320_v42 }
  0x61   : > { %8139 = vmatmul.mubr.msk.f32.gmra.mrb[6].mxu0 %vm276_vm0, %v10327_v43 }
  0x62   : > { %8141 = vmatprep.mubr.msk.f32.mxu0 %vm276_vm0, %v10330_v44 }
  0x65   : > { %8142 = vmatmul.mubr.msk.f32.gmra.mrb[8].mxu0 %vm276_vm0, %v10337_v45 }
  0x66   : > { %8144 = vmatprep.mubr.msk.f32.mxu0 %vm276_vm0, %v10340_v46 }
  0x69   : > { %8145 = vmatmul.mubr.msk.f32.gmra.mrb[10].mxu0 %vm276_vm0, %v10347_v47 }
  0x6a   : > { %8147 = vmatprep.mubr.msk.f32.mxu0 %vm276_vm0, %v10350_v48 }
  0x6d   : > { %8148 = vmatmul.mubr.msk.f32.gmra.mrb[12].mxu0 %vm276_vm0, %v10357_v49 }
  0x6e   : > { %8150 = vmatprep.mubr.msk.f32.mxu0 %vm276_vm0, %v10360_v50 }
  0x71   : > { %8151 = vmatmul.mubr.msk.f32.gmra.mrb[14].mxu0 %vm276_vm0, %v10367_v51 }
  0x72   : > { %8153 = vmatprep.mubr.msk.f32.mxu0 %vm276_vm0, %v10370_v52 }
  0x75   : > { %8154 = vmatmul.mubr.msk.f32.gmra.mrb[16].mxu0 %vm276_vm0, %v10377_v53 }
  0x76   : > { %8156 = vmatprep.mubr.msk.f32.mxu0 %vm276_vm0, %v10380_v54 }
  0x79   : > { %8157 = vmatmul.mubr.msk.f32.gmra.mrb[18].mxu0 %vm276_vm0, %v10387_v55 }
  0x7a   : > { %8159 = vmatprep.mubr.msk.f32.mxu0 %vm276_vm0, %v10390_v56 }
  0x7d   : > { %8160 = vmatmul.mubr.msk.f32.gmra.mrb[20].mxu0 %vm276_vm0, %v10397_v57 }
  0x7e   : > { %8162 = vmatprep.mubr.msk.f32.mxu0 %vm276_vm0, %v10400_v58 }
  0x81   : > { %8163 = vmatmul.mubr.msk.f32.gmra.mrb[22].mxu0 %vm276_vm0, %v10407_v59 }
  0x82   : > { %8165 = vmatprep.mubr.msk.f32.mxu0 %vm276_vm0, %v10410_v60 }
  0x85   : > { %8166 = vmatmul.mubr.msk.f32.gmra.mrb[24].mxu0 %vm276_vm0, %v10417_v61 }
  0x86   : > { %8168 = vmatprep.mubr.msk.f32.mxu0 %vm276_vm0, %v10420_v62 }
  0x89   : > { %8169 = vmatmul.mubr.msk.f32.gmra.mrb[26].mxu0 %vm276_vm0, %v10427_v63 }
  0x8a   : > { %8171 = vmatprep.mubr.msk.f32.mxu0 %vm276_vm0, %v10430_v0 }
  0x8d   : > { %8172 = vmatmul.mubr.msk.f32.gmra.mrb[28].mxu0 %vm276_vm0, %v10437_v1 }
  0x8e   : > { %8174 = vmatprep.mubr.msk.f32.mxu0 %vm276_vm0, %v10440_v2 }
  0x91   : > { %8175 = vmatmul.mubr.msk.f32.gmra.mrb[30].mxu0 %vm276_vm0, %v10447_v3 }
  0x92   : > { %8179 = vmatprep.mubr.msk.f32.mxu0 %vm276_vm0, %v919_v5  ;;  %v10467_v5 = vld [vmem:[%s10128_s24 + $0x22] sm:$0xff] }
  0x93   : > { %12097 = vst [vmem:[#allocation13_spill] sm:$0xff] %v10467_v5 }
  0x95   : > { %8180 = vmatmul.mubr.msk.f32.vlgmr.msra.gmra.mrb[0].mxu0 %vm276_vm0, %v920_v35  ;;  %v10478_v35 = vld [vmem:[%s10128_s24 + $0x3a] sm:$0xff] }
  0x96   : > { %8228 = vmatpush3.msra.mxu0 %v10299_v38  ;;  %8182 = vmatprep.mubr.msk.f32.mxu0 %vm276_vm0, %v10455_v36  ;;  %12099 = vst [vmem:[#allocation15_spill] sm:$0xff] %v10478_v35  ;;  %v10481_v38 = vld [vmem:[%s10128_s24 + $0x4a] sm:$0xff]  ;;  %v10488_v36 = vld [vmem:[%s10128_s24 + $0x52] sm:$0xff] }
  0x97   : > { %8277 = vmatprep.subr.mxu0 %v10460_v34  ;;  %12100 = vst [vmem:[#allocation16_spill] sm:$0xff] %v10481_v38  ;;  %12101 = vst [vmem:[#allocation17_spill] sm:$0xff] %v10488_v36 }
  0x99   : > { %8183 = vmatmul.mubr.msk.f32.gmra.mrb[2].mxu0 %vm276_vm0, %v10467_v5  ;;  %v10501_v5 = vld [vmem:[%s10128_s24 + $0x7a] sm:$0xff] }
  0x9a   : > { %8185 = vmatprep.mubr.msk.f32.mxu0 %vm276_vm0, %v10470_v33  ;;  %v10498_v33 = vld [vmem:[%s10128_s24 + $0x6a] sm:$0xff]  ;;  %12104 = vst [vmem:[#allocation20_spill] sm:$0xff] %v10501_v5 }
  0x9b   : > { %12103 = vst [vmem:[#allocation19_spill] sm:$0xff] %v10498_v33 }
  0x9d   : > { %8186 = vmatmul.mubr.msk.f32.gmra.mrb[4].mxu0 %vm276_vm0, %v10478_v35  ;;  %v10511_v35 = vld [vmem:[%s10128_s24 + $0x92] sm:$0xff] }
  0x9e   : > { %8188 = vmatprep.mubr.msk.f32.mxu0 %vm276_vm0, %v10481_v38  ;;  %v10508_v38 = vld [vmem:[%s10128_s24 + $0x82] sm:$0xff]  ;;  %12106 = vst [vmem:[#allocation22_spill] sm:$0xff] %v10511_v35 }
  0x9f   : > { %12105 = vst [vmem:[#allocation21_spill] sm:$0xff] %v10508_v38 }
  0xa1   : > { %8189 = vmatmul.mubr.msk.f32.gmra.mrb[6].mxu0 %vm276_vm0, %v10488_v36  ;;  %v10521_v36 = vld [vmem:[%s10128_s24 + $0xaa] sm:$0xff] }
  0xa2   : > { %8191 = vmatprep.mubr.msk.f32.mxu0 %vm276_vm0, %v10491_v32  ;;  %v10518_v32 = vld [vmem:[%s10128_s24 + $0x9a] sm:$0xff]  ;;  %12108 = vst [vmem:[#allocation24_spill] sm:$0xff] %v10521_v36 }
  0xa3   : > { %12107 = vst [vmem:[#allocation23_spill] sm:$0xff] %v10518_v32 }
  0xa5   : > { %8192 = vmatmul.mubr.msk.f32.gmra.mrb[8].mxu0 %vm276_vm0, %v10498_v33  ;;  %v10531_v33 = vld [vmem:[%s10128_s24 + $0xc2] sm:$0xff] }
  0xa6   : > { %8194 = vmatprep.mubr.msk.f32.mxu0 %vm276_vm0, %v10501_v5  ;;  %v10528_v5 = vld [vmem:[%s10128_s24 + $0xb2] sm:$0xff]  ;;  %12110 = vst [vmem:[#allocation26_spill] sm:$0xff] %v10531_v33 }
  0xa7   : > { %12109 = vst [vmem:[#allocation25_spill] sm:$0xff] %v10528_v5 }
  0xa9   : > { %8195 = vmatmul.mubr.msk.f32.gmra.mrb[10].mxu0 %vm276_vm0, %v10508_v38  ;;  %v10541_v38 = vld [vmem:[%s10128_s24 + $0xda] sm:$0xff] }
  0xaa   : > { %8197 = vmatprep.mubr.msk.f32.mxu0 %vm276_vm0, %v10511_v35  ;;  %v10538_v35 = vld [vmem:[%s10128_s24 + $0xca] sm:$0xff]  ;;  %12112 = vst [vmem:[#allocation28_spill] sm:$0xff] %v10541_v38 }
  0xab   : > { %12111 = vst [vmem:[#allocation27_spill] sm:$0xff] %v10538_v35 }
  0xad   : > { %8198 = vmatmul.mubr.msk.f32.gmra.mrb[12].mxu0 %vm276_vm0, %v10518_v32  ;;  %v10551_v32 = vld [vmem:[%s10128_s24 + $0xf2] sm:$0xff] }
  0xae   : > { %8200 = vmatprep.mubr.msk.f32.mxu0 %vm276_vm0, %v10521_v36  ;;  %v10548_v36 = vld [vmem:[%s10128_s24 + $0xe2] sm:$0xff]  ;;  %12114 = vst [vmem:[#allocation30_spill] sm:$0xff] %v10551_v32 }
  0xaf   : > { %12113 = vst [vmem:[#allocation29_spill] sm:$0xff] %v10548_v36 }
  0xb1   : > { %8201 = vmatmul.mubr.msk.f32.gmra.mrb[14].mxu0 %vm276_vm0, %v10528_v5  ;;  %v10561_v5 = vld [vmem:[%s10128_s24 + $0x10a] sm:$0xff] }
  0xb2   : > { %8203 = vmatprep.mubr.msk.f32.mxu0 %vm276_vm0, %v10531_v33  ;;  %v10558_v33 = vld [vmem:[%s10128_s24 + $0xfa] sm:$0xff]  ;;  %12116 = vst [vmem:[#allocation32_spill] sm:$0xff] %v10561_v5 }
  0xb3   : > { %12115 = vst [vmem:[#allocation31_spill] sm:$0xff] %v10558_v33 }
  0xb5   : > { %8204 = vmatmul.mubr.msk.f32.gmra.mrb[16].mxu0 %vm276_vm0, %v10538_v35  ;;  %v10571_v35 = vld [vmem:[%s10128_s24 + $0x122] sm:$0xff] }
  0xb6   : > { %8206 = vmatprep.mubr.msk.f32.mxu0 %vm276_vm0, %v10541_v38  ;;  %v10568_v38 = vld [vmem:[%s10128_s24 + $0x112] sm:$0xff]  ;;  %12118 = vst [vmem:[#allocation34_spill] sm:$0xff] %v10571_v35 }
  0xb7   : > { %12117 = vst [vmem:[#allocation33_spill] sm:$0xff] %v10568_v38 }
  0xb9   : > { %8207 = vmatmul.mubr.msk.f32.gmra.mrb[18].mxu0 %vm276_vm0, %v10548_v36  ;;  %v10581_v36 = vld [vmem:[%s10128_s24 + $0x13a] sm:$0xff] }
  0xba   : > { %8209 = vmatprep.mubr.msk.f32.mxu0 %vm276_vm0, %v10551_v32  ;;  %v10578_v32 = vld [vmem:[%s10128_s24 + $0x12a] sm:$0xff]  ;;  %12119 = vst [vmem:[#allocation35_spill] sm:$0xff] %v10581_v36 }
  0xbd   : > { %8210 = vmatmul.mubr.msk.f32.gmra.mrb[20].mxu0 %vm276_vm0, %v10558_v33  ;;  %v10591_v33 = vld [vmem:[%s10128_s24 + $0x152] sm:$0xff] }
  0xbe   : > { %8212 = vmatprep.mubr.msk.f32.mxu0 %vm276_vm0, %v10561_v5  ;;  %v10588_v5 = vld [vmem:[%s10128_s24 + $0x142] sm:$0xff]  ;;  %12120 = vst [vmem:[#allocation36_spill] sm:$0xff] %v10591_v33 }
  0xc1   : > { %8213 = vmatmul.mubr.msk.f32.gmra.mrb[22].mxu0 %vm276_vm0, %v10568_v38  ;;  %v10601_v38 = vld [vmem:[%s10128_s24 + $0x16a] sm:$0xff] }
  0xc2   : > { %8215 = vmatprep.mubr.msk.f32.mxu0 %vm276_vm0, %v10571_v35  ;;  %v10598_v35 = vld [vmem:[%s10128_s24 + $0x15a] sm:$0xff]  ;;  %12121 = vst [vmem:[#allocation37_spill] sm:$0xff] %v10601_v38 }
  0xc5   : > { %8216 = vmatmul.mubr.msk.f32.gmra.mrb[24].mxu0 %vm276_vm0, %v10578_v32 }
  0xc6   : > { %8218 = vmatprep.mubr.msk.f32.mxu0 %vm276_vm0, %v10581_v36  ;;  %v10608_v36 = vld [vmem:[%s10128_s24 + $0x172] sm:$0xff] }
  0xc9   : > { %8219 = vmatmul.mubr.msk.f32.gmra.mrb[26].mxu0 %vm276_vm0, %v10588_v5 }
  0xca   : > { %8221 = vmatprep.mubr.msk.f32.mxu0 %vm276_vm0, %v10591_v33  ;;  %v6989_v33 = vld [vmem:[%s11994_s1 + $0x28] sm:$0xff] }
  0xcd   : > { %8222 = vmatmul.mubr.msk.f32.gmra.mrb[28].mxu0 %vm276_vm0, %v10598_v35 }
  0xce   : > { %8224 = vmatprep.mubr.msk.f32.mxu0 %vm276_vm0, %v10601_v38 }
  0xd1   : > { %8225 = vmatmul.mubr.msk.f32.gmra.mrb[30].mxu0 %vm276_vm0, %v10608_v36 }
  0xd2   : > { %8229 = vmatprep.mubr.msk.f32.mxu0 %vm276_vm0, %v10294_v37  ;;  %v10682_v37 = vld [vmem:[%s10128_s24 + $0x188] sm:$0xff] }
  0xd5   : > { %8230 = vmatmul.mubr.msk.f32.vlgmr.msra.gmra.mrb[0].mxu0 %vm276_vm0, %v10306_v39  ;;  %v7054_v39 = vld [vmem:[%s11994_s1 + $0x30] sm:$0xff] }
  0xd6   : > { %8278 = vmatpush3.msra.mxu0 %v10460_v34  ;;  %8232 = vmatprep.mubr.msk.f32.mxu0 %vm276_vm0, %v10309_v40  ;;  %v10675_v34 = vld [vmem:[%s10128_s24 + $0x180] sm:$0xff] }
  0xd7   : > { %8327 = vmatprep.subr.mxu0 %v6989_v33 }
  0xd9   : > { %8233 = vmatmul.mubr.msk.f32.gmra.mrb[2].mxu0 %vm276_vm0, %v10317_v41 }
  0xda   : > { %8235 = vmatprep.mubr.msk.f32.mxu0 %vm276_vm0, %v10320_v42 }
  0xdd   : > { %8236 = vmatmul.mubr.msk.f32.gmra.mrb[4].mxu0 %vm276_vm0, %v10327_v43 }
  0xde   : > { %8238 = vmatprep.mubr.msk.f32.mxu0 %vm276_vm0, %v10330_v44 }
  0xe1   : > { %8239 = vmatmul.mubr.msk.f32.gmra.mrb[6].mxu0 %vm276_vm0, %v10337_v45 }
  0xe2   : > { %8241 = vmatprep.mubr.msk.f32.mxu0 %vm276_vm0, %v10340_v46 }
  0xe5   : > { %8242 = vmatmul.mubr.msk.f32.gmra.mrb[8].mxu0 %vm276_vm0, %v10347_v47 }
  0xe6   : > { %8244 = vmatprep.mubr.msk.f32.mxu0 %vm276_vm0, %v10350_v48 }
  0xe9   : > { %8245 = vmatmul.mubr.msk.f32.gmra.mrb[10].mxu0 %vm276_vm0, %v10357_v49 }
  0xea   : > { %8247 = vmatprep.mubr.msk.f32.mxu0 %vm276_vm0, %v10360_v50 }
  0xed   : > { %8248 = vmatmul.mubr.msk.f32.gmra.mrb[12].mxu0 %vm276_vm0, %v10367_v51 }
  0xee   : > { %8250 = vmatprep.mubr.msk.f32.mxu0 %vm276_vm0, %v10370_v52 }
  0xf1   : > { %8251 = vmatmul.mubr.msk.f32.gmra.mrb[14].mxu0 %vm276_vm0, %v10377_v53 }
  0xf2   : > { %8253 = vmatprep.mubr.msk.f32.mxu0 %vm276_vm0, %v10380_v54 }
  0xf5   : > { %8254 = vmatmul.mubr.msk.f32.gmra.mrb[16].mxu0 %vm276_vm0, %v10387_v55 }
  0xf6   : > { %8256 = vmatprep.mubr.msk.f32.mxu0 %vm276_vm0, %v10390_v56 }
  0xf9   : > { %8257 = vmatmul.mubr.msk.f32.gmra.mrb[18].mxu0 %vm276_vm0, %v10397_v57 }
  0xfa   : > { %8259 = vmatprep.mubr.msk.f32.mxu0 %vm276_vm0, %v10400_v58 }
  0xfd   : > { %8260 = vmatmul.mubr.msk.f32.gmra.mrb[20].mxu0 %vm276_vm0, %v10407_v59 }
  0xfe   : > { %8262 = vmatprep.mubr.msk.f32.mxu0 %vm276_vm0, %v10410_v60 }
 0x101   : > { %8263 = vmatmul.mubr.msk.f32.gmra.mrb[22].mxu0 %vm276_vm0, %v10417_v61 }
 0x102   : > { %8265 = vmatprep.mubr.msk.f32.mxu0 %vm276_vm0, %v10420_v62 }
 0x105   : > { %8266 = vmatmul.mubr.msk.f32.gmra.mrb[24].mxu0 %vm276_vm0, %v10427_v63 }
 0x106   : > { %8268 = vmatprep.mubr.msk.f32.mxu0 %vm276_vm0, %v10430_v0 }
 0x109   : > { %8269 = vmatmul.mubr.msk.f32.gmra.mrb[26].mxu0 %vm276_vm0, %v10437_v1 }
 0x10a   : > { %8271 = vmatprep.mubr.msk.f32.mxu0 %vm276_vm0, %v10440_v2 }
 0x10d   : > { %8272 = vmatmul.mubr.msk.f32.gmra.mrb[28].mxu0 %vm276_vm0, %v10447_v3 }
 0x10e   : > { %8274 = vmatprep.mubr.msk.f32.mxu0 %vm276_vm0, %v10675_v34 }
 0x111   : > { %8275 = vmatmul.mubr.msk.f32.gmra.mrb[30].mxu0 %vm276_vm0, %v10682_v37 }
 0x112   : > { %8279 = vmatprep.mubr.msk.f32.mxu0 %vm276_vm0, %v10133_v4  ;;  %v12122_v4 = vld [vmem:[#allocation9_spill] sm:$0xff] }
 0x115   : > { %8280 = vmatmul.mubr.msk.f32.vlgmr.msra.gmra.mrb[0].mxu0 %vm276_vm0, %v10145_v6  ;;  %v12123_v6 = vld [vmem:[#allocation10_spill] sm:$0xff] }
 0x116   : > { %8328 = vmatpush3.msra.mxu0 %v6989_v33  ;;  %8282 = vmatprep.mubr.msk.f32.mxu0 %vm276_vm0, %v10148_v7  ;;  %v10748_v33 = vld [vmem:[%s10128_s24 + $0x181] sm:$0xff] }
 0x117   : > { %8377 = vmatprep.subr.mxu0 %v7054_v39  ;;  %12124 = vst [vmem:[#allocation38_spill] sm:$0xff] %v10748_v33 }
 0x119   : > { %8283 = vmatmul.mubr.msk.f32.gmra.mrb[2].mxu0 %vm276_vm0, %v10156_v8 }
 0x11a   : > { %8285 = vmatprep.mubr.msk.f32.mxu0 %vm276_vm0, %v10159_v9 }
 0x11d   : > { %8286 = vmatmul.mubr.msk.f32.gmra.mrb[4].mxu0 %vm276_vm0, %v10166_v10 }
 0x11e   : > { %8288 = vmatprep.mubr.msk.f32.mxu0 %vm276_vm0, %v10169_v11 }
 0x121   : > { %8289 = vmatmul.mubr.msk.f32.gmra.mrb[6].mxu0 %vm276_vm0, %v10176_v12 }
 0x122   : > { %8291 = vmatprep.mubr.msk.f32.mxu0 %vm276_vm0, %v10179_v13 }
 0x125   : > { %8292 = vmatmul.mubr.msk.f32.gmra.mrb[8].mxu0 %vm276_vm0, %v10186_v14 }
 0x126   : > { %8294 = vmatprep.mubr.msk.f32.mxu0 %vm276_vm0, %v10189_v15 }
 0x129   : > { %8295 = vmatmul.mubr.msk.f32.gmra.mrb[10].mxu0 %vm276_vm0, %v10196_v16 }
 0x12a   : > { %8297 = vmatprep.mubr.msk.f32.mxu0 %vm276_vm0, %v10199_v17 }
 0x12d   : > { %8298 = vmatmul.mubr.msk.f32.gmra.mrb[12].mxu0 %vm276_vm0, %v10206_v18 }
 0x12e   : > { %8300 = vmatprep.mubr.msk.f32.mxu0 %vm276_vm0, %v10209_v19 }
 0x131   : > { %8301 = vmatmul.mubr.msk.f32.gmra.mrb[14].mxu0 %vm276_vm0, %v10216_v20 }
 0x132   : > { %8303 = vmatprep.mubr.msk.f32.mxu0 %vm276_vm0, %v10219_v21 }
 0x135   : > { %8304 = vmatmul.mubr.msk.f32.gmra.mrb[16].mxu0 %vm276_vm0, %v10226_v22 }
 0x136   : > { %8306 = vmatprep.mubr.msk.f32.mxu0 %vm276_vm0, %v10229_v23 }
 0x139   : > { %8307 = vmatmul.mubr.msk.f32.gmra.mrb[18].mxu0 %vm276_vm0, %v10236_v24 }
 0x13a   : > { %8309 = vmatprep.mubr.msk.f32.mxu0 %vm276_vm0, %v10239_v25 }
 0x13d   : > { %8310 = vmatmul.mubr.msk.f32.gmra.mrb[20].mxu0 %vm276_vm0, %v10246_v26 }
 0x13e   : > { %8312 = vmatprep.mubr.msk.f32.mxu0 %vm276_vm0, %v10249_v27  ;;  %v12125_v27 = vld [vmem:[#allocation11_spill] sm:$0xff] }
 0x141   : > { %8313 = vmatmul.mubr.msk.f32.gmra.mrb[22].mxu0 %vm276_vm0, %v10256_v28  ;;  %v12134_v28 = vld [vmem:[#allocation19_spill] sm:$0xff] }
 0x142   : > { %8315 = vmatprep.mubr.msk.f32.mxu0 %vm276_vm0, %v10259_v29  ;;  %v10755_v29 = vld [vmem:[%s10128_s24 + $0x189] sm:$0xff] }
 0x143   : > { %12126 = vst [vmem:[#allocation39_spill] sm:$0xff] %v10755_v29 }
 0x145   : > { %8316 = vmatmul.mubr.msk.f32.gmra.mrb[24].mxu0 %vm276_vm0, %v10266_v30  ;;  %v12131_v30 = vld [vmem:[#allocation16_spill] sm:$0xff] }
 0x146   : > { %8318 = vmatprep.mubr.msk.f32.mxu0 %vm276_vm0, %v10269_v31  ;;  %v12127_v31 = vld [vmem:[#allocation12_spill] sm:$0xff] }
 0x149   : > { %8319 = vmatmul.mubr.msk.f32.gmra.mrb[26].mxu0 %vm276_vm0, %v12122_v4  ;;  %v12128_v4 = vld [vmem:[#allocation13_spill] sm:$0xff] }
 0x14a   : > { %8321 = vmatprep.mubr.msk.f32.mxu0 %vm276_vm0, %v12123_v6  ;;  %v7119_v6 = vld [vmem:[%s11994_s1 + $0x38] sm:$0xff] }
 0x14d   : > { %8322 = vmatmul.mubr.msk.f32.gmra.mrb[28].mxu0 %vm276_vm0, %v12125_v27  ;;  %v12129_v27 = vld [vmem:[#allocation14_spill] sm:$0xff] }
 0x14e   : > { %8324 = vmatprep.mubr.msk.f32.mxu0 %vm276_vm0, %v10748_v33  ;;  %v12130_v33 = vld [vmem:[#allocation15_spill] sm:$0xff] }
 0x151   : > { %8325 = vmatmul.mubr.msk.f32.gmra.mrb[30].mxu0 %vm276_vm0, %v10755_v29  ;;  %v12132_v29 = vld [vmem:[#allocation17_spill] sm:$0xff] }
 0x152   : > { %8329 = vmatprep.mubr.msk.f32.mxu0 %vm276_vm0, %v12127_v31  ;;  %v12133_v31 = vld [vmem:[#allocation18_spill] sm:$0xff] }
 0x155   : > { %8330 = vmatmul.mubr.msk.f32.vlgmr.msra.gmra.mrb[0].mxu0 %vm276_vm0, %v12128_v4  ;;  %v12136_v4 = vld [vmem:[#allocation21_spill] sm:$0xff] }
 0x156   : > { %8378 = vmatpush3.msra.mxu0 %v7054_v39  ;;  %8332 = vmatprep.mubr.msk.f32.mxu0 %vm276_vm0, %v12129_v27  ;;  %v12135_v39 = vld [vmem:[#allocation20_spill] sm:$0xff]  ;;  %v12137_v27 = vld [vmem:[#allocation22_spill] sm:$0xff] }
 0x157   : > { %8427 = vmatprep.subr.mxu0 %v7119_v6 }
 0x159   : > { %8333 = vmatmul.mubr.msk.f32.gmra.mrb[2].mxu0 %vm276_vm0, %v12130_v33  ;;  %v12138_v33 = vld [vmem:[#allocation23_spill] sm:$0xff] }
 0x15a   : > { %8335 = vmatprep.mubr.msk.f32.mxu0 %vm276_vm0, %v12131_v30  ;;  %v12139_v30 = vld [vmem:[#allocation24_spill] sm:$0xff] }
 0x15d   : > { %8336 = vmatmul.mubr.msk.f32.gmra.mrb[4].mxu0 %vm276_vm0, %v12132_v29  ;;  %v12140_v29 = vld [vmem:[#allocation25_spill] sm:$0xff] }
 0x15e   : > { %8338 = vmatprep.mubr.msk.f32.mxu0 %vm276_vm0, %v12133_v31  ;;  %v12141_v31 = vld [vmem:[#allocation26_spill] sm:$0xff] }
 0x161   : > { %8339 = vmatmul.mubr.msk.f32.gmra.mrb[6].mxu0 %vm276_vm0, %v12134_v28 }
 0x162   : > { %8341 = vmatprep.mubr.msk.f32.mxu0 %vm276_vm0, %v12135_v39  ;;  %v12142_v39 = vld [vmem:[#allocation27_spill] sm:$0xff] }
 0x165   : > { %8342 = vmatmul.mubr.msk.f32.gmra.mrb[8].mxu0 %vm276_vm0, %v12136_v4  ;;  %v12143_v4 = vld [vmem:[#allocation28_spill] sm:$0xff] }
 0x166   : > { %8344 = vmatprep.mubr.msk.f32.mxu0 %vm276_vm0, %v12137_v27  ;;  %v12144_v27 = vld [vmem:[#allocation29_spill] sm:$0xff] }
 0x169   : > { %8345 = vmatmul.mubr.msk.f32.gmra.mrb[10].mxu0 %vm276_vm0, %v12138_v33  ;;  %v12145_v33 = vld [vmem:[#allocation30_spill] sm:$0xff] }
 0x16a   : > { %8347 = vmatprep.mubr.msk.f32.mxu0 %vm276_vm0, %v12139_v30  ;;  %v12146_v30 = vld [vmem:[#allocation31_spill] sm:$0xff] }
 0x16d   : > { %8348 = vmatmul.mubr.msk.f32.gmra.mrb[12].mxu0 %vm276_vm0, %v12140_v29  ;;  %v12147_v29 = vld [vmem:[#allocation32_spill] sm:$0xff] }
 0x16e   : > { %8350 = vmatprep.mubr.msk.f32.mxu0 %vm276_vm0, %v12141_v31  ;;  %v12148_v31 = vld [vmem:[#allocation33_spill] sm:$0xff] }
 0x171   : > { %8351 = vmatmul.mubr.msk.f32.gmra.mrb[14].mxu0 %vm276_vm0, %v12142_v39  ;;  %v12149_v39 = vld [vmem:[#allocation34_spill] sm:$0xff] }
 0x172   : > { %8353 = vmatprep.mubr.msk.f32.mxu0 %vm276_vm0, %v12143_v4  ;;  %v12150_v4 = vld [vmem:[#allocation35_spill] sm:$0xff] }
 0x175   : > { %8354 = vmatmul.mubr.msk.f32.gmra.mrb[16].mxu0 %vm276_vm0, %v12144_v27 }
 0x176   : > { %8356 = vmatprep.mubr.msk.f32.mxu0 %vm276_vm0, %v12145_v33  ;;  %v12151_v33 = vld [vmem:[#allocation36_spill] sm:$0xff] }
 0x179   : > { %8357 = vmatmul.mubr.msk.f32.gmra.mrb[18].mxu0 %vm276_vm0, %v12146_v30 }
 0x17a   : > { %8359 = vmatprep.mubr.msk.f32.mxu0 %vm276_vm0, %v12147_v29 }
 0x17d   : > { %8360 = vmatmul.mubr.msk.f32.gmra.mrb[20].mxu0 %vm276_vm0, %v12148_v31  ;;  %v10821_v31 = vld [vmem:[%s10128_s24 + $0x182] sm:$0xff] }
 0x17e   : > { %8362 = vmatprep.mubr.msk.f32.mxu0 %vm276_vm0, %v12149_v39 }
 0x181   : > { %8363 = vmatmul.mubr.msk.f32.gmra.mrb[22].mxu0 %vm276_vm0, %v10578_v32 }
 0x182   : > { %8365 = vmatprep.mubr.msk.f32.mxu0 %vm276_vm0, %v12150_v4  ;;  %v10828_v4 = vld [vmem:[%s10128_s24 + $0x18a] sm:$0xff] }
 0x185   : > { %8366 = vmatmul.mubr.msk.f32.gmra.mrb[24].mxu0 %vm276_vm0, %v10588_v5 }
 0x186   : > { %8368 = vmatprep.mubr.msk.f32.mxu0 %vm276_vm0, %v12151_v33 }
 0x189   : > { %8369 = vmatmul.mubr.msk.f32.gmra.mrb[26].mxu0 %vm276_vm0, %v10598_v35 }
 0x18a   : > { %8371 = vmatprep.mubr.msk.f32.mxu0 %vm276_vm0, %v10601_v38  ;;  %v7184_v38 = vld [vmem:[%s11994_s1 + $0x40] sm:$0xff] }
 0x18d   : > { %8372 = vmatmul.mubr.msk.f32.gmra.mrb[28].mxu0 %vm276_vm0, %v10608_v36 }
 0x18e   : > { %8374 = vmatprep.mubr.msk.f32.mxu0 %vm276_vm0, %v10821_v31 }
 0x191   : > { %8375 = vmatmul.mubr.msk.f32.gmra.mrb[30].mxu0 %vm276_vm0, %v10828_v4 }
 0x192   : > { %8379 = vmatprep.mubr.msk.f32.mxu0 %vm276_vm0, %v10309_v40  ;;  %v7052_v40 = vld [vmem:[%s10128_s24 + $0x198] sm:$0xff] }
 0x195   : > { %8380 = vmatmul.mubr.msk.f32.vlgmr.msra.gmra.mrb[0].mxu0 %vm276_vm0, %v10317_v41  ;;  %v7053_v41 = vld [vmem:[%s10128_s24 + $0x1a0] sm:$0xff] }
 0x196   : > { %8428 = vmatpush3.msra.mxu0 %v7119_v6  ;;  %8382 = vmatprep.mubr.msk.f32.mxu0 %vm276_vm0, %v10320_v42  ;;  %v7217_v42 = vld [vmem:[%s11995_s2 + $0x80] sm:$0xff] }
 0x197   : > { %8477 = vmatprep.subr.mxu0 %v7184_v38 }
 0x199   : > { %8383 = vmatmul.mubr.msk.f32.gmra.mrb[2].mxu0 %vm276_vm0, %v10327_v43  ;;  %v7218_v43 = vld [vmem:[%s11995_s2 + $0x88] sm:$0xff] }
 0x19a   : > { %8385 = vmatprep.mubr.msk.f32.mxu0 %vm276_vm0, %v10330_v44  ;;  %v10907_v44 = vpack.c.bf16 %v7218_v43, %v7217_v42 }
 0x19c   : > { %9535 = vmatprep.subr.bf16.mxu1 %v10907_v44 }
 0x19d   : > { %8386 = vmatmul.mubr.msk.f32.gmra.mrb[4].mxu0 %vm276_vm0, %v10337_v45  ;;  %v7219_v45 = vld [vmem:[%s11995_s2 + $0x90] sm:$0xff]  ;;  %9543 = vmatpush3.bf16.msra.mxu1 %v10907_v44 }
 0x19e   : > { %8388 = vmatprep.mubr.msk.f32.mxu0 %vm276_vm0, %v10340_v46  ;;  %v7220_v46 = vld [vmem:[%s11995_s2 + $0x98] sm:$0xff] }
 0x1a1   : > { %8389 = vmatmul.mubr.msk.f32.gmra.mrb[6].mxu0 %vm276_vm0, %v10347_v47  ;;  %v10918_v47 = vpack.c.bf16 %v7220_v46, %v7219_v45 }
 0x1a2   : > { %8391 = vmatprep.mubr.msk.f32.mxu0 %vm276_vm0, %v10350_v48  ;;  %v7222_v48 = vld [vmem:[%s11995_s2 + $0xa8] sm:$0xff] }
 0x1a3   : > { %9536 = vmatprep.subr.bf16.mxu1 %v10918_v47 }
 0x1a4   : > { %9544 = vmatpush3.bf16.msra.mxu1 %v10918_v47 }
 0x1a5   : > { %8392 = vmatmul.mubr.msk.f32.gmra.mrb[8].mxu0 %vm276_vm0, %v10357_v49  ;;  %v7223_v49 = vld [vmem:[%s11995_s2 + $0xb0] sm:$0xff] }
 0x1a6   : > { %8394 = vmatprep.mubr.msk.f32.mxu0 %vm276_vm0, %v10360_v50  ;;  %v7224_v50 = vld [vmem:[%s11995_s2 + $0xb8] sm:$0xff] }
 0x1a9   : > { %8395 = vmatmul.mubr.msk.f32.gmra.mrb[10].mxu0 %vm276_vm0, %v10367_v51  ;;  %v7226_v51 = vld [vmem:[%s11995_s2 + $0xc8] sm:$0xff] }
 0x1aa   : > { %8397 = vmatprep.mubr.msk.f32.mxu0 %vm276_vm0, %v10370_v52 }
 0x1ad   : > { %8398 = vmatmul.mubr.msk.f32.gmra.mrb[12].mxu0 %vm276_vm0, %v10377_v53 }
 0x1ae   : > { %8400 = vmatprep.mubr.msk.f32.mxu0 %vm276_vm0, %v10380_v54  ;;  %v12164_v54 = vld [vmem:[#allocation16_spill] sm:$0xff] }
 0x1b1   : > { %8401 = vmatmul.mubr.msk.f32.gmra.mrb[14].mxu0 %vm276_vm0, %v10387_v55  ;;  %v12165_v55 = vld [vmem:[#allocation17_spill] sm:$0xff] }
 0x1b2   : > { %8403 = vmatprep.mubr.msk.f32.mxu0 %vm276_vm0, %v10390_v56  ;;  %v12166_v56 = vld [vmem:[#allocation18_spill] sm:$0xff] }
 0x1b5   : > { %8404 = vmatmul.mubr.msk.f32.gmra.mrb[16].mxu0 %vm276_vm0, %v10397_v57  ;;  %v12167_v57 = vld [vmem:[#allocation20_spill] sm:$0xff] }
 0x1b6   : > { %8406 = vmatprep.mubr.msk.f32.mxu0 %vm276_vm0, %v10400_v58  ;;  %v12168_v58 = vld [vmem:[#allocation21_spill] sm:$0xff] }
 0x1b9   : > { %8407 = vmatmul.mubr.msk.f32.gmra.mrb[18].mxu0 %vm276_vm0, %v10407_v59  ;;  %v12169_v59 = vld [vmem:[#allocation22_spill] sm:$0xff] }
 0x1ba   : > { %8409 = vmatprep.mubr.msk.f32.mxu0 %vm276_vm0, %v10410_v60  ;;  %v12170_v60 = vld [vmem:[#allocation23_spill] sm:$0xff] }
 0x1bd   : > { %8410 = vmatmul.mubr.msk.f32.gmra.mrb[20].mxu0 %vm276_vm0, %v10417_v61  ;;  %v12171_v61 = vld [vmem:[#allocation24_spill] sm:$0xff] }
 0x1be   : > { %8412 = vmatprep.mubr.msk.f32.mxu0 %vm276_vm0, %v10420_v62  ;;  %v12173_v62 = vld [vmem:[#allocation26_spill] sm:$0xff] }
 0x1c1   : > { %8413 = vmatmul.mubr.msk.f32.gmra.mrb[22].mxu0 %vm276_vm0, %v10427_v63  ;;  %v12174_v63 = vld [vmem:[#allocation27_spill] sm:$0xff] }
 0x1c2   : > { %8415 = vmatprep.mubr.msk.f32.mxu0 %vm276_vm0, %v10430_v0  ;;  %v12175_v0 = vld [vmem:[#allocation28_spill] sm:$0xff] }
 0x1c5   : > { %8416 = vmatmul.mubr.msk.f32.gmra.mrb[24].mxu0 %vm276_vm0, %v10437_v1  ;;  %v12176_v1 = vld [vmem:[#allocation30_spill] sm:$0xff] }
 0x1c6   : > { %8418 = vmatprep.mubr.msk.f32.mxu0 %vm276_vm0, %v10440_v2  ;;  %v12177_v2 = vld [vmem:[#allocation33_spill] sm:$0xff] }
 0x1c9   : > { %8419 = vmatmul.mubr.msk.f32.gmra.mrb[26].mxu0 %vm276_vm0, %v10447_v3  ;;  %v7229_v3 = vld [vmem:[%s11995_s2 + $0xe0] sm:$0xff] }
 0x1ca   : > { %8421 = vmatprep.mubr.msk.f32.mxu0 %vm276_vm0, %v10675_v34  ;;  %v7232_v34 = vld [vmem:[%s11995_s2 + $0xf8] sm:$0xff] }
 0x1cd   : > { %8422 = vmatmul.mubr.msk.f32.gmra.mrb[28].mxu0 %vm276_vm0, %v10682_v37 }
 0x1ce   : > { %8424 = vmatprep.mubr.msk.f32.mxu0 %vm276_vm0, %v7052_v40 }
 0x1d1   : > { %8425 = vmatmul.mubr.msk.f32.gmra.mrb[30].mxu0 %vm276_vm0, %v7053_v41 }
 0x1d2   : > { %8429 = vmatprep.mubr.msk.f32.mxu0 %vm276_vm0, %v10148_v7  ;;  %v7221_v7 = vld [vmem:[%s11995_s2 + $0xa0] sm:$0xff] }
 0x1d5   : > { %8430 = vmatmul.mubr.msk.f32.vlgmr.msra.gmra.mrb[0].mxu0 %vm276_vm0, %v10156_v8  ;;  %v9255_v8 = vpack.c.bf16 %v7222_v48, %v7221_v7  ;;  %v3783_v48 = vld [vmem:[%s11995_s2 + $0x10] sm:$0xff] }
 0x1d6   : > { %8478 = vmatpush3.msra.mxu0 %v7184_v38  ;;  %8432 = vmatprep.mubr.msk.f32.mxu0 %vm276_vm0, %v10159_v9  ;;  %v9259_v9 = vpack.c.bf16 %v7224_v50, %v7223_v49  ;;  %v7231_v38 = vld [vmem:[%s11995_s2 + $0xf0] sm:$0xff] }
 0x1d7   : > { %9248 = vmatprep.subr.bf16.mxu0 %v10907_v44  ;;  %9537 = vmatprep.subr.bf16.mxu1 %v9255_v8  ;;  %v9275_v37 = vpack.c.bf16 %v7232_v34, %v7231_v38 }
 0x1d8   : > { %9545 = vmatpush3.bf16.msra.mxu1 %v9255_v8 }
 0x1d9   : > { %8433 = vmatmul.mubr.msk.f32.gmra.mrb[2].mxu0 %vm276_vm0, %v10166_v10  ;;  %v7225_v10 = vld [vmem:[%s11995_s2 + $0xc0] sm:$0xff]  ;;  %9538 = vmatprep.subr.bf16.mxu1 %v9259_v9 }
 0x1da   : > { %8435 = vmatprep.mubr.msk.f32.mxu0 %vm276_vm0, %v10169_v11  ;;  %v9263_v52 = vpack.c.bf16 %v7226_v51, %v7225_v10  ;;  %v7227_v11 = vld [vmem:[%s11995_s2 + $0xd0] sm:$0xff] }
 0x1dc   : > { %9546 = vmatpush3.bf16.msra.mxu1 %v9259_v9 }
 0x1dd   : > { %8436 = vmatmul.mubr.msk.f32.gmra.mrb[4].mxu0 %vm276_vm0, %v10176_v12  ;;  %v7228_v12 = vld [vmem:[%s11995_s2 + $0xd8] sm:$0xff]  ;;  %9539 = vmatprep.subr.bf16.mxu1 %v9263_v52 }
 0x1de   : > { %8438 = vmatprep.mubr.msk.f32.mxu0 %vm276_vm0, %v10179_v13  ;;  %v9267_v53 = vpack.c.bf16 %v7228_v12, %v7227_v11  ;;  %v12152_v13 = vld [vmem:[#allocation4_spill] sm:$0xff]  ;;  %v3786_v11 = vld [vmem:[%s11995_s2 + $0x28] sm:$0xff] }
 0x1e0   : > { %9547 = vmatpush3.bf16.msra.mxu1 %v9263_v52 }
 0x1e1   : > { %8439 = vmatmul.mubr.msk.f32.gmra.mrb[6].mxu0 %vm276_vm0, %v10186_v14  ;;  %9540 = vmatprep.subr.bf16.mxu1 %v9267_v53  ;;  %v12153_v14 = vld [vmem:[#allocation5_spill] sm:$0xff] }
 0x1e2   : > { %8441 = vmatprep.mubr.msk.f32.mxu0 %vm276_vm0, %v10189_v15  ;;  %v12154_v15 = vld [vmem:[#allocation6_spill] sm:$0xff] }
 0x1e4   : > { %9548 = vmatpush3.bf16.msra.mxu1 %v9267_v53 }
 0x1e5   : > { %8442 = vmatmul.mubr.msk.f32.gmra.mrb[8].mxu0 %vm276_vm0, %v10196_v16  ;;  %v12155_v16 = vld [vmem:[#allocation7_spill] sm:$0xff] }
 0x1e6   : > { %8444 = vmatprep.mubr.msk.f32.mxu0 %vm276_vm0, %v10199_v17  ;;  %v12156_v17 = vld [vmem:[#allocation8_spill] sm:$0xff] }
 0x1e9   : > { %8445 = vmatmul.mubr.msk.f32.gmra.mrb[10].mxu0 %vm276_vm0, %v10206_v18  ;;  %v12157_v18 = vld [vmem:[#allocation9_spill] sm:$0xff] }
 0x1ea   : > { %8447 = vmatprep.mubr.msk.f32.mxu0 %vm276_vm0, %v10209_v19  ;;  %v12158_v19 = vld [vmem:[#allocation10_spill] sm:$0xff] }
 0x1ed   : > { %8448 = vmatmul.mubr.msk.f32.gmra.mrb[12].mxu0 %vm276_vm0, %v10216_v20  ;;  %v12159_v20 = vld [vmem:[#allocation11_spill] sm:$0xff] }
 0x1ee   : > { %8450 = vmatprep.mubr.msk.f32.mxu0 %vm276_vm0, %v10219_v21  ;;  %v12160_v21 = vld [vmem:[#allocation38_spill] sm:$0xff] }
 0x1f1   : > { %8451 = vmatmul.mubr.msk.f32.gmra.mrb[14].mxu0 %vm276_vm0, %v10226_v22  ;;  %v7117_v22 = vld [vmem:[%s10128_s24 + $0x199] sm:$0xff] }
 0x1f2   : > { %8453 = vmatprep.mubr.msk.f32.mxu0 %vm276_vm0, %v10229_v23  ;;  %v12161_v23 = vld [vmem:[#allocation39_spill] sm:$0xff] }
 0x1f5   : > { %8454 = vmatmul.mubr.msk.f32.gmra.mrb[16].mxu0 %vm276_vm0, %v10236_v24  ;;  %v7118_v24 = vld [vmem:[%s10128_s24 + $0x1a1] sm:$0xff] }
 0x1f6   : > { %8456 = vmatprep.mubr.msk.f32.mxu0 %vm276_vm0, %v10239_v25  ;;  %v12162_v25 = vld [vmem:[#allocation14_spill] sm:$0xff] }
 0x1f9   : > { %8457 = vmatmul.mubr.msk.f32.gmra.mrb[18].mxu0 %vm276_vm0, %v10246_v26  ;;  %v12163_v26 = vld [vmem:[#allocation15_spill] sm:$0xff] }
 0x1fa   : > { %8459 = vmatprep.mubr.msk.f32.mxu0 %vm276_vm0, %v12152_v13 }
 0x1fd   : > { %8460 = vmatmul.mubr.msk.f32.gmra.mrb[20].mxu0 %vm276_vm0, %v12153_v14 }
 0x1fe   : > { %8462 = vmatprep.mubr.msk.f32.mxu0 %vm276_vm0, %v12154_v15 }
 0x201   : > { %8463 = vmatmul.mubr.msk.f32.gmra.mrb[22].mxu0 %vm276_vm0, %v12155_v16  ;;  %v3787_v16 = vld [vmem:[%s11995_s2 + $0x30] sm:$0xff] }
 0x202   : > { %8465 = vmatprep.mubr.msk.f32.mxu0 %vm276_vm0, %v12156_v17  ;;  %v3788_v17 = vld [vmem:[%s11995_s2 + $0x38] sm:$0xff] }
 0x205   : > { %8466 = vmatmul.mubr.msk.f32.gmra.mrb[24].mxu0 %vm276_vm0, %v12157_v18 }
 0x206   : > { %8468 = vmatprep.mubr.msk.f32.mxu0 %vm276_vm0, %v12158_v19 }
 0x209   : > { %8469 = vmatmul.mubr.msk.f32.gmra.mrb[26].mxu0 %vm276_vm0, %v12159_v20 }
 0x20a   : > { %8471 = vmatprep.mubr.msk.f32.mxu0 %vm276_vm0, %v12160_v21  ;;  %v9291_v21 = vpack.c.bf16 %v3788_v17, %v3787_v16  ;;  %v7236_v16 = vld [vmem:[%s11995_s2 + $0x118] sm:$0xff] }
 0x20d   : > { %8472 = vmatmul.mubr.msk.f32.gmra.mrb[28].mxu0 %vm276_vm0, %v12161_v23  ;;  %v3789_v23 = vld [vmem:[%s11995_s2 + $0x40] sm:$0xff] }
 0x20e   : > { %8474 = vmatprep.mubr.msk.f32.mxu0 %vm276_vm0, %v7117_v22 }
 0x211   : > { %8475 = vmatmul.mubr.msk.f32.gmra.mrb[30].mxu0 %vm276_vm0, %v7118_v24  ;;  %v3790_v24 = vld [vmem:[%s11995_s2 + $0x48] sm:$0xff] }
 0x212   : > { %8479 = vmatprep.mubr.msk.f32.mxu0 %vm276_vm0, %v12162_v25 }
 0x215   : > { %8480 = vmatmul.mubr.msk.f32.vlgmr.msra.gmra.mrb[0].mxu0 %vm276_vm0, %v12163_v26 }
 0x216   : > { %8482 = vmatprep.mubr.msk.f32.mxu0 %vm276_vm0, %v12164_v54  ;;  %9250 = vmatpush3.bf16.msra.mxu0 %v10907_v44 }
 0x217   : > { %9252 = vmatprep.subr.bf16.mxu0 %v10918_v47 }
 0x219   : > { %8483 = vmatmul.mubr.msk.f32.gmra.mrb[2].mxu0 %vm276_vm0, %v12165_v55  ;;  %v9295_v55 = vpack.c.bf16 %v3790_v24, %v3789_v23  ;;  %v7238_v23 = vld [vmem:[%s11995_s2 + $0x128] sm:$0xff] }
 0x21a   : > { %8485 = vmatprep.mubr.msk.f32.mxu0 %vm276_vm0, %v12166_v56  ;;  %9254 = vmatpush3.bf16.msra.mxu0 %v10918_v47 }
 0x21b   : > { %9256 = vmatprep.subr.bf16.mxu0 %v9255_v8 }
 0x21d   : > { %8486 = vmatmul.mubr.msk.f32.gmra.mrb[4].mxu0 %vm276_vm0, %v12134_v28  ;;  %v12172_v28 = vld [vmem:[#allocation25_spill] sm:$0xff] }
 0x21e   : > { %8488 = vmatprep.mubr.msk.f32.mxu0 %vm276_vm0, %v12167_v57  ;;  %9258 = vmatpush3.bf16.msra.mxu0 %v9255_v8  ;;  %v3784_v8 = vld [vmem:[%s11995_s2 + $0x18] sm:$0xff]  ;;  %v3791_v57 = vld [vmem:[%s11995_s2 + $0x50] sm:$0xff] }
 0x21f   : > { %9260 = vmatprep.subr.bf16.mxu0 %v9259_v9  ;;  %v9283_v10 = vpack.c.bf16 %v3784_v8, %v3783_v48 }
 0x221   : > { %8489 = vmatmul.mubr.msk.f32.gmra.mrb[6].mxu0 %vm276_vm0, %v12168_v58  ;;  %v3792_v58 = vld [vmem:[%s11995_s2 + $0x58] sm:$0xff] }
 0x222   : > { %8491 = vmatprep.mubr.msk.f32.mxu0 %vm276_vm0, %v12169_v59  ;;  %9262 = vmatpush3.bf16.msra.mxu0 %v9259_v9 }
 0x223   : > { %9264 = vmatprep.subr.bf16.mxu0 %v9263_v52 }
 0x225   : > { %8492 = vmatmul.mubr.msk.f32.gmra.mrb[8].mxu0 %vm276_vm0, %v12170_v60 }
 0x226   : > { %8494 = vmatprep.mubr.msk.f32.mxu0 %vm276_vm0, %v12171_v61  ;;  %9266 = vmatpush3.bf16.msra.mxu0 %v9263_v52  ;;  %v3785_v52 = vld [vmem:[%s11995_s2 + $0x20] sm:$0xff] }
 0x227   : > { %9268 = vmatprep.subr.bf16.mxu0 %v9267_v53  ;;  %v9287_v14 = vpack.c.bf16 %v3786_v11, %v3785_v52 }
 0x229   : > { %8495 = vmatmul.mubr.msk.f32.gmra.mrb[10].mxu0 %vm276_vm0, %v12172_v28  ;;  %v9299_v28 = vpack.c.bf16 %v3792_v58, %v3791_v57  ;;  %v7240_v57 = vld [vmem:[%s11995_s2 + $0x138] sm:$0xff] }
 0x22a   : > { %8497 = vmatprep.mubr.msk.f32.mxu0 %vm276_vm0, %v12173_v62  ;;  %9270 = vmatpush3.bf16.msra.mxu0 %v9267_v53 }
 0x22d   : > { %8498 = vmatmul.mubr.msk.f32.gmra.mrb[12].mxu0 %vm276_vm0, %v12174_v63  ;;  %v3793_v63 = vld [vmem:[%s11995_s2 + $0x60] sm:$0xff] }
 0x22e   : > { %8500 = vmatprep.mubr.msk.f32.mxu0 %vm276_vm0, %v12175_v0  ;;  %v3794_v0 = vld [vmem:[%s11995_s2 + $0x68] sm:$0xff] }
 0x231   : > { %8501 = vmatmul.mubr.msk.f32.gmra.mrb[14].mxu0 %vm276_vm0, %v12144_v27  ;;  %v12178_v27 = vld [vmem:[#allocation35_spill] sm:$0xff] }
 0x232   : > { %8503 = vmatprep.mubr.msk.f32.mxu0 %vm276_vm0, %v12176_v1 }
 0x235   : > { %8504 = vmatmul.mubr.msk.f32.gmra.mrb[16].mxu0 %vm276_vm0, %v12146_v30  ;;  %v7182_v30 = vld [vmem:[%s10128_s24 + $0x19a] sm:$0xff] }
 0x236   : > { %8506 = vmatprep.mubr.msk.f32.mxu0 %vm276_vm0, %v12147_v29  ;;  %v12179_v29 = vld [vmem:[#allocation37_spill] sm:$0xff] }
 0x239   : > { %8507 = vmatmul.mubr.msk.f32.gmra.mrb[18].mxu0 %vm276_vm0, %v12177_v2 }
 0x23a   : > { %8509 = vmatprep.mubr.msk.f32.mxu0 %vm276_vm0, %v12149_v39  ;;  %v3782_v39 = vld [vmem:[%s11995_s2 + $0x8] sm:$0xff] }
 0x23d   : > { %8510 = vmatmul.mubr.msk.f32.gmra.mrb[20].mxu0 %vm276_vm0, %v10578_v32  ;;  %v7183_v32 = vld [vmem:[%s10128_s24 + $0x1a2] sm:$0xff]  ;;  %s6728_s24 = sshll.u32 %s12239_s16, 1 }
 0x23e   : > { %8512 = vmatprep.mubr.msk.f32.mxu0 %vm276_vm0, %v12178_v27  ;;  %s208_s22 = scalar_lea.vmem %s11997_s4, %s6728_s24 }
 0x241   : > { %8513 = vmatmul.mubr.msk.f32.gmra.mrb[22].mxu0 %vm276_vm0, %v10588_v5 }
 0x242   : > { %8515 = vmatprep.mubr.msk.f32.mxu0 %vm276_vm0, %v12151_v33 }
 0x245   : > { %8516 = vmatmul.mubr.msk.f32.gmra.mrb[24].mxu0 %vm276_vm0, %v10598_v35  ;;  %v10082_v35 = vmov 0.0  }
 0x246   : > { %8518 = vmatprep.mubr.msk.f32.mxu0 %vm276_vm0, %v12179_v29  ;;  %3666 = vst [vmem:[#allocation2 + $0x20] sm:$0xff] %v10082_v35  ;;  %3667 = vst [vmem:[#allocation2 + $0x28] sm:$0x3] %v10082_v35  ;;  %v9303_v29 = vpack.c.bf16 %v3794_v0, %v3793_v63 }
 0x247   : > { %3662 = vst [vmem:[#allocation2] sm:$0xff] %v10082_v35  ;;  %3663 = vst [vmem:[#allocation2 + $0x8] sm:$0xff] %v10082_v35 }
 0x248   : > { %3664 = vst [vmem:[#allocation2 + $0x10] sm:$0x3] %v10082_v35  ;;  %3665 = vst [vmem:[#allocation2 + $0x18] sm:$0xff] %v10082_v35 }
 0x249   : > { %8519 = vmatmul.mubr.msk.f32.gmra.mrb[26].mxu0 %vm276_vm0, %v10608_v36  ;;  %v7230_v36 = vld [vmem:[%s11995_s2 + $0xe8] sm:$0xff]  ;;  %3668 = vst [vmem:[#allocation2 + $0x30] sm:$0xff] %v10082_v35  ;;  %3669 = vst [vmem:[#allocation2 + $0x38] sm:$0xff] %v10082_v35 }
 0x24a   : > { %8521 = vmatprep.mubr.msk.f32.mxu0 %vm276_vm0, %v10821_v31  ;;  %v9271_v5 = vpack.c.bf16 %v7230_v36, %v7229_v3  ;;  %3670 = vst [vmem:[#allocation2 + $0x40] sm:$0x3] %v10082_v35  ;;  %3671 = vst [vmem:[#allocation2 + $0x48] sm:$0xff] %v10082_v35  ;;  %v3781_v31 = vld [vmem:[%s11995_s2] sm:$0xff]  ;;  %v3796_v3 = vld [vmem:[%s11995_s2 + $0x78] sm:$0xff] }
 0x24b   : > { %3672 = vst [vmem:[#allocation2 + $0x50] sm:$0xff] %v10082_v35  ;;  %3673 = vst [vmem:[#allocation2 + $0x58] sm:$0x3] %v10082_v35 }
 0x24c   : > { %3674 = vst [vmem:[#allocation2 + $0x60] sm:$0xff] %v10082_v35  ;;  %3675 = vst [vmem:[#allocation2 + $0x68] sm:$0xff] %v10082_v35  ;;  %9272 = vmatprep.subr.bf16.mxu0 %v9271_v5  ;;  %9541 = vmatprep.subr.bf16.mxu1 %v9271_v5 }
 0x24d   : > { %8522 = vmatmul.mubr.msk.f32.gmra.mrb[28].mxu0 %vm276_vm0, %v10828_v4  ;;  %3676 = vst [vmem:[#allocation2 + $0x70] sm:$0x3] %v10082_v35  ;;  %3677 = vst [vmem:[#allocation2 + $0x78] sm:$0xff] %v10082_v35  ;;  %9549 = vmatpush3.bf16.msra.mxu1 %v9271_v5  ;;  %v9279_v4 = vpack.c.bf16 %v3782_v39, %v3781_v31 }
 0x24e   : > { %8524 = vmatprep.mubr.msk.f32.mxu0 %vm276_vm0, %v7182_v30  ;;  %3678 = vst [vmem:[#allocation2 + $0x80] sm:$0xff] %v10082_v35  ;;  %3679 = vst [vmem:[#allocation2 + $0x88] sm:$0x3] %v10082_v35  ;;  %9274 = vmatpush3.bf16.msra.mxu0 %v9271_v5  ;;  %v3797_v6 = vld [vmem:[#allocation2 + $0x1] sm:$0xff] }
 0x24f   : > { %3680 = vst [vmem:[#allocation2 + $0x90] sm:$0xff] %v10082_v35  ;;  %3681 = vst [vmem:[#allocation2 + $0x98] sm:$0xff] %v10082_v35  ;;  %9276 = vmatprep.subr.bf16.mxu0 %v9275_v37  ;;  %9542 = vmatprep.subr.bf16.mxu1 %v9275_v37  ;;  %v3798_v33 = vld [vmem:[#allocation2 + $0x9] sm:$0xff] }
 0x250   : > { %3682 = vst [vmem:[#allocation2 + $0xa0] sm:$0x3] %v10082_v35  ;;  %3683 = vst [vmem:[#allocation2 + $0xa8] sm:$0xff] %v10082_v35 }
 0x251   : > { %8525 = vmatmul.mubr.msk.f32.gmra.mrb[30].mxu0 %vm276_vm0, %v7183_v32  ;;  %3684 = vst [vmem:[#allocation2 + $0xb0] sm:$0xff] %v10082_v35  ;;  %3685 = vst [vmem:[#allocation2 + $0xb8] sm:$0x3] %v10082_v35  ;;  %9550 = vmatpush3.bf16.msra.mxu1 %v9275_v37  ;;  %v3795_v32 = vld [vmem:[%s11995_s2 + $0x70] sm:$0xff] }
 0x252   : > { %3686 = vst [vmem:[#allocation2 + $0xc0] sm:$0xff] %v10082_v35  ;;  %3687 = vst [vmem:[#allocation2 + $0xc8] sm:$0xff] %v10082_v35  ;;  %9278 = vmatpush3.bf16.msra.mxu0 %v9275_v37  ;;  %8559 = vmatprep.mubr.f32.mxu0 %v3797_v6  ;;  %v9307_v34 = vpack.c.bf16 %v3796_v3, %v3795_v32  ;;  %v7233_v6 = vld [vmem:[%s11995_s2 + $0x100] sm:$0xff] }
 0x253   : > { %3688 = vst [vmem:[#allocation2 + $0xd0] sm:$0x3] %v10082_v35  ;;  %3689 = vst [vmem:[#allocation2 + $0xd8] sm:$0xff] %v10082_v35  ;;  %9280 = vmatprep.subr.bf16.mxu1 %v9279_v4 }
 0x254   : > { %3690 = vst [vmem:[#allocation2 + $0xe0] sm:$0xff] %v10082_v35  ;;  %3691 = vst [vmem:[#allocation2 + $0xe8] sm:$0x3] %v10082_v35 }
 0x255   : > { %3692 = vst [vmem:[#allocation2 + $0xf0] sm:$0xff] %v10082_v35  ;;  %3693 = vst [vmem:[#allocation2 + $0xf8] sm:$0xff] %v10082_v35  ;;  %8560 = vmatmul.mubr.f32.vlgmr.msra.gmra.mrb[32].mxu0 %v3798_v33  ;;  %v7234_v33 = vld [vmem:[%s11995_s2 + $0x108] sm:$0xff] }
 0x256   : > { %3694 = vst [vmem:[#allocation2 + $0x100] sm:$0x3] %v10082_v35  ;;  %3695 = vst [vmem:[#allocation2 + $0x108] sm:$0xff] %v10082_v35 }
 0x257   : > { %3696 = vst [vmem:[#allocation2 + $0x110] sm:$0xff] %v10082_v35  ;;  %3697 = vst [vmem:[#allocation2 + $0x118] sm:$0x3] %v10082_v35 }
 0x258   : > { %3698 = vst [vmem:[#allocation2 + $0x120] sm:$0xff] %v10082_v35  ;;  %3699 = vst [vmem:[#allocation2 + $0x128] sm:$0xff] %v10082_v35 }
 0x259   : > { %3700 = vst [vmem:[#allocation2 + $0x130] sm:$0x3] %v10082_v35  ;;  %3701 = vst [vmem:[#allocation2 + $0x138] sm:$0xff] %v10082_v35 }
 0x25a   : > { %3702 = vst [vmem:[#allocation2 + $0x140] sm:$0xff] %v10082_v35  ;;  %3703 = vst [vmem:[#allocation2 + $0x148] sm:$0x3] %v10082_v35 }
 0x25b   : > { %3704 = vst [vmem:[#allocation2 + $0x150] sm:$0xff] %v10082_v35  ;;  %3705 = vst [vmem:[#allocation2 + $0x158] sm:$0xff] %v10082_v35 }
 0x25c   : > { %3706 = vst [vmem:[#allocation2 + $0x160] sm:$0x3] %v10082_v35  ;;  %3707 = vst [vmem:[#allocation2 + $0x168] sm:$0xff] %v10082_v35 }
 0x25d   : > { %3708 = vst [vmem:[#allocation2 + $0x170] sm:$0xff] %v10082_v35  ;;  %3709 = vst [vmem:[#allocation2 + $0x178] sm:$0x3] %v10082_v35 }
 0x25e   : > { %3710 = vst [vmem:[#allocation2 + $0x180] sm:$0xff] %v10082_v35  ;;  %3711 = vst [vmem:[#allocation2 + $0x188] sm:$0xff] %v10082_v35 }
 0x25f   : > { %3712 = vst [vmem:[#allocation2 + $0x190] sm:$0x3] %v10082_v35  ;;  %3713 = vst [vmem:[#allocation2 + $0x198] sm:$0xff] %v10082_v35 }
 0x260   : > { %3714 = vst [vmem:[#allocation2 + $0x1a0] sm:$0xff] %v10082_v35  ;;  %3715 = vst [vmem:[#allocation2 + $0x1a8] sm:$0x3] %v10082_v35 }
 0x2e8   : > { %v8481_v40 = vpop.f32.mrb[0].mxu0 }
 0x2e9   : > { %v3631_v41 = vmax.f32 %v8481_v40, 0.0  ;;  %v3439_v42 = vpop.f32.mrb[1].mxu0  ;;  %v9311_v40 = vpack.c.bf16 %v7234_v33, %v7233_v6 }
 0x2ea   : > { %v3630_v43 = vmax.f32 %v3439_v42, 0.0 }
 0x2eb   : > { %3718 = vst [vmem:[#allocation2 + $0x21] sm:$0xff] %v3631_v41 }
 0x2ec   : > { %3717 = vst [vmem:[#allocation2 + $0x19] sm:$0xff] %v3630_v43  ;;  %v8484_v44 = vpop.f32.mrb[2].mxu0  ;;  %8562 = vmatprep.mubr.f32.mxu0 %v3630_v43 }
 0x2ed   : > { %v3633_v45 = vmax.f32 %v8484_v44, 0.0  ;;  %v3449_v46 = vpop.f32.mrb[3].mxu0  ;;  %8563 = vmatmul.mubr.f32.gmra.mrb[34].mxu0 %v3631_v41 }
 0x2ee   : > { %v3632_v47 = vmax.f32 %v3449_v46, 0.0 }
 0x2ef   : > { %3720 = vst [vmem:[#allocation2 + $0x39] sm:$0xff] %v3633_v45 }
 0x2f0   : > { %3719 = vst [vmem:[#allocation2 + $0x31] sm:$0xff] %v3632_v47  ;;  %v8487_v7 = vpop.f32.mrb[4].mxu0  ;;  %8565 = vmatprep.mubr.f32.mxu0 %v3632_v47 }
 0x2f1   : > { %v3635_v49 = vmax.f32 %v8487_v7, 0.0  ;;  %v3459_v50 = vpop.f32.mrb[5].mxu0  ;;  %8566 = vmatmul.mubr.f32.gmra.mrb[36].mxu0 %v3633_v45 }
 0x2f2   : > { %v3634_v9 = vmax.f32 %v3459_v50, 0.0 }
 0x2f3   : > { %3722 = vst [vmem:[#allocation2 + $0x51] sm:$0xff] %v3635_v49  ;;  %v11303_v24 = vld [vmem:[#allocation2 + $0x18] sm:$0xff] }
 0x2f4   : > { %3721 = vst [vmem:[#allocation2 + $0x49] sm:$0xff] %v3634_v9  ;;  %v8490_v51 = vpop.f32.mrb[6].mxu0  ;;  %8568 = vmatprep.mubr.f32.mxu1 %v3634_v9 }
 0x2f5   : > { %v3637_v12 = vmax.f32 %v8490_v51, 0.0  ;;  %v3469_v53 = vpop.f32.mrb[7].mxu0  ;;  %8569 = vmatmul.mubr.f32.vlgmr.msra.gmra.mrb[0].mxu1 %v3635_v49 }
 0x2f6   : > { %v3636_v13 = vmax.f32 %v3469_v53, 0.0  ;;  %9282 = vmatpush3.bf16.msra.mxu1 %v9279_v4 }
 0x2f7   : > { %3724 = vst [vmem:[#allocation2 + $0x69] sm:$0xff] %v3637_v12  ;;  %9284 = vmatprep.subr.bf16.mxu1 %v9283_v10 }
 0x2f8   : > { %3723 = vst [vmem:[#allocation2 + $0x61] sm:$0xff] %v3636_v13  ;;  %v8493_v15 = vpop.f32.mrb[8].mxu0  ;;  %8571 = vmatprep.mubr.f32.mxu1 %v3636_v13 }
 0x2f9   : > { %v3639_v18 = vmax.f32 %v8493_v15, 0.0  ;;  %v3479_v19 = vpop.f32.mrb[9].mxu0  ;;  %8572 = vmatmul.mubr.f32.gmra.mrb[2].mxu1 %v3637_v12  ;;  %v7235_v15 = vld [vmem:[%s11995_s2 + $0x110] sm:$0xff] }
 0x2fa   : > { %v11165_v20 = vmax.f32 %v3479_v19, 0.0  ;;  %9286 = vmatpush3.bf16.msra.mxu1 %v9283_v10 }
 0x2fb   : > { %3726 = vst [vmem:[#allocation2 + $0x81] sm:$0xff] %v3639_v18  ;;  %9288 = vmatprep.subr.bf16.mxu1 %v9287_v14  ;;  %v11327_v63 = vld [vmem:[#allocation2 + $0x48] sm:$0xff] }
 0x2fc   : > { %3725 = vst [vmem:[#allocation2 + $0x79] sm:$0xff] %v11165_v20  ;;  %v8496_v22 = vpop.f32.mrb[10].mxu0  ;;  %8574 = vmatprep.mubr.f32.mxu1 %v11165_v20 }
 0x2fd   : > { %v11175_v25 = vmax.f32 %v8496_v22, 0.0  ;;  %v3489_v26 = vpop.f32.mrb[11].mxu0  ;;  %8575 = vmatmul.mubr.f32.gmra.mrb[4].mxu1 %v3639_v18  ;;  %v7237_v22 = vld [vmem:[%s11995_s2 + $0x120] sm:$0xff] }
 0x2fe   : > { %v11177_v54 = vmax.f32 %v3489_v26, 0.0  ;;  %9290 = vmatpush3.bf16.msra.mxu1 %v9287_v14  ;;  %v9319_v26 = vpack.c.bf16 %v7238_v23, %v7237_v22 }
 0x2ff   : > { %3728 = vst [vmem:[#allocation2 + $0x99] sm:$0xff] %v11175_v25  ;;  %9292 = vmatprep.subr.bf16.mxu1 %v9291_v21  ;;  %v11339_v32 = vld [vmem:[#allocation2 + $0x60] sm:$0xff] }
 0x300   : > { %3727 = vst [vmem:[#allocation2 + $0x91] sm:$0xff] %v11177_v54  ;;  %v8499_v56 = vpop.f32.mrb[12].mxu0  ;;  %8577 = vmatprep.mubr.f32.mxu1 %v11177_v54 }
 0x301   : > { %v11188_v59 = vmax.f32 %v8499_v56, 0.0  ;;  %v3499_v60 = vpop.f32.mrb[13].mxu0  ;;  %8578 = vmatmul.mubr.f32.gmra.mrb[6].mxu1 %v11175_v25  ;;  %v7239_v56 = vld [vmem:[%s11995_s2 + $0x130] sm:$0xff] }
 0x302   : > { %v11191_v61 = vmax.f32 %v3499_v60, 0.0  ;;  %9294 = vmatpush3.bf16.msra.mxu1 %v9291_v21  ;;  %v9315_v21 = vpack.c.bf16 %v7236_v16, %v7235_v15  ;;  %v9323_v58 = vpack.c.bf16 %v7240_v57, %v7239_v56  ;;  %v11318_v60 = vld [vmem:[#allocation2 + $0x38] sm:$0xff] }
 0x303   : > { %3730 = vst [vmem:[#allocation2 + $0xb1] sm:$0xff] %v11188_v59  ;;  %9296 = vmatprep.subr.bf16.mxu1 %v9295_v55  ;;  %v11351_v6 = vld [vmem:[#allocation2 + $0x78] sm:$0xff] }
 0x304   : > { %3729 = vst [vmem:[#allocation2 + $0xa9] sm:$0xff] %v11191_v61  ;;  %v8502_v62 = vpop.f32.mrb[14].mxu0  ;;  %8580 = vmatprep.mubr.f32.mxu1 %v11191_v61 }
 0x305   : > { %v11202_v1 = vmax.f32 %v8502_v62, 0.0  ;;  %v3509_v2 = vpop.f32.mrb[15].mxu0  ;;  %8581 = vmatmul.mubr.f32.gmra.mrb[8].mxu1 %v11188_v59  ;;  %v7242_v62 = vld [vmem:[%s11995_s2 + $0x148] sm:$0xff] }
 0x306   : > { %v11205_v27 = vmax.f32 %v3509_v2, 0.0  ;;  %9298 = vmatpush3.bf16.msra.mxu1 %v9295_v55  ;;  %v11306_v55 = vld [vmem:[#allocation2 + $0x20] sm:$0xff]  ;;  %v11330_v2 = vld [vmem:[#allocation2 + $0x50] sm:$0xff] }
 0x307   : > { %3732 = vst [vmem:[#allocation2 + $0xc9] sm:$0xff] %v11202_v1  ;;  %9300 = vmatprep.subr.bf16.mxu1 %v9299_v28 }
 0x308   : > { %3731 = vst [vmem:[#allocation2 + $0xc1] sm:$0xff] %v11205_v27  ;;  %v8505_v30 = vpop.f32.mrb[16].mxu0  ;;  %8583 = vmatprep.mubr.f32.mxu1 %v11205_v27 }
 0x309   : > { %v11216_v36 = vmax.f32 %v8505_v30, 0.0  ;;  %v3519_v5 = vpop.f32.mrb[17].mxu0  ;;  %8584 = vmatmul.mubr.f32.gmra.mrb[10].mxu1 %v11202_v1  ;;  %v7244_v30 = vld [vmem:[%s11995_s2 + $0x158] sm:$0xff] }
 0x30a   : > { %v11219_v38 = vmax.f32 %v3519_v5, 0.0  ;;  %9302 = vmatpush3.bf16.msra.mxu1 %v9299_v28  ;;  %v7241_v28 = vld [vmem:[%s11995_s2 + $0x140] sm:$0xff]  ;;  %v11342_v5 = vld [vmem:[#allocation2 + $0x68] sm:$0xff] }
 0x30b   : > { %3734 = vst [vmem:[#allocation2 + $0xe1] sm:$0xff] %v11216_v36  ;;  %9304 = vmatprep.subr.bf16.mxu1 %v9303_v29  ;;  %v9327_v0 = vpack.c.bf16 %v7242_v62, %v7241_v28  ;;  %v11382_v15 = vld [vmem:[#allocation2 + $0xb0] sm:$0xff] }
 0x30c   : > { %3733 = vst [vmem:[#allocation2 + $0xd9] sm:$0xff] %v11219_v38  ;;  %v8508_v37 = vpop.f32.mrb[18].mxu0  ;;  %8586 = vmatprep.mubr.f32.mxu1 %v11219_v38 }
 0x30d   : > { %v11230_v31 = vmax.f32 %v8508_v37, 0.0  ;;  %v3529_v39 = vpop.f32.mrb[19].mxu0  ;;  %8587 = vmatmul.mubr.f32.gmra.mrb[12].mxu1 %v11216_v36  ;;  %v7246_v37 = vld [vmem:[%s11995_s2 + $0x168] sm:$0xff] }
 0x30e   : > { %v11233_v4 = vmax.f32 %v3529_v39, 0.0  ;;  %9306 = vmatpush3.bf16.msra.mxu1 %v9303_v29  ;;  %v7243_v29 = vld [vmem:[%s11995_s2 + $0x150] sm:$0xff]  ;;  %v11354_v39 = vld [vmem:[#allocation2 + $0x80] sm:$0xff] }
 0x30f   : > { %3736 = vst [vmem:[#allocation2 + $0xf9] sm:$0xff] %v11230_v31  ;;  %9308 = vmatprep.subr.bf16.mxu1 %v9307_v34  ;;  %v9331_v3 = vpack.c.bf16 %v7244_v30, %v7243_v29  ;;  %v11385_v16 = vld [vmem:[#allocation2 + $0xc0] sm:$0xff] }
 0x310   : > { %3735 = vst [vmem:[#allocation2 + $0xf1] sm:$0xff] %v11233_v4  ;;  %v8511_v41 = vpop.f32.mrb[20].mxu0  ;;  %8589 = vmatprep.mubr.f32.mxu1 %v11233_v4 }
 0x311   : > { %v11238_v42 = vmax.f32 %v8511_v41, 0.0  ;;  %v3539_v43 = vpop.f32.mrb[21].mxu0  ;;  %8590 = vmatmul.mubr.f32.gmra.mrb[14].mxu1 %v11230_v31  ;;  %v7248_v41 = vld [vmem:[%s11995_s2 + $0x178] sm:$0xff] }
 0x312   : > { %v11241_v44 = vmax.f32 %v3539_v43, 0.0  ;;  %9310 = vmatpush3.bf16.msra.mxu1 %v9307_v34  ;;  %v7245_v34 = vld [vmem:[%s11995_s2 + $0x160] sm:$0xff]  ;;  %v11363_v43 = vld [vmem:[#allocation2 + $0x90] sm:$0xff] }
 0x313   : > { %3738 = vst [vmem:[#allocation2 + $0x111] sm:$0xff] %v11238_v42  ;;  %9312 = vmatprep.subr.bf16.mxu1 %v9311_v40  ;;  %v9335_v33 = vpack.c.bf16 %v7246_v37, %v7245_v34  ;;  %v11391_v22 = vld [vmem:[#allocation2 + $0xd8] sm:$0xff]  ;;  %v11394_v23 = vld [vmem:[#allocation2 + $0xe0] sm:$0xff] }
 0x314   : > { %3737 = vst [vmem:[#allocation2 + $0x109] sm:$0xff] %v11241_v44  ;;  %v8514_v45 = vpop.f32.mrb[22].mxu0  ;;  %8592 = vmatprep.mubr.f32.mxu1 %v11241_v44  ;;  %v4296_v37 = vld [vmem:[#allocation2 + $0x2] sm:$0xff] }
 0x315   : > { %v11246_v46 = vmax.f32 %v8514_v45, 0.0  ;;  %v3549_v47 = vpop.f32.mrb[23].mxu0  ;;  %8593 = vmatmul.mubr.f32.gmra.mrb[16].mxu1 %v11238_v42 }
 0x316   : > { %v11249_v7 = vmax.f32 %v3549_v47, 0.0 }
 0x317   : > { %3740 = vst [vmem:[#allocation2 + $0x129] sm:$0xff] %v11246_v46  ;;  %v11400_v56 = vld [vmem:[#allocation2 + $0xf8] sm:$0xff] }
 0x318   : > { %3739 = vst [vmem:[#allocation2 + $0x121] sm:$0xff] %v11249_v7  ;;  %v8517_v48 = vpop.f32.mrb[24].mxu0  ;;  %8595 = vmatprep.mubr.f32.mxu1 %v11249_v7 }
 0x319   : > { %v11254_v8 = vmax.f32 %v8517_v48, 0.0  ;;  %v3559_v49 = vpop.f32.mrb[25].mxu0  ;;  %8596 = vmatmul.mubr.f32.gmra.mrb[18].mxu1 %v11246_v46 }
 0x31a   : > { %v11257_v50 = vmax.f32 %v3559_v49, 0.0  ;;  %v11370_v49 = vld [vmem:[#allocation2 + $0x98] sm:$0xff] }
 0x31b   : > { %3742 = vst [vmem:[#allocation2 + $0x141] sm:$0xff] %v11254_v8  ;;  %v11403_v57 = vld [vmem:[#allocation2 + $0x108] sm:$0xff] }
 0x31c   : > { %3741 = vst [vmem:[#allocation2 + $0x139] sm:$0xff] %v11257_v50  ;;  %v8520_v9 = vpop.f32.mrb[26].mxu0  ;;  %8598 = vmatprep.mubr.f32.mxu1 %v11257_v50 }
 0x31d   : > { %v11262_v10 = vmax.f32 %v8520_v9, 0.0  ;;  %v3569_v51 = vpop.f32.mrb[27].mxu0  ;;  %8599 = vmatmul.mubr.f32.gmra.mrb[20].mxu1 %v11254_v8  ;;  %v7249_v9 = vld [vmem:[%s11995_s2 + $0x180] sm:$0xff] }
 0x31e   : > { %v11265_v52 = vmax.f32 %v3569_v51, 0.0  ;;  %v7250_v51 = vld [vmem:[%s11995_s2 + $0x188] sm:$0xff] }
 0x31f   : > { %3744 = vst [vmem:[#allocation2 + $0x159] sm:$0xff] %v11262_v10  ;;  %v11409_v28 = vld [vmem:[#allocation2 + $0x120] sm:$0xff]  ;;  %v11412_v62 = vld [vmem:[#allocation2 + $0x128] sm:$0xff] }
 0x320   : > { %3743 = vst [vmem:[#allocation2 + $0x151] sm:$0xff] %v11265_v52  ;;  %v8523_v11 = vpop.f32.mrb[28].mxu0  ;;  %8601 = vmatprep.mubr.f32.mxu1 %v11265_v52 }
 0x321   : > { %v11270_v12 = vmax.f32 %v8523_v11, 0.0  ;;  %v3579_v53 = vpop.f32.mrb[29].mxu0  ;;  %8602 = vmatmul.mubr.f32.gmra.mrb[22].mxu1 %v11262_v10  ;;  %v11379_v11 = vld [vmem:[#allocation2 + $0xa8] sm:$0xff] }
 0x322   : > { %v11273_v13 = vmax.f32 %v3579_v53, 0.0  ;;  %v9343_v53 = vpack.c.bf16 %v7250_v51, %v7249_v9  ;;  %v7253_v51 = vld [vmem:[%s11995_s2 + $0x1a0] sm:$0xff] }
 0x323   : > { %3746 = vst [vmem:[#allocation2 + $0x171] sm:$0xff] %v11270_v12  ;;  %v11418_v29 = vld [vmem:[#allocation2 + $0x140] sm:$0xff] }
 0x324   : > { %3745 = vst [vmem:[#allocation2 + $0x169] sm:$0xff] %v11273_v13  ;;  %v11277_v14 = vpop.f32.mrb[30].mxu0  ;;  %8604 = vmatprep.mubr.f32.mxu1 %v11273_v13 }
 0x325   : > { %v12060_v17 = vmax.f32 %v11277_v14, 0.0  ;;  %v11287_v18 = vpop.f32.mrb[31].mxu0  ;;  %8605 = vmatmul.mubr.f32.gmra.mrb[24].mxu1 %v11270_v12 }
 0x326   : > { %v12061_v19 = vmax.f32 %v11287_v18, 0.0  ;;  %8639 = vmatprep.mubr.f32.mxu1 %v10082_v35 }
 0x327   : > { %3748 = vst [vmem:[#allocation2 + $0x189] sm:$0xff] %v12060_v17  ;;  %v11421_v30 = vld [vmem:[#allocation2 + $0x150] sm:$0xff]  ;;  %v7254_v17 = vld [vmem:[%s11995_s2 + $0x1a8] sm:$0xff] }
 0x328   : > { %3747 = vst [vmem:[#allocation2 + $0x181] sm:$0xff] %v12061_v19  ;;  %v11365_v45 = vpop.f32.mrb[32].mxu0  ;;  %v11445_v19 = vld [vmem:[#allocation2 + $0x1a] sm:$0xff] }
 0x329   : > { %8640 = vmatmul.mubr.f32.vlgmr.msra.gmra.mrb[26].mxu1 %v10082_v35  ;;  %v11315_v35 = vld [vmem:[#allocation2 + $0x30] sm:$0xff]  ;;  %12180 = vst [vmem:[#allocation12_spill] sm:$0xff] %v11365_v45  ;;  %v11368_v47 = vpop.f32.mrb[33].mxu0  ;;  %v11448_v45 = vld [vmem:[#allocation2 + $0x22] sm:$0xff] }
 0x32a   : > { %9314 = vmatpush3.bf16.msra.mxu1 %v9311_v40  ;;  %8642 = vmatprep.mubr.f32.mxu1 %v11303_v24  ;;  %v7247_v40 = vld [vmem:[%s11995_s2 + $0x170] sm:$0xff]  ;;  %12181 = vst [vmem:[#allocation13_spill] sm:$0xff] %v11368_v47  ;;  %v9351_v47 = vpack.c.bf16 %v7254_v17, %v7253_v51  ;;  %12182 = vst [vmem:[#allocation19_spill] sm:$0xff] %v11448_v45  ;;  %v11460_v17 = vld [vmem:[#allocation2 + $0x3a] sm:$0xff] }
 0x32b   : > { %9316 = vmatprep.subr.bf16.mxu1 %v9315_v21  ;;  %v9339_v48 = vpack.c.bf16 %v7248_v41, %v7247_v40  ;;  %v11427_v34 = vld [vmem:[#allocation2 + $0x168] sm:$0xff]  ;;  %v7251_v40 = vld [vmem:[%s11995_s2 + $0x190] sm:$0xff]  ;;  %v7252_v41 = vld [vmem:[%s11995_s2 + $0x198] sm:$0xff]  ;;  %12184 = vst [vmem:[#allocation31_spill] sm:$0xff] %v11460_v17 }
 0x32c   : > { %v9347_v9 = vpack.c.bf16 %v7252_v41, %v7251_v40  ;;  %v7256_v40 = vld [vmem:[%s11995_s2 + $0x1b8] sm:$0xff]  ;;  %v7258_v51 = vld [vmem:[%s11995_s2 + $0x1c8] sm:$0xff] }
 0x32d   : > { %8643 = vmatmul.mubr.f32.gmra.mrb[28].mxu1 %v11306_v55  ;;  %v11457_v41 = vld [vmem:[#allocation2 + $0x32] sm:$0xff] }
 0x32e   : > { %8645 = vmatprep.mubr.f32.mxu1 %v11315_v35  ;;  %9318 = vmatpush3.bf16.msra.mxu1 %v9315_v21  ;;  %v11388_v21 = vld [vmem:[#allocation2 + $0xc8] sm:$0xff]  ;;  %12183 = vst [vmem:[#allocation29_spill] sm:$0xff] %v11457_v41 }
 0x32f   : > { %9320 = vmatprep.subr.bf16.mxu1 %v9319_v26 }
 0x331   : > { %8646 = vmatmul.mubr.f32.gmra.mrb[30].mxu1 %v11318_v60 }
 0x332   : > { %8648 = vmatprep.mubr.f32.mxu1 %v11327_v63  ;;  %9322 = vmatpush3.bf16.msra.mxu1 %v9319_v26  ;;  %v11397_v26 = vld [vmem:[#allocation2 + $0xf0] sm:$0xff] }
 0x333   : > { %9324 = vmatprep.subr.bf16.mxu1 %v9323_v58 }
 0x335   : > { %8649 = vmatmul.mubr.f32.gmra.mrb[0].mxu1 %v11330_v2 }
 0x336   : > { %8651 = vmatprep.mubr.f32.mxu1 %v11339_v32  ;;  %9326 = vmatpush3.bf16.msra.mxu1 %v9323_v58  ;;  %v11406_v58 = vld [vmem:[#allocation2 + $0x110] sm:$0xff] }
 0x337   : > { %9328 = vmatprep.subr.bf16.mxu1 %v9327_v0 }
 0x339   : > { %8652 = vmatmul.mubr.f32.gmra.mrb[2].mxu1 %v11342_v5 }
 0x33a   : > { %8654 = vmatprep.mubr.f32.mxu1 %v11351_v6  ;;  %9330 = vmatpush3.bf16.msra.mxu1 %v9327_v0  ;;  %v11415_v0 = vld [vmem:[#allocation2 + $0x138] sm:$0xff] }
 0x33b   : > { %9332 = vmatprep.subr.bf16.mxu1 %v9331_v3 }
 0x33d   : > { %8655 = vmatmul.mubr.f32.gmra.mrb[4].mxu1 %v11354_v39 }
 0x33e   : > { %8657 = vmatprep.mubr.f32.mxu1 %v11363_v43  ;;  %9334 = vmatpush3.bf16.msra.mxu1 %v9331_v3  ;;  %v11424_v3 = vld [vmem:[#allocation2 + $0x158] sm:$0xff] }
 0x33f   : > { %9336 = vmatprep.subr.bf16.mxu1 %v9335_v33 }
 0x341   : > { %8658 = vmatmul.mubr.f32.gmra.mrb[6].mxu1 %v11370_v49 }
 0x342   : > { %8660 = vmatprep.mubr.f32.mxu1 %v11379_v11  ;;  %9338 = vmatpush3.bf16.msra.mxu1 %v9335_v33  ;;  %v11430_v33 = vld [vmem:[#allocation2 + $0x170] sm:$0xff] }
 0x343   : > { %9340 = vmatprep.subr.bf16.mxu1 %v9339_v48 }
 0x345   : > { %8661 = vmatmul.mubr.f32.gmra.mrb[8].mxu1 %v11382_v15 }
 0x346   : > { %8663 = vmatprep.mubr.f32.mxu1 %v11385_v16  ;;  %9342 = vmatpush3.bf16.msra.mxu1 %v9339_v48  ;;  %v4297_v48 = vld [vmem:[#allocation2 + $0xa] sm:$0xff] }
 0x347   : > { %9344 = vmatprep.subr.bf16.mxu1 %v9343_v53 }
 0x349   : > { %8664 = vmatmul.mubr.f32.gmra.mrb[10].mxu1 %v11388_v21 }
 0x34a   : > { %8666 = vmatprep.mubr.f32.mxu1 %v11391_v22 }
 0x34d   : > { %8667 = vmatmul.mubr.f32.gmra.mrb[12].mxu1 %v11394_v23 }
 0x34e   : > { %8669 = vmatprep.mubr.f32.mxu1 %v11397_v26 }
 0x351   : > { %8670 = vmatmul.mubr.f32.gmra.mrb[14].mxu1 %v11400_v56 }
 0x352   : > { %8672 = vmatprep.mubr.f32.mxu1 %v11403_v57 }
 0x355   : > { %8673 = vmatmul.mubr.f32.gmra.mrb[16].mxu1 %v11406_v58 }
 0x356   : > { %8675 = vmatprep.mubr.f32.mxu1 %v11409_v28 }
 0x359   : > { %8676 = vmatmul.mubr.f32.gmra.mrb[18].mxu1 %v11412_v62 }
 0x35a   : > { %8678 = vmatprep.mubr.f32.mxu1 %v11415_v0 }
 0x35d   : > { %8679 = vmatmul.mubr.f32.gmra.mrb[20].mxu1 %v11418_v29 }
 0x35e   : > { %8681 = vmatprep.mubr.f32.mxu1 %v11421_v30 }
 0x361   : > { %8682 = vmatmul.mubr.f32.gmra.mrb[22].mxu1 %v11424_v3 }
 0x362   : > { %8684 = vmatprep.mubr.f32.mxu1 %v11427_v34 }
 0x365   : > { %8685 = vmatmul.mubr.f32.gmra.mrb[24].mxu1 %v11430_v33 }
 0x366   : > { %8719 = vmatprep.mubr.f32.mxu1 %v4296_v37  ;;  %v7255_v37 = vld [vmem:[%s11995_s2 + $0x1b0] sm:$0xff] }
 0x369   : > { %8720 = vmatmul.mubr.f32.vlgmr.msra.gmra.mrb[26].mxu1 %v4297_v48  ;;  %v7257_v48 = vld [vmem:[%s11995_s2 + $0x1c0] sm:$0xff] }
 0x36a   : > { %9346 = vmatpush3.bf16.msra.mxu1 %v9343_v53  ;;  %8722 = vmatprep.mubr.f32.mxu1 %v11445_v19  ;;  %v9355_v53 = vpack.c.bf16 %v7256_v40, %v7255_v37  ;;  %v11472_v37 = vld [vmem:[#allocation2 + $0x52] sm:$0xff] }
 0x36b   : > { %9348 = vmatprep.subr.bf16.mxu1 %v9347_v9  ;;  %12186 = vst [vmem:[#allocation34_spill] sm:$0xff] %v11472_v37  ;;  %v7259_v40 = vld [vmem:[%s11995_s2 + $0x1d0] sm:$0xff] }
 0x36d   : > { %8723 = vmatmul.mubr.f32.gmra.mrb[28].mxu1 %v11448_v45  ;;  %v11469_v45 = vld [vmem:[#allocation2 + $0x4a] sm:$0xff] }
 0x36e   : > { %8725 = vmatprep.mubr.f32.mxu1 %v11457_v41  ;;  %9350 = vmatpush3.bf16.msra.mxu1 %v9347_v9  ;;  %12185 = vst [vmem:[#allocation32_spill] sm:$0xff] %v11469_v45  ;;  %v9359_v9 = vpack.c.bf16 %v7258_v51, %v7257_v48  ;;  %v7260_v41 = vld [vmem:[%s11995_s2 + $0x1d8] sm:$0xff]  ;;  %v11484_v48 = vld [vmem:[#allocation2 + $0x6a] sm:$0xff]  ;;  %v7261_v51 = vld [vmem:[%s11995_s2 + $0x1e0] sm:$0xff] }
 0x36f   : > { %9352 = vmatprep.subr.bf16.mxu1 %v9351_v47  ;;  %12188 = vst [vmem:[#allocation4_spill] sm:$0xff] %v11484_v48 }
 0x371   : > { %8726 = vmatmul.mubr.f32.gmra.mrb[30].mxu1 %v11460_v17  ;;  %v11481_v17 = vld [vmem:[#allocation2 + $0x62] sm:$0xff] }
 0x372   : > { %8728 = vmatprep.mubr.f32.mxu1 %v11469_v45  ;;  %9354 = vmatpush3.bf16.msra.mxu1 %v9351_v47  ;;  %12187 = vst [vmem:[#allocation36_spill] sm:$0xff] %v11481_v17  ;;  %v9363_v47 = vpack.c.bf16 %v7260_v41, %v7259_v40  ;;  %v7262_v45 = vld [vmem:[%s11995_s2 + $0x1e8] sm:$0xff]  ;;  %v7263_v40 = vld [vmem:[%s11995_s2 + $0x1f0] sm:$0xff] }
 0x373   : > { %9356 = vmatprep.subr.bf16.mxu1 %v9355_v53  ;;  %v11496_v41 = vld [vmem:[#allocation2 + $0x82] sm:$0xff] }
 0x374   : > { %12190 = vst [vmem:[#allocation6_spill] sm:$0xff] %v11496_v41 }
 0x375   : > { %8729 = vmatmul.mubr.f32.gmra.mrb[0].mxu1 %v11472_v37  ;;  %v11493_v37 = vld [vmem:[#allocation2 + $0x7a] sm:$0xff] }
 0x376   : > { %8731 = vmatprep.mubr.f32.mxu1 %v11481_v17  ;;  %9358 = vmatpush3.bf16.msra.mxu1 %v9355_v53  ;;  %12189 = vst [vmem:[#allocation5_spill] sm:$0xff] %v11493_v37  ;;  %v9367_v53 = vpack.c.bf16 %v7262_v45, %v7261_v51  ;;  %v7264_v17 = vld [vmem:[%s11995_s2 + $0x1f8] sm:$0xff]  ;;  %v7265_v51 = vld [vmem:[%s11995_s2 + $0x200] sm:$0xff] }
 0x377   : > { %9360 = vmatprep.subr.bf16.mxu1 %v9359_v9  ;;  %v11508_v45 = vld [vmem:[#allocation2 + $0x9a] sm:$0xff] }
 0x378   : > { %12192 = vst [vmem:[#allocation8_spill] sm:$0xff] %v11508_v45 }
 0x379   : > { %8732 = vmatmul.mubr.f32.gmra.mrb[2].mxu1 %v11484_v48  ;;  %v11505_v48 = vld [vmem:[#allocation2 + $0x92] sm:$0xff] }
 0x37a   : > { %8734 = vmatprep.mubr.f32.mxu1 %v11493_v37  ;;  %9362 = vmatpush3.bf16.msra.mxu1 %v9359_v9  ;;  %12191 = vst [vmem:[#allocation7_spill] sm:$0xff] %v11505_v48  ;;  %v9371_v9 = vpack.c.bf16 %v7264_v17, %v7263_v40  ;;  %v7266_v37 = vld [vmem:[%s11995_s2 + $0x208] sm:$0xff]  ;;  %v11520_v17 = vld [vmem:[#allocation2 + $0xb2] sm:$0xff] }
 0x37b   : > { %9364 = vmatprep.subr.bf16.mxu1 %v9363_v47  ;;  %v11523_v40 = vld [vmem:[#allocation2 + $0xc2] sm:$0xff] }
 0x37c   : > { %12193 = vst [vmem:[#allocation9_spill] sm:$0xff] %v11523_v40 }
 0x37d   : > { %8735 = vmatmul.mubr.f32.gmra.mrb[4].mxu1 %v11496_v41  ;;  %v11517_v41 = vld [vmem:[#allocation2 + $0xaa] sm:$0xff] }
 0x37e   : > { %8737 = vmatprep.mubr.f32.mxu1 %v11505_v48  ;;  %9366 = vmatpush3.bf16.msra.mxu1 %v9363_v47  ;;  %v9375_v47 = vpack.c.bf16 %v7266_v37, %v7265_v51  ;;  %v11526_v48 = vld [vmem:[#allocation2 + $0xca] sm:$0xff]  ;;  %v11535_v37 = vld [vmem:[#allocation2 + $0xf2] sm:$0xff]  ;;  %v11538_v51 = vld [vmem:[#allocation2 + $0xfa] sm:$0xff] }
 0x37f   : > { %9368 = vmatprep.subr.bf16.mxu1 %v9367_v53  ;;  %12194 = vst [vmem:[#allocation10_spill] sm:$0xff] %v11526_v48  ;;  %12197 = vst [vmem:[#allocation39_spill] sm:$0xff] %v11535_v37 }
 0x380   : > { %12198 = vst [vmem:[#allocation14_spill] sm:$0xff] %v11538_v51 }
 0x381   : > { %8738 = vmatmul.mubr.f32.gmra.mrb[6].mxu1 %v11508_v45  ;;  %v11529_v45 = vld [vmem:[#allocation2 + $0xda] sm:$0xff] }
 0x382   : > { %8740 = vmatprep.mubr.f32.mxu1 %v11517_v41  ;;  %9370 = vmatpush3.bf16.msra.mxu1 %v9367_v53  ;;  %12195 = vst [vmem:[#allocation11_spill] sm:$0xff] %v11529_v45  ;;  %v11532_v53 = vld [vmem:[#allocation2 + $0xe2] sm:$0xff] }
 0x383   : > { %9372 = vmatprep.subr.bf16.mxu1 %v9371_v9  ;;  %12196 = vst [vmem:[#allocation38_spill] sm:$0xff] %v11532_v53 }
 0x385   : > { %8741 = vmatmul.mubr.f32.gmra.mrb[8].mxu1 %v11520_v17 }
 0x386   : > { %8743 = vmatprep.mubr.f32.mxu1 %v11523_v40  ;;  %9374 = vmatpush3.bf16.msra.mxu1 %v9371_v9  ;;  %v11541_v9 = vld [vmem:[#allocation2 + $0x10a] sm:$0xff] }
 0x387   : > { %9376 = vmatprep.subr.bf16.mxu1 %v9375_v47  ;;  %12199 = vst [vmem:[#allocation15_spill] sm:$0xff] %v11541_v9 }
 0x389   : > { %8744 = vmatmul.mubr.f32.gmra.mrb[10].mxu1 %v11526_v48  ;;  %v11544_v48 = vld [vmem:[#allocation2 + $0x112] sm:$0xff] }
 0x38a   : > { %8746 = vmatprep.mubr.f32.mxu1 %v11529_v45  ;;  %12200 = vst [vmem:[#allocation16_spill] sm:$0xff] %v11544_v48  ;;  %v11547_v45 = vld [vmem:[#allocation2 + $0x122] sm:$0xff] }
 0x38b   : > { %12201 = vst [vmem:[#allocation17_spill] sm:$0xff] %v11547_v45 }
 0x38d   : > { %8747 = vmatmul.mubr.f32.gmra.mrb[12].mxu1 %v11532_v53  ;;  %v11550_v53 = vld [vmem:[#allocation2 + $0x12a] sm:$0xff] }
 0x38e   : > { %8749 = vmatprep.mubr.f32.mxu1 %v11535_v37  ;;  %12202 = vst [vmem:[#allocation18_spill] sm:$0xff] %v11550_v53  ;;  %v11553_v37 = vld [vmem:[#allocation2 + $0x13a] sm:$0xff] }
 0x38f   : > { %12203 = vst [vmem:[#allocation20_spill] sm:$0xff] %v11553_v37 }
 0x391   : > { %8750 = vmatmul.mubr.f32.gmra.mrb[14].mxu1 %v11538_v51  ;;  %v11556_v51 = vld [vmem:[#allocation2 + $0x142] sm:$0xff] }
 0x392   : > { %8752 = vmatprep.mubr.f32.mxu1 %v11541_v9  ;;  %12204 = vst [vmem:[#allocation21_spill] sm:$0xff] %v11556_v51  ;;  %v11559_v9 = vld [vmem:[#allocation2 + $0x152] sm:$0xff] }
 0x393   : > { %12205 = vst [vmem:[#allocation22_spill] sm:$0xff] %v11559_v9 }
 0x395   : > { %8753 = vmatmul.mubr.f32.gmra.mrb[16].mxu1 %v11544_v48  ;;  %v11562_v48 = vld [vmem:[#allocation2 + $0x15a] sm:$0xff] }
 0x396   : > { %8755 = vmatprep.mubr.f32.mxu1 %v11547_v45  ;;  %12206 = vst [vmem:[#allocation23_spill] sm:$0xff] %v11562_v48  ;;  %v11565_v45 = vld [vmem:[#allocation2 + $0x16a] sm:$0xff] }
 0x397   : > { %12207 = vst [vmem:[#allocation24_spill] sm:$0xff] %v11565_v45 }
 0x399   : > { %8756 = vmatmul.mubr.f32.gmra.mrb[18].mxu1 %v11550_v53  ;;  %v11568_v53 = vld [vmem:[#allocation2 + $0x172] sm:$0xff] }
 0x39a   : > { %8758 = vmatprep.mubr.f32.mxu1 %v11553_v37  ;;  %v7267_v37 = vld [vmem:[%s11995_s2 + $0x210] sm:$0xff] }
 0x39d   : > { %8759 = vmatmul.mubr.f32.gmra.mrb[20].mxu1 %v11556_v51  ;;  %v7268_v51 = vld [vmem:[%s11995_s2 + $0x218] sm:$0xff] }
 0x39e   : > { %8761 = vmatprep.mubr.f32.mxu1 %v11559_v9  ;;  %v9379_v9 = vpack.c.bf16 %v7268_v51, %v7267_v37  ;;  %v7272_v37 = vld [vmem:[%s11995_s2 + $0x238] sm:$0xff] }
 0x3a1   : > { %8762 = vmatmul.mubr.f32.gmra.mrb[22].mxu1 %v11562_v48  ;;  %v7269_v48 = vld [vmem:[%s11995_s2 + $0x220] sm:$0xff] }
 0x3a2   : > { %8764 = vmatprep.mubr.f32.mxu1 %v11565_v45  ;;  %v7270_v45 = vld [vmem:[%s11995_s2 + $0x228] sm:$0xff] }
 0x3a3   : > { %v9383_v40 = vpack.c.bf16 %v7270_v45, %v7269_v48  ;;  %v7274_v48 = vld [vmem:[%s11995_s2 + $0x248] sm:$0xff]  ;;  %v7276_v45 = vld [vmem:[%s11995_s2 + $0x258] sm:$0xff] }
 0x3a5   : > { %8765 = vmatmul.mubr.f32.gmra.mrb[24].mxu1 %v11568_v53 }
 0x3a6   : > { %8799 = vmatprep.mubr.f32.mxu1 %v11303_v24  ;;  %v7271_v24 = vld [vmem:[%s11995_s2 + $0x230] sm:$0xff] }
 0x3a9   : > { %8800 = vmatmul.mubr.f32.vlgmr.msra.gmra.mrb[26].mxu1 %v11306_v55  ;;  %v9387_v55 = vpack.c.bf16 %v7272_v37, %v7271_v24 }
 0x3aa   : > { %9378 = vmatpush3.bf16.msra.mxu1 %v9375_v47  ;;  %8802 = vmatprep.mubr.f32.mxu1 %v11315_v35  ;;  %v7273_v35 = vld [vmem:[%s11995_s2 + $0x240] sm:$0xff]  ;;  %v7278_v47 = vld [vmem:[%s11995_s2 + $0x268] sm:$0xff] }
 0x3ab   : > { %9380 = vmatprep.subr.bf16.mxu1 %v9379_v9 }
 0x3ad   : > { %8803 = vmatmul.mubr.f32.gmra.mrb[28].mxu1 %v11318_v60  ;;  %v9391_v60 = vpack.c.bf16 %v7274_v48, %v7273_v35  ;;  %v7290_v35 = vld [vmem:[%s11995_s2 + $0x2c8] sm:$0xff] }
 0x3ae   : > { %8805 = vmatprep.mubr.f32.mxu1 %v11327_v63  ;;  %9382 = vmatpush3.bf16.msra.mxu1 %v9379_v9  ;;  %v7275_v63 = vld [vmem:[%s11995_s2 + $0x250] sm:$0xff]  ;;  %v7282_v9 = vld [vmem:[%s11995_s2 + $0x288] sm:$0xff] }
 0x3af   : > { %9384 = vmatprep.subr.bf16.mxu1 %v9383_v40  ;;  %v11699_v48 = vld [vmem:[#allocation2 + $0x61] sm:$0xff] }
 0x3b1   : > { %8806 = vmatmul.mubr.f32.gmra.mrb[30].mxu1 %v11330_v2  ;;  %v9395_v2 = vpack.c.bf16 %v7276_v45, %v7275_v63  ;;  %v11702_v63 = vld [vmem:[#allocation2 + $0x69] sm:$0xff] }
 0x3b2   : > { %8808 = vmatprep.mubr.f32.mxu1 %v11339_v32  ;;  %9386 = vmatpush3.bf16.msra.mxu1 %v9383_v40  ;;  %v7277_v32 = vld [vmem:[%s11995_s2 + $0x260] sm:$0xff]  ;;  %v7280_v40 = vld [vmem:[%s11995_s2 + $0x278] sm:$0xff]  ;;  %v7291_v45 = vld [vmem:[%s11995_s2 + $0x2d0] sm:$0xff] }
 0x3b3   : > { %9388 = vmatprep.subr.bf16.mxu1 %v9387_v55 }
 0x3b5   : > { %8809 = vmatmul.mubr.f32.gmra.mrb[0].mxu1 %v11342_v5  ;;  %v9399_v5 = vpack.c.bf16 %v7278_v47, %v7277_v32  ;;  %v11712_v47 = vld [vmem:[#allocation2 + $0x81] sm:$0xff] }
 0x3b6   : > { %8811 = vmatprep.mubr.f32.mxu1 %v11351_v6  ;;  %9390 = vmatpush3.bf16.msra.mxu1 %v9387_v55  ;;  %v7279_v6 = vld [vmem:[%s11995_s2 + $0x270] sm:$0xff]  ;;  %v7289_v55 = vld [vmem:[%s11995_s2 + $0x2c0] sm:$0xff] }
 0x3b7   : > { %9392 = vmatprep.subr.bf16.mxu1 %v9391_v60 }
 0x3b9   : > { %8812 = vmatmul.mubr.f32.gmra.mrb[2].mxu1 %v11354_v39  ;;  %v9403_v39 = vpack.c.bf16 %v7280_v40, %v7279_v6  ;;  %v7294_v6 = vld [vmem:[%s11995_s2 + $0x2e8] sm:$0xff]  ;;  %v7295_v40 = vld [vmem:[%s11995_s2 + $0x2f0] sm:$0xff] }
 0x3ba   : > { %8814 = vmatprep.mubr.f32.mxu1 %v11363_v43  ;;  %9394 = vmatpush3.bf16.msra.mxu1 %v9391_v60  ;;  %v7281_v43 = vld [vmem:[%s11995_s2 + $0x280] sm:$0xff]  ;;  %v9423_v60 = vpack.c.bf16 %v7290_v35, %v7289_v55 }
 0x3bb   : > { %9396 = vmatprep.subr.bf16.mxu1 %v9395_v2  ;;  %v7313_v35 = vld [vmem:[%s11995_s2 + $0x380] sm:$0xff] }
 0x3bd   : > { %8815 = vmatmul.mubr.f32.gmra.mrb[4].mxu1 %v11370_v49  ;;  %v9407_v49 = vpack.c.bf16 %v7282_v9, %v7281_v43  ;;  %v7298_v9 = vld [vmem:[%s11995_s2 + $0x308] sm:$0xff] }
 0x3be   : > { %8817 = vmatprep.mubr.f32.mxu1 %v11379_v11  ;;  %9398 = vmatpush3.bf16.msra.mxu1 %v9395_v2  ;;  %v7292_v2 = vld [vmem:[%s11995_s2 + $0x2d8] sm:$0xff] }
 0x3bf   : > { %9400 = vmatprep.subr.bf16.mxu1 %v9399_v5  ;;  %v9427_v32 = vpack.c.bf16 %v7292_v2, %v7291_v45  ;;  %v12221_v45 = vld [vmem:[#allocation9_spill] sm:$0xff] }
 0x3c0   : > { %v11626_v51 = vpop.f32.mrb[34].mxu0 }
 0x3c1   : > { %v11634_v24 = vpop.f32.mrb[35].mxu0  ;;  %8818 = vmatmul.mubr.f32.gmra.mrb[6].mxu1 %v11382_v15  ;;  %v11657_v15 = vld [vmem:[#allocation2 + $0x180] sm:$0xff] }
 0x3c2   : > { %8820 = vmatprep.mubr.f32.mxu1 %v11385_v16  ;;  %9402 = vmatpush3.bf16.msra.mxu1 %v9399_v5  ;;  %v11660_v16 = vld [vmem:[#allocation2 + $0x188] sm:$0xff]  ;;  %v7293_v5 = vld [vmem:[%s11995_s2 + $0x2e0] sm:$0xff] }
 0x3c3   : > { %9404 = vmatprep.subr.bf16.mxu1 %v9403_v39 }
 0x3c4   : > { %v11638_v11 = vpop.f32.mrb[36].mxu0 }
 0x3c5   : > { %v11640_v37 = vpop.f32.mrb[37].mxu0  ;;  %8821 = vmatmul.mubr.f32.gmra.mrb[8].mxu1 %v11388_v21  ;;  %v7283_v21 = vld [vmem:[%s11995_s2 + $0x290] sm:$0xff] }
 0x3c6   : > { %8823 = vmatprep.mubr.f32.mxu1 %v11391_v22  ;;  %9406 = vmatpush3.bf16.msra.mxu1 %v9403_v39  ;;  %v7284_v22 = vld [vmem:[%s11995_s2 + $0x298] sm:$0xff] }
 0x3c7   : > { %9408 = vmatprep.subr.bf16.mxu1 %v9407_v49  ;;  %v7296_v39 = vld [vmem:[%s11995_s2 + $0x2f8] sm:$0xff] }
 0x3c8   : > { %v9435_v43 = vpack.c.bf16 %v7296_v39, %v7295_v40  ;;  %v12227_v40 = vld [vmem:[#allocation15_spill] sm:$0xff]  ;;  %v12229_v39 = vld [vmem:[#allocation17_spill] sm:$0xff] }
 0x3c9   : > { %8824 = vmatmul.mubr.f32.gmra.mrb[10].mxu1 %v11394_v23  ;;  %v4908_v23 = vld [vmem:[#allocation2 + $0x19] sm:$0xff] }
 0x3ca   : > { %8826 = vmatprep.mubr.f32.mxu1 %v11397_v26  ;;  %v9411_v26 = vpack.c.bf16 %v7284_v22, %v7283_v21  ;;  %v12216_v21 = vld [vmem:[#allocation4_spill] sm:$0xff]  ;;  %v12217_v22 = vld [vmem:[#allocation5_spill] sm:$0xff] }
 0x3cd   : > { %8827 = vmatmul.mubr.f32.gmra.mrb[12].mxu1 %v11400_v56  ;;  %v4909_v56 = vld [vmem:[#allocation2 + $0x21] sm:$0xff] }
 0x3ce   : > { %8829 = vmatprep.mubr.f32.mxu1 %v11403_v57  ;;  %v7285_v57 = vld [vmem:[%s11995_s2 + $0x2a0] sm:$0xff] }
 0x3d1   : > { %8830 = vmatmul.mubr.f32.gmra.mrb[14].mxu1 %v11406_v58  ;;  %v7286_v58 = vld [vmem:[%s11995_s2 + $0x2a8] sm:$0xff] }
 0x3d2   : > { %8832 = vmatprep.mubr.f32.mxu1 %v11409_v28  ;;  %v11675_v28 = vld [vmem:[#allocation2 + $0x31] sm:$0xff] }
 0x3d5   : > { %8833 = vmatmul.mubr.f32.gmra.mrb[16].mxu1 %v11412_v62  ;;  %v9415_v62 = vpack.c.bf16 %v7286_v58, %v7285_v57  ;;  %v12218_v57 = vld [vmem:[#allocation6_spill] sm:$0xff]  ;;  %v12219_v58 = vld [vmem:[#allocation7_spill] sm:$0xff] }
 0x3d6   : > { %8835 = vmatprep.mubr.f32.mxu1 %v11415_v0  ;;  %v11678_v0 = vld [vmem:[#allocation2 + $0x39] sm:$0xff] }
 0x3d9   : > { %8836 = vmatmul.mubr.f32.gmra.mrb[18].mxu1 %v11418_v29  ;;  %v7287_v29 = vld [vmem:[%s11995_s2 + $0x2b0] sm:$0xff] }
 0x3da   : > { %8838 = vmatprep.mubr.f32.mxu1 %v11421_v30  ;;  %v7288_v30 = vld [vmem:[%s11995_s2 + $0x2b8] sm:$0xff] }
 0x3dd   : > { %8839 = vmatmul.mubr.f32.gmra.mrb[20].mxu1 %v11424_v3  ;;  %v11687_v3 = vld [vmem:[#allocation2 + $0x49] sm:$0xff] }
 0x3de   : > { %8841 = vmatprep.mubr.f32.mxu1 %v11427_v34  ;;  %v9419_v34 = vpack.c.bf16 %v7288_v30, %v7287_v29  ;;  %v7311_v29 = vld [vmem:[%s11995_s2 + $0x370] sm:$0xff]  ;;  %v7312_v30 = vld [vmem:[%s11995_s2 + $0x378] sm:$0xff] }
 0x3df   : > { %v9467_v55 = vpack.c.bf16 %v7312_v30, %v7311_v29  ;;  %v5531_v29 = vld [vmem:[#allocation2 + $0xa8] sm:$0xff] }
 0x3e1   : > { %8842 = vmatmul.mubr.f32.gmra.mrb[22].mxu1 %v11430_v33  ;;  %v11690_v33 = vld [vmem:[#allocation2 + $0x51] sm:$0xff] }
 0x3e2   : > { %8844 = vmatprep.mubr.f32.mxu1 %v11657_v15 }
 0x3e5   : > { %8845 = vmatmul.mubr.f32.gmra.mrb[24].mxu1 %v11660_v16 }
 0x3e6   : > { %8879 = vmatprep.mubr.f32.mxu1 %v4908_v23 }
 0x3e9   : > { %8880 = vmatmul.mubr.f32.vlgmr.msra.gmra.mrb[26].mxu1 %v4909_v56  ;;  %v7310_v56 = vld [vmem:[%s11995_s2 + $0x368] sm:$0xff] }
 0x3ea   : > { %9410 = vmatpush3.bf16.msra.mxu1 %v9407_v49  ;;  %8882 = vmatprep.mubr.f32.mxu1 %v11675_v28  ;;  %v7308_v49 = vld [vmem:[%s11995_s2 + $0x358] sm:$0xff] }
 0x3eb   : > { %9412 = vmatprep.subr.bf16.mxu1 %v9411_v26 }
 0x3ed   : > { %8883 = vmatmul.mubr.f32.gmra.mrb[28].mxu1 %v11678_v0 }
 0x3ee   : > { %8885 = vmatprep.mubr.f32.mxu1 %v11687_v3  ;;  %9414 = vmatpush3.bf16.msra.mxu1 %v9411_v26  ;;  %v7309_v26 = vld [vmem:[%s11995_s2 + $0x360] sm:$0xff] }
 0x3ef   : > { %9416 = vmatprep.subr.bf16.mxu1 %v9415_v62 }
 0x3f1   : > { %8886 = vmatmul.mubr.f32.gmra.mrb[30].mxu1 %v11690_v33 }
 0x3f2   : > { %8888 = vmatprep.mubr.f32.mxu1 %v11699_v48  ;;  %9418 = vmatpush3.bf16.msra.mxu1 %v9415_v62  ;;  %v9463_v62 = vpack.c.bf16 %v7310_v56, %v7309_v26  ;;  %v5529_v26 = vld [vmem:[#allocation2 + $0x90] sm:$0xff] }
 0x3f3   : > { %9420 = vmatprep.subr.bf16.mxu1 %v9419_v34 }
 0x3f5   : > { %8889 = vmatmul.mubr.f32.gmra.mrb[0].mxu1 %v11702_v63 }
 0x3f6   : > { %8891 = vmatprep.mubr.f32.mxu1 %v11165_v20  ;;  %9422 = vmatpush3.bf16.msra.mxu1 %v9419_v34  ;;  %v9431_v20 = vpack.c.bf16 %v7294_v6, %v7293_v5  ;;  %v12220_v34 = vld [vmem:[#allocation8_spill] sm:$0xff]  ;;  %v12224_v5 = vld [vmem:[#allocation38_spill] sm:$0xff]  ;;  %v12225_v6 = vld [vmem:[#allocation39_spill] sm:$0xff] }
 0x3f7   : > { %9424 = vmatprep.subr.bf16.mxu1 %v9423_v60 }
 0x3f9   : > { %8892 = vmatmul.mubr.f32.gmra.mrb[2].mxu1 %v11712_v47 }
 0x3fa   : > { %8894 = vmatprep.mubr.f32.mxu1 %v11177_v54  ;;  %9426 = vmatpush3.bf16.msra.mxu1 %v9423_v60  ;;  %v7297_v54 = vld [vmem:[%s11995_s2 + $0x300] sm:$0xff]  ;;  %v7314_v60 = vld [vmem:[%s11995_s2 + $0x388] sm:$0xff] }
 0x3fb   : > { %9428 = vmatprep.subr.bf16.mxu1 %v9427_v32  ;;  %v9471_v2 = vpack.c.bf16 %v7314_v60, %v7313_v35  ;;  %v7328_v35 = vld [vmem:[%s11995_s2 + $0x3f8] sm:$0xff]  ;;  %v5533_v60 = vld [vmem:[#allocation2 + $0xc0] sm:$0xff] }
 0x3fd   : > { %8895 = vmatmul.mubr.f32.gmra.mrb[4].mxu1 %v11175_v25  ;;  %v9439_v25 = vpack.c.bf16 %v7298_v9, %v7297_v54  ;;  %v12231_v54 = vld [vmem:[#allocation20_spill] sm:$0xff]  ;;  %v12232_v9 = vld [vmem:[#allocation21_spill] sm:$0xff] }
 0x3fe   : > { %8897 = vmatprep.mubr.f32.mxu1 %v11191_v61  ;;  %9430 = vmatpush3.bf16.msra.mxu1 %v9427_v32  ;;  %v7299_v61 = vld [vmem:[%s11995_s2 + $0x310] sm:$0xff]  ;;  %v12222_v32 = vld [vmem:[#allocation10_spill] sm:$0xff] }
 0x3ff   : > { %9432 = vmatprep.subr.bf16.mxu1 %v9431_v20 }
 0x401   : > { %8898 = vmatmul.mubr.f32.gmra.mrb[6].mxu1 %v11188_v59  ;;  %v12208_v59 = vmax.f32 %v11287_v18, 0.0 }
 0x402   : > { %8900 = vmatprep.mubr.f32.mxu1 %v11205_v27  ;;  %9434 = vmatpush3.bf16.msra.mxu1 %v9431_v20  ;;  %v12209_v27 = vmax.f32 %v11277_v14, 0.0  ;;  %v12215_v14 = vld [vmem:[#allocation36_spill] sm:$0xff]  ;;  %v12226_v20 = vld [vmem:[#allocation14_spill] sm:$0xff] }
 0x403   : > { %9436 = vmatprep.subr.bf16.mxu1 %v9435_v43 }
 0x405   : > { %8901 = vmatmul.mubr.f32.gmra.mrb[8].mxu1 %v11202_v1  ;;  %v7300_v1 = vld [vmem:[%s11995_s2 + $0x318] sm:$0xff] }
 0x406   : > { %8903 = vmatprep.mubr.f32.mxu1 %v11219_v38  ;;  %9438 = vmatpush3.bf16.msra.mxu1 %v9435_v43  ;;  %v7301_v38 = vld [vmem:[%s11995_s2 + $0x320] sm:$0xff] }
 0x407   : > { %9440 = vmatprep.subr.bf16.mxu1 %v9439_v25  ;;  %v12230_v43 = vld [vmem:[#allocation18_spill] sm:$0xff] }
 0x409   : > { %8904 = vmatmul.mubr.f32.gmra.mrb[10].mxu1 %v11216_v36  ;;  %v9443_v36 = vpack.c.bf16 %v7300_v1, %v7299_v61  ;;  %v12235_v61 = vld [vmem:[#allocation24_spill] sm:$0xff]  ;;  %v11835_v1 = vld [vmem:[#allocation2 + $0x182] sm:$0xff] }
 0x40a   : > { %8906 = vmatprep.mubr.f32.mxu1 %v11233_v4  ;;  %v12210_v4 = vld [vmem:[#allocation19_spill] sm:$0xff] }
 0x40d   : > { %8907 = vmatmul.mubr.f32.gmra.mrb[12].mxu1 %v11230_v31  ;;  %v7302_v31 = vld [vmem:[%s11995_s2 + $0x328] sm:$0xff] }
 0x40e   : > { %8909 = vmatprep.mubr.f32.mxu1 %v11241_v44  ;;  %v9447_v44 = vpack.c.bf16 %v7302_v31, %v7301_v38  ;;  %v7316_v38 = vld [vmem:[%s11995_s2 + $0x398] sm:$0xff]  ;;  %v5521_v31 = vld [vmem:[#allocation2 + $0x30] sm:$0xff] }
 0x411   : > { %8910 = vmatmul.mubr.f32.gmra.mrb[14].mxu1 %v11238_v42  ;;  %v12211_v42 = vld [vmem:[#allocation29_spill] sm:$0xff] }
 0x412   : > { %8912 = vmatprep.mubr.f32.mxu1 %v11249_v7  ;;  %v7304_v7 = vld [vmem:[%s11995_s2 + $0x338] sm:$0xff] }
 0x415   : > { %8913 = vmatmul.mubr.f32.gmra.mrb[16].mxu1 %v11246_v46  ;;  %v7303_v46 = vld [vmem:[%s11995_s2 + $0x330] sm:$0xff] }
 0x416   : > { %8915 = vmatprep.mubr.f32.mxu1 %v11257_v50  ;;  %v12213_v50 = vld [vmem:[#allocation32_spill] sm:$0xff] }
 0x419   : > { %8916 = vmatmul.mubr.f32.gmra.mrb[18].mxu1 %v11254_v8  ;;  %v12212_v8 = vld [vmem:[#allocation31_spill] sm:$0xff] }
 0x41a   : > { %8918 = vmatprep.mubr.f32.mxu1 %v11265_v52  ;;  %v7305_v52 = vld [vmem:[%s11995_s2 + $0x340] sm:$0xff] }
 0x41d   : > { %8919 = vmatmul.mubr.f32.gmra.mrb[20].mxu1 %v11262_v10  ;;  %v9451_v10 = vpack.c.bf16 %v7304_v7, %v7303_v46  ;;  %v5523_v46 = vld [vmem:[#allocation2 + $0x48] sm:$0xff] }
 0x41e   : > { %8921 = vmatprep.mubr.f32.mxu1 %v11273_v13  ;;  %v12214_v13 = vld [vmem:[#allocation34_spill] sm:$0xff] }
 0x421   : > { %8922 = vmatmul.mubr.f32.gmra.mrb[22].mxu1 %v11270_v12  ;;  %v7306_v12 = vld [vmem:[%s11995_s2 + $0x348] sm:$0xff] }
 0x422   : > { %8924 = vmatprep.mubr.f32.mxu1 %v12208_v59  ;;  %v9455_v18 = vpack.c.bf16 %v7306_v12, %v7305_v52  ;;  %v12234_v59 = vld [vmem:[#allocation23_spill] sm:$0xff]  ;;  %v5525_v52 = vld [vmem:[#allocation2 + $0x60] sm:$0xff] }
 0x425   : > { %8925 = vmatmul.mubr.f32.gmra.mrb[24].mxu1 %v12209_v27  ;;  %v11838_v27 = vld [vmem:[#allocation2 + $0x18a] sm:$0xff] }
 0x426   : > { %8959 = vmatprep.mubr.f32.mxu1 %v11445_v19  ;;  %v7307_v19 = vld [vmem:[%s11995_s2 + $0x350] sm:$0xff] }
 0x427   : > { %v9459_v23 = vpack.c.bf16 %v7308_v49, %v7307_v19  ;;  %v5527_v19 = vld [vmem:[#allocation2 + $0x78] sm:$0xff] }
 0x429   : > { %8960 = vmatmul.mubr.f32.vlgmr.msra.gmra.mrb[26].mxu1 %v12210_v4 }
 0x42a   : > { %9442 = vmatpush3.bf16.msra.mxu1 %v9439_v25  ;;  %8962 = vmatprep.mubr.f32.mxu1 %v12211_v42  ;;  %v12233_v25 = vld [vmem:[#allocation22_spill] sm:$0xff] }
 0x42b   : > { %9444 = vmatprep.subr.bf16.mxu1 %v9443_v36  ;;  %v7317_v42 = vld [vmem:[%s11995_s2 + $0x3a0] sm:$0xff] }
 0x42d   : > { %8963 = vmatmul.mubr.f32.gmra.mrb[28].mxu1 %v12212_v8  ;;  %v5524_v8 = vld [vmem:[#allocation2 + $0x50] sm:$0xff] }
 0x42e   : > { %8965 = vmatprep.mubr.f32.mxu1 %v12213_v50  ;;  %9446 = vmatpush3.bf16.msra.mxu1 %v9443_v36  ;;  %v7315_v36 = vld [vmem:[%s11995_s2 + $0x390] sm:$0xff] }
 0x42f   : > { %9448 = vmatprep.subr.bf16.mxu1 %v9447_v44  ;;  %v9475_v4 = vpack.c.bf16 %v7316_v38, %v7315_v36  ;;  %v7319_v50 = vld [vmem:[%s11995_s2 + $0x3b0] sm:$0xff]  ;;  %v5546_v36 = vld [vmem:[#allocation2 + $0x158] sm:$0xff]  ;;  %v5547_v38 = vld [vmem:[#allocation2 + $0x168] sm:$0xff] }
 0x431   : > { %8966 = vmatmul.mubr.f32.gmra.mrb[30].mxu1 %v12214_v13  ;;  %v5526_v13 = vld [vmem:[#allocation2 + $0x68] sm:$0xff] }
 0x432   : > { %8968 = vmatprep.mubr.f32.mxu1 %v12215_v14  ;;  %9450 = vmatpush3.bf16.msra.mxu1 %v9447_v44  ;;  %v7318_v44 = vld [vmem:[%s11995_s2 + $0x3a8] sm:$0xff]  ;;  %v7321_v14 = vld [vmem:[%s11995_s2 + $0x3c0] sm:$0xff] }
 0x433   : > { %9452 = vmatprep.subr.bf16.mxu1 %v9451_v10  ;;  %v9479_v7 = vpack.c.bf16 %v7318_v44, %v7317_v42  ;;  %v7332_v42 = vld [vmem:[%s11995_s2 + $0x418] sm:$0xff] }
 0x435   : > { %8969 = vmatmul.mubr.f32.gmra.mrb[0].mxu1 %v12216_v21  ;;  %v5528_v21 = vld [vmem:[#allocation2 + $0x80] sm:$0xff] }
 0x436   : > { %8971 = vmatprep.mubr.f32.mxu1 %v12217_v22  ;;  %9454 = vmatpush3.bf16.msra.mxu1 %v9451_v10  ;;  %v7320_v10 = vld [vmem:[%s11995_s2 + $0x3b8] sm:$0xff]  ;;  %v7323_v22 = vld [vmem:[%s11995_s2 + $0x3d0] sm:$0xff] }
 0x437   : > { %9456 = vmatprep.subr.bf16.mxu1 %v9455_v18  ;;  %v9483_v12 = vpack.c.bf16 %v7320_v10, %v7319_v50  ;;  %v5833_v50 = vld [vmem:[#allocation2 + $0x79] sm:$0xff] }
 0x438   : > { %v7340_v10 = vld [vmem:[%s11995_s2 + $0x458] sm:$0xff] }
 0x439   : > { %8972 = vmatmul.mubr.f32.gmra.mrb[2].mxu1 %v12218_v57  ;;  %v5530_v57 = vld [vmem:[#allocation2 + $0x98] sm:$0xff] }
 0x43a   : > { %8974 = vmatprep.mubr.f32.mxu1 %v12219_v58  ;;  %9458 = vmatpush3.bf16.msra.mxu1 %v9455_v18  ;;  %v7322_v18 = vld [vmem:[%s11995_s2 + $0x3c8] sm:$0xff]  ;;  %v7325_v58 = vld [vmem:[%s11995_s2 + $0x3e0] sm:$0xff] }
 0x43b   : > { %9460 = vmatprep.subr.bf16.mxu1 %v9459_v23  ;;  %v9487_v49 = vpack.c.bf16 %v7322_v18, %v7321_v14  ;;  %v7342_v14 = vld [vmem:[%s11995_s2 + $0x468] sm:$0xff] }
 0x43c   : > { %v5837_v18 = vld [vmem:[#allocation2 + $0xa9] sm:$0xff] }
 0x43d   : > { %8975 = vmatmul.mubr.f32.gmra.mrb[4].mxu1 %v12220_v34  ;;  %v5532_v34 = vld [vmem:[#allocation2 + $0xb0] sm:$0xff] }
 0x43e   : > { %8977 = vmatprep.mubr.f32.mxu1 %v11517_v41  ;;  %9462 = vmatpush3.bf16.msra.mxu1 %v9459_v23  ;;  %v12223_v41 = vld [vmem:[#allocation11_spill] sm:$0xff]  ;;  %v7324_v23 = vld [vmem:[%s11995_s2 + $0x3d8] sm:$0xff] }
 0x43f   : > { %9464 = vmatprep.subr.bf16.mxu1 %v9463_v62  ;;  %v9491_v56 = vpack.c.bf16 %v7324_v23, %v7323_v22  ;;  %v5839_v22 = vld [vmem:[#allocation2 + $0xc1] sm:$0xff] }
 0x441   : > { %8978 = vmatmul.mubr.f32.gmra.mrb[6].mxu1 %v11520_v17  ;;  %v12228_v17 = vld [vmem:[#allocation16_spill] sm:$0xff] }
 0x442   : > { %8980 = vmatprep.mubr.f32.mxu1 %v12221_v45  ;;  %9466 = vmatpush3.bf16.msra.mxu1 %v9463_v62  ;;  %v7326_v62 = vld [vmem:[%s11995_s2 + $0x3e8] sm:$0xff] }
 0x443   : > { %9468 = vmatprep.subr.bf16.mxu1 %v9467_v55  ;;  %v9495_v30 = vpack.c.bf16 %v7326_v62, %v7325_v58  ;;  %v5843_v58 = vld [vmem:[#allocation2 + $0xf1] sm:$0xff]  ;;  %v5844_v62 = vld [vmem:[#allocation2 + $0xf9] sm:$0xff] }
 0x445   : > { %8981 = vmatmul.mubr.f32.gmra.mrb[8].mxu1 %v12222_v32  ;;  %v7329_v32 = vld [vmem:[%s11995_s2 + $0x400] sm:$0xff] }
 0x446   : > { %8983 = vmatprep.mubr.f32.mxu1 %v12223_v41  ;;  %9470 = vmatpush3.bf16.msra.mxu1 %v9467_v55  ;;  %v7327_v55 = vld [vmem:[%s11995_s2 + $0x3f0] sm:$0xff]  ;;  %v7330_v41 = vld [vmem:[%s11995_s2 + $0x408] sm:$0xff] }
 0x447   : > { %9472 = vmatprep.subr.bf16.mxu1 %v9471_v2  ;;  %v9499_v45 = vpack.c.bf16 %v7328_v35, %v7327_v55  ;;  %v5848_v55 = vld [vmem:[#allocation2 + $0x129] sm:$0xff]  ;;  %v5849_v35 = vld [vmem:[#allocation2 + $0x139] sm:$0xff] }
 0x449   : > { %8984 = vmatmul.mubr.f32.gmra.mrb[10].mxu1 %v12224_v5  ;;  %v5535_v5 = vld [vmem:[#allocation2 + $0xd8] sm:$0xff] }
 0x44a   : > { %8986 = vmatprep.mubr.f32.mxu1 %v12225_v6  ;;  %v9503_v6 = vpack.c.bf16 %v7330_v41, %v7329_v32  ;;  %v5853_v32 = vld [vmem:[#allocation2 + $0x169] sm:$0xff]  ;;  %v5854_v41 = vld [vmem:[#allocation2 + $0x171] sm:$0xff] }
 0x44d   : > { %8987 = vmatmul.mubr.f32.gmra.mrb[12].mxu1 %v12226_v20  ;;  %v5536_v20 = vld [vmem:[#allocation2 + $0xe0] sm:$0xff] }
 0x44e   : > { %8989 = vmatprep.mubr.f32.mxu1 %v12227_v40  ;;  %v5537_v40 = vld [vmem:[#allocation2 + $0xf0] sm:$0xff] }
 0x451   : > { %8990 = vmatmul.mubr.f32.gmra.mrb[14].mxu1 %v12228_v17  ;;  %v5538_v17 = vld [vmem:[#allocation2 + $0xf8] sm:$0xff] }
 0x452   : > { %8992 = vmatprep.mubr.f32.mxu1 %v12229_v39  ;;  %v5539_v39 = vld [vmem:[#allocation2 + $0x108] sm:$0xff] }
 0x455   : > { %8993 = vmatmul.mubr.f32.gmra.mrb[16].mxu1 %v12230_v43  ;;  %v5540_v43 = vld [vmem:[#allocation2 + $0x110] sm:$0xff] }
 0x456   : > { %8995 = vmatprep.mubr.f32.mxu1 %v12231_v54  ;;  %v5541_v54 = vld [vmem:[#allocation2 + $0x120] sm:$0xff] }
 0x459   : > { %8996 = vmatmul.mubr.f32.gmra.mrb[18].mxu1 %v12232_v9  ;;  %v5542_v9 = vld [vmem:[#allocation2 + $0x128] sm:$0xff] }
 0x45a   : > { %8998 = vmatprep.mubr.f32.mxu1 %v12233_v25  ;;  %v5543_v25 = vld [vmem:[#allocation2 + $0x138] sm:$0xff] }
 0x45d   : > { %8999 = vmatmul.mubr.f32.gmra.mrb[20].mxu1 %v12234_v59  ;;  %v5544_v59 = vld [vmem:[#allocation2 + $0x140] sm:$0xff] }
 0x45e   : > { %9001 = vmatprep.mubr.f32.mxu1 %v12235_v61  ;;  %v5545_v61 = vld [vmem:[#allocation2 + $0x150] sm:$0xff] }
 0x461   : > { %9002 = vmatmul.mubr.f32.gmra.mrb[22].mxu1 %v11568_v53  ;;  %v5522_v53 = vld [vmem:[#allocation2 + $0x38] sm:$0xff] }
 0x462   : > { %9004 = vmatprep.mubr.f32.mxu1 %v11835_v1 }
 0x465   : > { %9005 = vmatmul.mubr.f32.gmra.mrb[24].mxu1 %v11838_v27 }
 0x466   : > { %9039 = vmatprep.mubr.f32.mxu1 %v5521_v31  ;;  %v5548_v31 = vld [vmem:[#allocation2 + $0x170] sm:$0xff] }
 0x469   : > { %9040 = vmatmul.mubr.f32.vlgmr.msra.gmra.mrb[26].mxu1 %v5522_v53  ;;  %v7331_v53 = vld [vmem:[%s11995_s2 + $0x410] sm:$0xff] }
 0x46a   : > { %9474 = vmatpush3.bf16.msra.mxu1 %v9471_v2  ;;  %9042 = vmatprep.mubr.f32.mxu1 %v5523_v46  ;;  %v5534_v2 = vld [vmem:[#allocation2 + $0xc8] sm:$0xff]  ;;  %v9507_v44 = vpack.c.bf16 %v7332_v42, %v7331_v53 }
 0x46b   : > { %9476 = vmatprep.subr.bf16.mxu1 %v9475_v4  ;;  %v6145_v53 = vld [vmem:[#allocation2 + $0xc2] sm:$0xff]  ;;  %v6146_v42 = vld [vmem:[#allocation2 + $0xca] sm:$0xff] }
 0x46d   : > { %9043 = vmatmul.mubr.f32.gmra.mrb[28].mxu1 %v5524_v8  ;;  %v7338_v8 = vld [vmem:[%s11995_s2 + $0x448] sm:$0xff] }
 0x46e   : > { %9045 = vmatprep.mubr.f32.mxu1 %v5525_v52  ;;  %9478 = vmatpush3.bf16.msra.mxu1 %v9475_v4  ;;  %v10073_v4 = vld [vmem:[#allocation2] sm:$0xff]  ;;  %v5835_v52 = vld [vmem:[#allocation2 + $0x91] sm:$0xff] }
 0x46f   : > { %9480 = vmatprep.subr.bf16.mxu1 %v9479_v7 }
 0x471   : > { %9046 = vmatmul.mubr.f32.gmra.mrb[30].mxu1 %v5526_v13  ;;  %v7341_v13 = vld [vmem:[%s11995_s2 + $0x460] sm:$0xff] }
 0x472   : > { %9048 = vmatprep.mubr.f32.mxu1 %v5527_v19  ;;  %9482 = vmatpush3.bf16.msra.mxu1 %v9479_v7  ;;  %v7336_v7 = vld [vmem:[%s11995_s2 + $0x438] sm:$0xff] }
 0x473   : > { %9484 = vmatprep.subr.bf16.mxu1 %v9483_v12  ;;  %v5838_v19 = vld [vmem:[#allocation2 + $0xb1] sm:$0xff] }
 0x475   : > { %9049 = vmatmul.mubr.f32.gmra.mrb[0].mxu1 %v5528_v21  ;;  %v7344_v21 = vld [vmem:[%s11995_s2 + $0x478] sm:$0xff] }
 0x476   : > { %9051 = vmatprep.mubr.f32.mxu1 %v5529_v26  ;;  %9486 = vmatpush3.bf16.msra.mxu1 %v9483_v12  ;;  %v5836_v12 = vld [vmem:[#allocation2 + $0x99] sm:$0xff]  ;;  %v5840_v26 = vld [vmem:[#allocation2 + $0xc9] sm:$0xff] }
 0x477   : > { %9488 = vmatprep.subr.bf16.mxu1 %v9487_v49 }
 0x479   : > { %9052 = vmatmul.mubr.f32.gmra.mrb[2].mxu1 %v5530_v57  ;;  %v5842_v57 = vld [vmem:[#allocation2 + $0xe1] sm:$0xff] }
 0x47a   : > { %9054 = vmatprep.mubr.f32.mxu1 %v5531_v29  ;;  %9490 = vmatpush3.bf16.msra.mxu1 %v9487_v49  ;;  %v7343_v49 = vld [vmem:[%s11995_s2 + $0x470] sm:$0xff] }
 0x47b   : > { %9492 = vmatprep.subr.bf16.mxu1 %v9491_v56  ;;  %v9531_v23 = vpack.c.bf16 %v7344_v21, %v7343_v49  ;;  %v5845_v29 = vld [vmem:[#allocation2 + $0x109] sm:$0xff] }
 0x47d   : > { %9055 = vmatmul.mubr.f32.gmra.mrb[4].mxu1 %v5532_v34  ;;  %v5847_v34 = vld [vmem:[#allocation2 + $0x121] sm:$0xff] }
 0x47e   : > { %9057 = vmatprep.mubr.f32.mxu1 %v5533_v60  ;;  %9494 = vmatpush3.bf16.msra.mxu1 %v9491_v56  ;;  %v5841_v56 = vld [vmem:[#allocation2 + $0xd9] sm:$0xff]  ;;  %v5850_v60 = vld [vmem:[#allocation2 + $0x141] sm:$0xff] }
 0x47f   : > { %9496 = vmatprep.subr.bf16.mxu1 %v9495_v30 }
 0x481   : > { %9058 = vmatmul.mubr.f32.gmra.mrb[6].mxu1 %v5534_v2  ;;  %v5852_v2 = vld [vmem:[#allocation2 + $0x159] sm:$0xff] }
 0x482   : > { %9060 = vmatprep.mubr.f32.mxu1 %v5535_v5  ;;  %9498 = vmatpush3.bf16.msra.mxu1 %v9495_v30  ;;  %v5846_v30 = vld [vmem:[#allocation2 + $0x111] sm:$0xff]  ;;  %v5855_v5 = vld [vmem:[#allocation2 + $0x181] sm:$0xff] }
 0x483   : > { %9500 = vmatprep.subr.bf16.mxu1 %v9499_v45 }
 0x485   : > { %9061 = vmatmul.mubr.f32.gmra.mrb[8].mxu1 %v5536_v20  ;;  %v5856_v20 = vld [vmem:[#allocation2 + $0x189] sm:$0xff] }
 0x486   : > { %9063 = vmatprep.mubr.f32.mxu1 %v5537_v40  ;;  %9502 = vmatpush3.bf16.msra.mxu1 %v9499_v45  ;;  %v5851_v45 = vld [vmem:[#allocation2 + $0x151] sm:$0xff]  ;;  %v5858_v40 = vld [vmem:[#allocation2 + $0x1a1] sm:$0xff] }
 0x487   : > { %9504 = vmatprep.subr.bf16.mxu1 %v9503_v6 }
 0x489   : > { %9064 = vmatmul.mubr.f32.gmra.mrb[10].mxu1 %v5538_v17  ;;  %v6133_v17 = vld [vmem:[#allocation2 + $0x32] sm:$0xff] }
 0x48a   : > { %9066 = vmatprep.mubr.f32.mxu1 %v5539_v39  ;;  %v6134_v39 = vld [vmem:[#allocation2 + $0x3a] sm:$0xff] }
 0x48d   : > { %9067 = vmatmul.mubr.f32.gmra.mrb[12].mxu1 %v5540_v43  ;;  %v6135_v43 = vld [vmem:[#allocation2 + $0x4a] sm:$0xff] }
 0x48e   : > { %9069 = vmatprep.mubr.f32.mxu1 %v5541_v54  ;;  %v6136_v54 = vld [vmem:[#allocation2 + $0x52] sm:$0xff] }
 0x491   : > { %9070 = vmatmul.mubr.f32.gmra.mrb[14].mxu1 %v5542_v9  ;;  %v6137_v9 = vld [vmem:[#allocation2 + $0x62] sm:$0xff] }
 0x492   : > { %9072 = vmatprep.mubr.f32.mxu1 %v5543_v25  ;;  %v6138_v25 = vld [vmem:[#allocation2 + $0x6a] sm:$0xff] }
 0x495   : > { %9073 = vmatmul.mubr.f32.gmra.mrb[16].mxu1 %v5544_v59  ;;  %v6139_v59 = vld [vmem:[#allocation2 + $0x7a] sm:$0xff] }
 0x496   : > { %9075 = vmatprep.mubr.f32.mxu1 %v5545_v61  ;;  %v6140_v61 = vld [vmem:[#allocation2 + $0x82] sm:$0xff] }
 0x499   : > { %9076 = vmatmul.mubr.f32.gmra.mrb[18].mxu1 %v5546_v36  ;;  %v6141_v36 = vld [vmem:[#allocation2 + $0x92] sm:$0xff] }
 0x49a   : > { %9078 = vmatprep.mubr.f32.mxu1 %v5547_v38  ;;  %v6142_v38 = vld [vmem:[#allocation2 + $0x9a] sm:$0xff] }
 0x49d   : > { %9079 = vmatmul.mubr.f32.gmra.mrb[20].mxu1 %v5548_v31  ;;  %v6143_v31 = vld [vmem:[#allocation2 + $0xaa] sm:$0xff] }
 0x49e   : > { %9081 = vmatprep.mubr.f32.mxu1 %v11657_v15  ;;  %v7333_v15 = vld [vmem:[%s11995_s2 + $0x420] sm:$0xff] }
 0x4a1   : > { %9082 = vmatmul.mubr.f32.gmra.mrb[22].mxu1 %v11660_v16  ;;  %v7334_v16 = vld [vmem:[%s11995_s2 + $0x428] sm:$0xff] }
 0x4a2   : > { %9084 = vmatprep.mubr.f32.mxu1 %v10073_v4  ;;  %v9511_v46 = vpack.c.bf16 %v7334_v16, %v7333_v15  ;;  %v6148_v15 = vld [vmem:[#allocation2 + $0xe2] sm:$0xff]  ;;  %v6149_v16 = vld [vmem:[#allocation2 + $0xf2] sm:$0xff] }
 0x4a5   : > { %9085 = vmatmul.mubr.f32.gmra.mrb[24].mxu1 %v10073_v4  ;;  %v6144_v4 = vld [vmem:[#allocation2 + $0xb2] sm:$0xff] }
 0x4a6   : > { %9119 = vmatprep.mubr.f32.mxu1 %v11675_v28  ;;  %v7335_v28 = vld [vmem:[%s11995_s2 + $0x430] sm:$0xff] }
 0x4a9   : > { %9120 = vmatmul.mubr.f32.vlgmr.msra.gmra.mrb[26].mxu1 %v11678_v0  ;;  %v9515_v0 = vpack.c.bf16 %v7336_v7, %v7335_v28  ;;  %v6151_v28 = vld [vmem:[#allocation2 + $0x10a] sm:$0xff]  ;;  %v6152_v7 = vld [vmem:[#allocation2 + $0x112] sm:$0xff] }
 0x4aa   : > { %9506 = vmatpush3.bf16.msra.mxu1 %v9503_v6  ;;  %9122 = vmatprep.mubr.f32.mxu1 %v11687_v3  ;;  %v7337_v3 = vld [vmem:[%s11995_s2 + $0x440] sm:$0xff] }
 0x4ab   : > { %9508 = vmatprep.subr.bf16.mxu1 %v9507_v44  ;;  %v5857_v6 = vld [vmem:[#allocation2 + $0x199] sm:$0xff] }
 0x4ad   : > { %9123 = vmatmul.mubr.f32.gmra.mrb[28].mxu1 %v11690_v33  ;;  %v9519_v33 = vpack.c.bf16 %v7338_v8, %v7337_v3  ;;  %v6154_v3 = vld [vmem:[#allocation2 + $0x12a] sm:$0xff]  ;;  %v6155_v8 = vld [vmem:[#allocation2 + $0x13a] sm:$0xff] }
 0x4ae   : > { %9125 = vmatprep.mubr.f32.mxu1 %v11699_v48  ;;  %9510 = vmatpush3.bf16.msra.mxu1 %v9507_v44  ;;  %v7339_v48 = vld [vmem:[%s11995_s2 + $0x450] sm:$0xff]  ;;  %v6147_v44 = vld [vmem:[#allocation2 + $0xda] sm:$0xff] }
 0x4af   : > { %9512 = vmatprep.subr.bf16.mxu1 %v9511_v46 }
 0x4b1   : > { %9126 = vmatmul.mubr.f32.gmra.mrb[30].mxu1 %v11702_v63  ;;  %v9523_v63 = vpack.c.bf16 %v7340_v10, %v7339_v48  ;;  %v6158_v48 = vld [vmem:[#allocation2 + $0x15a] sm:$0xff]  ;;  %v6159_v10 = vld [vmem:[#allocation2 + $0x16a] sm:$0xff] }
 0x4b2   : > { %9128 = vmatprep.mubr.f32.mxu1 %v5833_v50  ;;  %9514 = vmatpush3.bf16.msra.mxu1 %v9511_v46  ;;  %v6150_v46 = vld [vmem:[#allocation2 + $0xfa] sm:$0xff]  ;;  %v6156_v50 = vld [vmem:[#allocation2 + $0x142] sm:$0xff] }
 0x4b3   : > { %9516 = vmatprep.subr.bf16.mxu1 %v9515_v0 }
 0x4b5   : > { %9129 = vmatmul.mubr.f32.gmra.mrb[0].mxu1 %v11712_v47  ;;  %v9527_v47 = vpack.c.bf16 %v7342_v14, %v7341_v13  ;;  %v12236_v14 = vld [vmem:[#allocation12_spill] sm:$0xff] }
 0x4b6   : > { %9131 = vmatprep.mubr.f32.mxu1 %v5835_v52  ;;  %9518 = vmatpush3.bf16.msra.mxu1 %v9515_v0  ;;  %v6153_v0 = vld [vmem:[#allocation2 + $0x122] sm:$0xff]  ;;  %v6160_v52 = vld [vmem:[#allocation2 + $0x172] sm:$0xff] }
 0x4b7   : > { %9520 = vmatprep.subr.bf16.mxu1 %v9519_v33 }
 0x4b9   : > { %9132 = vmatmul.mubr.f32.gmra.mrb[2].mxu1 %v5836_v12  ;;  %v6164_v12 = vld [vmem:[#allocation2 + $0x1a2] sm:$0xff] }
 0x4ba   : > { %9134 = vmatprep.mubr.f32.mxu1 %v5837_v18  ;;  %9522 = vmatpush3.bf16.msra.mxu1 %v9519_v33  ;;  %v6157_v33 = vld [vmem:[#allocation2 + $0x152] sm:$0xff] }
 0x4bb   : > { %9524 = vmatprep.subr.bf16.mxu1 %v9523_v63 }
 0x4bd   : > { %9135 = vmatmul.mubr.f32.gmra.mrb[4].mxu1 %v5838_v19  ;;  %v12237_v19 = vld [vmem:[#allocation13_spill] sm:$0xff] }
 0x4be   : > { %9137 = vmatprep.mubr.f32.mxu1 %v5839_v22  ;;  %9526 = vmatpush3.bf16.msra.mxu1 %v9523_v63  ;;  %v6163_v63 = vld [vmem:[#allocation2 + $0x19a] sm:$0xff] }
 0x4bf   : > { %9528 = vmatprep.subr.bf16.mxu1 %v9527_v47 }
 0x4c1   : > { %9138 = vmatmul.mubr.f32.gmra.mrb[6].mxu1 %v5840_v26 }
 0x4c2   : > { %9140 = vmatprep.mubr.f32.mxu1 %v5841_v56  ;;  %9530 = vmatpush3.bf16.msra.mxu1 %v9527_v47 }
 0x4c3   : > { %9532 = vmatprep.subr.bf16.mxu1 %v9531_v23 }
 0x4c5   : > { %9141 = vmatmul.mubr.f32.gmra.mrb[8].mxu1 %v5842_v57 }
 0x4c6   : > { %9143 = vmatprep.mubr.f32.mxu1 %v5843_v58  ;;  %9534 = vmatpush3.bf16.msra.mxu1 %v9531_v23 }
 0x4c9   : > { %9144 = vmatmul.mubr.f32.gmra.mrb[10].mxu1 %v5844_v62 }
 0x4ca   : > { %9146 = vmatprep.mubr.f32.mxu1 %v5845_v29 }
 0x4cd   : > { %9147 = vmatmul.mubr.f32.gmra.mrb[12].mxu1 %v5846_v30 }
 0x4ce   : > { %9149 = vmatprep.mubr.f32.mxu1 %v5847_v34 }
 0x4d1   : > { %9150 = vmatmul.mubr.f32.gmra.mrb[14].mxu1 %v5848_v55 }
 0x4d2   : > { %9152 = vmatprep.mubr.f32.mxu1 %v5849_v35 }
 0x4d5   : > { %9153 = vmatmul.mubr.f32.gmra.mrb[16].mxu1 %v5850_v60 }
 0x4d6   : > { %9155 = vmatprep.mubr.f32.mxu1 %v5851_v45 }
 0x4d9   : > { %9156 = vmatmul.mubr.f32.gmra.mrb[18].mxu1 %v5852_v2 }
 0x4da   : > { %9158 = vmatprep.mubr.f32.mxu1 %v5853_v32 }
 0x4dd   : > { %9159 = vmatmul.mubr.f32.gmra.mrb[20].mxu1 %v5854_v41 }
 0x4de   : > { %9161 = vmatprep.mubr.f32.mxu1 %v5855_v5 }
 0x4e1   : > { %9162 = vmatmul.mubr.f32.gmra.mrb[22].mxu1 %v5856_v20 }
 0x4e2   : > { %9164 = vmatprep.mubr.f32.mxu1 %v5857_v6 }
 0x4e5   : > { %9165 = vmatmul.mubr.f32.gmra.mrb[24].mxu1 %v5858_v40 }
 0x4e6   : > { %9199 = vmatprep.mubr.f32.mxu1 %v6133_v17 }
 0x4e9   : > { %9200 = vmatmul.mubr.f32.vlgmr.msra.gmra.mrb[26].mxu1 %v6134_v39 }
 0x4ea   : > { %9202 = vmatprep.mubr.f32.mxu1 %v6135_v43 }
 0x4ed   : > { %9203 = vmatmul.mubr.f32.gmra.mrb[28].mxu1 %v6136_v54 }
 0x4ee   : > { %9205 = vmatprep.mubr.f32.mxu1 %v6137_v9 }
 0x4f1   : > { %9206 = vmatmul.mubr.f32.gmra.mrb[30].mxu1 %v6138_v25 }
 0x4f2   : > { %9208 = vmatprep.mubr.f32.mxu1 %v6139_v59 }
 0x4f5   : > { %9209 = vmatmul.mubr.f32.gmra.mrb[0].mxu1 %v6140_v61 }
 0x4f6   : > { %9211 = vmatprep.mubr.f32.mxu1 %v6141_v36 }
 0x4f9   : > { %9212 = vmatmul.mubr.f32.gmra.mrb[2].mxu1 %v6142_v38 }
 0x4fa   : > { %9214 = vmatprep.mubr.f32.mxu1 %v6143_v31 }
 0x4fd   : > { %9215 = vmatmul.mubr.f32.gmra.mrb[4].mxu1 %v6144_v4 }
 0x4fe   : > { %9217 = vmatprep.mubr.f32.mxu1 %v6145_v53 }
 0x501   : > { %9218 = vmatmul.mubr.f32.gmra.mrb[6].mxu1 %v6146_v42 }
 0x502   : > { %9220 = vmatprep.mubr.f32.mxu1 %v6147_v44 }
 0x505   : > { %9221 = vmatmul.mubr.f32.gmra.mrb[8].mxu1 %v6148_v15 }
 0x506   : > { %9223 = vmatprep.mubr.f32.mxu1 %v6149_v16 }
 0x509   : > { %9224 = vmatmul.mubr.f32.gmra.mrb[10].mxu1 %v6150_v46 }
 0x50a   : > { %9226 = vmatprep.mubr.f32.mxu1 %v6151_v28 }
 0x50d   : > { %9227 = vmatmul.mubr.f32.gmra.mrb[12].mxu1 %v6152_v7 }
 0x50e   : > { %9229 = vmatprep.mubr.f32.mxu1 %v6153_v0 }
 0x511   : > { %9230 = vmatmul.mubr.f32.gmra.mrb[14].mxu1 %v6154_v3 }
 0x512   : > { %9232 = vmatprep.mubr.f32.mxu1 %v6155_v8 }
 0x515   : > { %9233 = vmatmul.mubr.f32.gmra.mrb[16].mxu1 %v6156_v50 }
 0x516   : > { %9235 = vmatprep.mubr.f32.mxu1 %v6157_v33 }
 0x519   : > { %9236 = vmatmul.mubr.f32.gmra.mrb[18].mxu1 %v6158_v48 }
 0x51a   : > { %9238 = vmatprep.mubr.f32.mxu1 %v6159_v10 }
 0x51d   : > { %9239 = vmatmul.mubr.f32.gmra.mrb[20].mxu1 %v6160_v52 }
 0x51e   : > { %9241 = vmatprep.mubr.f32.mxu1 %v11835_v1 }
 0x521   : > { %9242 = vmatmul.mubr.f32.gmra.mrb[22].mxu1 %v11838_v27 }
 0x522   : > { %9244 = vmatprep.mubr.f32.mxu1 %v6163_v63 }
 0x525   : > { %9245 = vmatmul.mubr.f32.gmra.mrb[24].mxu1 %v6164_v12 }
 0x5bc   : > { %v9201_v13 = vpop.f32.mrb[26].mxu1 }
 0x5bd   : > { %v9551_v18 = vadd.f32 %v9201_v13, %v12236_v14  ;;  %v6248_v47 = vpop.f32.mrb[27].mxu1 }
 0x5be   : > { %v9552_v49 = vadd.f32 %v6248_v47, %v12237_v19 }
 0x5bf   : > { %v6440_v21 = vmax.f32 %v9551_v18, 0.0 }
 0x5c0   : > { %v6439_v22 = vmax.f32 %v9552_v49, 0.0  ;;  %v9204_v23 = vpop.f32.mrb[28].mxu1 }
 0x5c1   : > { %6472 = vst [vmem:[#allocation3 + $0x8] sm:$0xff] %v6440_v21  ;;  %v9553_v26 = vadd.f32 %v9204_v23, %v11626_v51  ;;  %v6258_v56 = vpop.f32.mrb[29].mxu1 }
 0x5c2   : > { %6471 = vst [vmem:[#allocation3] sm:$0xff] %v6439_v22  ;;  %v9554_v1 = vadd.f32 %v6258_v56, %v11634_v24 }
 0x5c3   : > { %v6442_v27 = vmax.f32 %v9553_v26, 0.0 }
 0x5c4   : > { %v6441_v57 = vmax.f32 %v9554_v1, 0.0  ;;  %v9207_v58 = vpop.f32.mrb[30].mxu1 }
 0x5c5   : > { %6474 = vst [vmem:[#allocation3 + $0x18] sm:$0xff] %v6442_v27  ;;  %v9555_v62 = vadd.f32 %v9207_v58, %v11638_v11  ;;  %v6268_v29 = vpop.f32.mrb[31].mxu1 }
 0x5c6   : > { %6473 = vst [vmem:[#allocation3 + $0x10] sm:$0xff] %v6441_v57  ;;  %v9556_v30 = vadd.f32 %v6268_v29, %v11640_v37 }
 0x5c7   : > { %v6444_v34 = vmax.f32 %v9555_v62, 0.0 }
 0x5c8   : > { %v6443_v55 = vmax.f32 %v9556_v30, 0.0  ;;  %v9210_v35 = vpop.f32.mrb[0].mxu1 }
 0x5c9   : > { %6476 = vst [vmem:[#allocation3 + $0x28] sm:$0xff] %v6444_v34  ;;  %v6446_v51 = vmax.f32 %v9210_v35, 0.0  ;;  %v6278_v60 = vpop.f32.mrb[1].mxu1  ;;  %v6503_v24 = vld [vmem:[#allocation3] ss:$2 sm:$0xff] }
 0x5ca   : > { %6475 = vst [vmem:[#allocation3 + $0x20] sm:$0xff] %v6443_v55  ;;  %v6445_v45 = vmax.f32 %v6278_v60, 0.0  ;;  %v6535_v2 = vld [vmem:[#allocation3 + $0x1] ss:$2 sm:$0xff] }
 0x5cb   : > { %6478 = vst [vmem:[#allocation3 + $0x38] sm:$0xff] %v6446_v51  ;;  %v6566_v20 = vmax.f32 %v6503_v24, %v6535_v2 }
 0x5cc   : > { %6477 = vst [vmem:[#allocation3 + $0x30] sm:$0xff] %v6445_v45  ;;  %v9213_v32 = vpop.f32.mrb[2].mxu1 }
 0x5cd   : > { %v6505_v41 = vld [vmem:[#allocation3 + $0x10] ss:$2 sm:$0xff]  ;;  %v6537_v11 = vld [vmem:[#allocation3 + $0x11] ss:$2 sm:$0xff]  ;;  %v6448_v5 = vmax.f32 %v9213_v32, 0.0  ;;  %v6288_v6 = vpop.f32.mrb[3].mxu1 }
 0x5ce   : > { %v6567_v37 = vmax.f32 %v6505_v41, %v6537_v11  ;;  %v6447_v40 = vmax.f32 %v6288_v6, 0.0 }
 0x5cf   : > { %6480 = vst [vmem:[#allocation3 + $0x48] sm:$0xff] %v6448_v5 }
 0x5d0   : > { %v11954_v17 = vmax.f32 %v6566_v20, %v6567_v37  ;;  %6479 = vst [vmem:[#allocation3 + $0x40] sm:$0xff] %v6447_v40  ;;  %v9216_v39 = vpop.f32.mrb[4].mxu1 }
 0x5d1   : > { %v6507_v43 = vld [vmem:[#allocation3 + $0x20] ss:$2 sm:$0xff]  ;;  %v6539_v54 = vld [vmem:[#allocation3 + $0x21] ss:$2 sm:$0xff]  ;;  %v6450_v9 = vmax.f32 %v9216_v39, 0.0  ;;  %v6298_v25 = vpop.f32.mrb[5].mxu1 }
 0x5d2   : > { %6590 = vst [vmem:[%s11952_s19] sm:$0xff] %v11954_v17  ;;  %v6449_v59 = vmax.f32 %v6298_v25, 0.0  ;;  %v6568_v38 = vmax.f32 %v6507_v43, %v6539_v54 }
 0x5d3   : > { %v6509_v61 = vld [vmem:[#allocation3 + $0x30] ss:$2 sm:$0xff]  ;;  %v6541_v36 = vld [vmem:[#allocation3 + $0x31] ss:$2 sm:$0xff]  ;;  %6482 = vst [vmem:[#allocation3 + $0x58] sm:$0xff] %v6450_v9 }
 0x5d4   : > { %v6569_v31 = vmax.f32 %v6509_v61, %v6541_v36  ;;  %6481 = vst [vmem:[#allocation3 + $0x50] sm:$0xff] %v6449_v59  ;;  %v9219_v4 = vpop.f32.mrb[6].mxu1 }
 0x5d5   : > { %v6452_v53 = vmax.f32 %v9219_v4, 0.0  ;;  %v6308_v42 = vpop.f32.mrb[7].mxu1 }
 0x5d6   : > { %v11958_v44 = vmax.f32 %v6568_v38, %v6569_v31  ;;  %v6451_v15 = vmax.f32 %v6308_v42, 0.0 }
 0x5d7   : > { %6484 = vst [vmem:[#allocation3 + $0x68] sm:$0xff] %v6452_v53  ;;  %v6511_v46 = vld [vmem:[#allocation3 + $0x40] ss:$2 sm:$0xff]  ;;  %v6543_v28 = vld [vmem:[#allocation3 + $0x41] ss:$2 sm:$0xff] }
 0x5d8   : > { %6591 = vst [vmem:[%s11952_s19 + $0x8] sm:$0xff] %v11958_v44  ;;  %6483 = vst [vmem:[#allocation3 + $0x60] sm:$0xff] %v6451_v15  ;;  %v9222_v16 = vpop.f32.mrb[8].mxu1  ;;  %v6570_v33 = vmax.f32 %v6511_v46, %v6543_v28  ;;  %v6613_v15 = vmul.f32 %v11958_v44, %v11958_v44 }
 0x5d9   : > { %v6454_v7 = vmax.f32 %v9222_v16, 0.0  ;;  %v6318_v0 = vpop.f32.mrb[9].mxu1 }
 0x5da   : > { %v6453_v3 = vmax.f32 %v6318_v0, 0.0 }
 0x5db   : > { %v6513_v8 = vld [vmem:[#allocation3 + $0x50] ss:$2 sm:$0xff]  ;;  %v6545_v50 = vld [vmem:[#allocation3 + $0x51] ss:$2 sm:$0xff]  ;;  %6486 = vst [vmem:[#allocation3 + $0x78] sm:$0xff] %v6454_v7 }
 0x5dc   : > { %v6571_v48 = vmax.f32 %v6513_v8, %v6545_v50  ;;  %6485 = vst [vmem:[#allocation3 + $0x70] sm:$0xff] %v6453_v3  ;;  %v9225_v10 = vpop.f32.mrb[10].mxu1  ;;  %v6612_v3 = vmul.f32 %v11954_v17, %v11954_v17 }
 0x5dd   : > { %v6456_v52 = vmax.f32 %v9225_v10, 0.0  ;;  %v6328_v63 = vpop.f32.mrb[11].mxu1 }
 0x5de   : > { %v11962_v12 = vmax.f32 %v6570_v33, %v6571_v48  ;;  %v6455_v13 = vmax.f32 %v6328_v63, 0.0  ;;  %v6598_v48 = vadd.f32 %v11958_v44, %v11954_v17  ;;  %v6620_v63 = vadd.f32 %v6613_v15, %v6612_v3 }
 0x5df   : > { %6488 = vst [vmem:[#allocation3 + $0x88] sm:$0xff] %v6456_v52  ;;  %v6515_v18 = vld [vmem:[#allocation3 + $0x60] ss:$2 sm:$0xff]  ;;  %v6547_v47 = vld [vmem:[#allocation3 + $0x61] ss:$2 sm:$0xff] }
 0x5e0   : > { %6592 = vst [vmem:[%s11952_s19 + $0x10] sm:$0xff] %v11962_v12  ;;  %6487 = vst [vmem:[#allocation3 + $0x80] sm:$0xff] %v6455_v13  ;;  %v9228_v14 = vpop.f32.mrb[12].mxu1  ;;  %v6572_v26 = vmax.f32 %v6515_v18, %v6547_v47  ;;  %v6614_v8 = vmul.f32 %v11962_v12, %v11962_v12 }
 0x5e1   : > { %v6458_v19 = vmax.f32 %v9228_v14, 0.0  ;;  %v6338_v49 = vpop.f32.mrb[13].mxu1  ;;  %v6599_v14 = vadd.f32 %v6598_v48, %v11962_v12 }
 0x5e2   : > { %v6457_v21 = vmax.f32 %v6338_v49, 0.0  ;;  %v6621_v47 = vadd.f32 %v6620_v63, %v6614_v8 }
 0x5e3   : > { %v6517_v22 = vld [vmem:[#allocation3 + $0x70] ss:$2 sm:$0xff]  ;;  %v6549_v23 = vld [vmem:[#allocation3 + $0x71] ss:$2 sm:$0xff]  ;;  %6490 = vst [vmem:[#allocation3 + $0x98] sm:$0xff] %v6458_v19 }
 0x5e4   : > { %v6573_v56 = vmax.f32 %v6517_v22, %v6549_v23  ;;  %6489 = vst [vmem:[#allocation3 + $0x90] sm:$0xff] %v6457_v21  ;;  %v9231_v1 = vpop.f32.mrb[14].mxu1 }
 0x5e5   : > { %v6460_v27 = vmax.f32 %v9231_v1, 0.0  ;;  %v6348_v57 = vpop.f32.mrb[15].mxu1 }
 0x5e6   : > { %v11966_v58 = vmax.f32 %v6572_v26, %v6573_v56  ;;  %v6459_v62 = vmax.f32 %v6348_v57, 0.0 }
 0x5e7   : > { %6492 = vst [vmem:[#allocation3 + $0xa8] sm:$0xff] %v6460_v27  ;;  %v6519_v30 = vld [vmem:[#allocation3 + $0x80] ss:$2 sm:$0xff]  ;;  %v6551_v34 = vld [vmem:[#allocation3 + $0x81] ss:$2 sm:$0xff] }
 0x5e8   : > { %6593 = vst [vmem:[%s11952_s19 + $0x18] sm:$0xff] %v11966_v58  ;;  %6491 = vst [vmem:[#allocation3 + $0xa0] sm:$0xff] %v6459_v62  ;;  %v9234_v29 = vpop.f32.mrb[16].mxu1  ;;  %v6574_v24 = vmax.f32 %v6519_v30, %v6551_v34  ;;  %v6615_v13 = vmul.f32 %v11966_v58, %v11966_v58  ;;  %v6600_v49 = vadd.f32 %v6599_v14, %v11966_v58 }
 0x5e9   : > { %v6462_v55 = vmax.f32 %v9234_v29, 0.0  ;;  %v6358_v35 = vpop.f32.mrb[17].mxu1 }
 0x5ea   : > { %v6461_v51 = vmax.f32 %v6358_v35, 0.0  ;;  %v6622_v21 = vadd.f32 %v6621_v47, %v6615_v13 }
 0x5eb   : > { %v6521_v60 = vld [vmem:[#allocation3 + $0x90] ss:$2 sm:$0xff]  ;;  %v6553_v45 = vld [vmem:[#allocation3 + $0x91] ss:$2 sm:$0xff]  ;;  %6494 = vst [vmem:[#allocation3 + $0xb8] sm:$0xff] %v6462_v55 }
 0x5ec   : > { %v6575_v2 = vmax.f32 %v6521_v60, %v6553_v45  ;;  %6493 = vst [vmem:[#allocation3 + $0xb0] sm:$0xff] %v6461_v51  ;;  %v9237_v32 = vpop.f32.mrb[18].mxu1 }
 0x5ed   : > { %v6464_v41 = vmax.f32 %v9237_v32, 0.0  ;;  %v6368_v11 = vpop.f32.mrb[19].mxu1 }
 0x5ee   : > { %v6586_v5 = vmax.f32 %v6574_v24, %v6575_v2  ;;  %v6463_v6 = vmax.f32 %v6368_v11, 0.0 }
 0x5ef   : > { %6496 = vst [vmem:[#allocation3 + $0xc8] sm:$0xff] %v6464_v41  ;;  %v6523_v37 = vld [vmem:[#allocation3 + $0xa0] ss:$2 sm:$0xff]  ;;  %v6555_v40 = vld [vmem:[#allocation3 + $0xa1] ss:$2 sm:$0xff] }
 0x5f0   : > { %6594 = vst [vmem:[%s11952_s19 + $0x20] sm:$0xff] %v6586_v5  ;;  %6495 = vst [vmem:[#allocation3 + $0xc0] sm:$0xff] %v6463_v6  ;;  %v9240_v20 = vpop.f32.mrb[20].mxu1  ;;  %v6576_v59 = vmax.f32 %v6523_v37, %v6555_v40  ;;  %v6616_v19 = vmul.f32 %v6586_v5, %v6586_v5  ;;  %v6601_v17 = vadd.f32 %v6600_v49, %v6586_v5 }
 0x5f1   : > { %v6466_v39 = vmax.f32 %v9240_v20, 0.0  ;;  %v6378_v43 = vpop.f32.mrb[21].mxu1 }
 0x5f2   : > { %v6465_v54 = vmax.f32 %v6378_v43, 0.0  ;;  %v6623_v26 = vadd.f32 %v6622_v21, %v6616_v19 }
 0x5f3   : > { %v6525_v9 = vld [vmem:[#allocation3 + $0xb0] ss:$2 sm:$0xff]  ;;  %v6557_v25 = vld [vmem:[#allocation3 + $0xb1] ss:$2 sm:$0xff]  ;;  %6498 = vst [vmem:[#allocation3 + $0xd8] sm:$0xff] %v6466_v39 }
 0x5f4   : > { %v6577_v61 = vmax.f32 %v6525_v9, %v6557_v25  ;;  %6497 = vst [vmem:[#allocation3 + $0xd0] sm:$0xff] %v6465_v54  ;;  %v9243_v36 = vpop.f32.mrb[22].mxu1 }
 0x5f5   : > { %v6468_v38 = vmax.f32 %v9243_v36, 0.0  ;;  %v6388_v31 = vpop.f32.mrb[23].mxu1 }
 0x5f6   : > { %v6587_v4 = vmax.f32 %v6576_v59, %v6577_v61  ;;  %v6467_v53 = vmax.f32 %v6388_v31, 0.0 }
 0x5f7   : > { %6500 = vst [vmem:[#allocation3 + $0xe8] sm:$0xff] %v6468_v38  ;;  %v6527_v16 = vld [vmem:[#allocation3 + $0xc0] ss:$2 sm:$0xff]  ;;  %v6559_v46 = vld [vmem:[#allocation3 + $0xc1] ss:$2 sm:$0xff] }
 0x5f8   : > { %6595 = vst [vmem:[%s11952_s19 + $0x28] sm:$0xff] %v6587_v4  ;;  %6499 = vst [vmem:[#allocation3 + $0xe0] sm:$0xff] %v6467_v53  ;;  %v9246_v42 = vpop.f32.mrb[24].mxu1  ;;  %v6578_v10 = vmax.f32 %v6527_v16, %v6559_v46  ;;  %v6617_v44 = vmul.f32 %v6587_v4, %v6587_v4  ;;  %v6602_v27 = vadd.f32 %v6601_v17, %v6587_v4 }
 0x5f9   : > { %v6470_v28 = vmax.f32 %v9246_v42, 0.0  ;;  %v6398_v7 = vpop.f32.mrb[25].mxu1 }
 0x5fa   : > { %v6469_v0 = vmax.f32 %v6398_v7, 0.0  ;;  %v6624_v29 = vadd.f32 %v6623_v26, %v6617_v44 }
 0x5fb   : > { %v6529_v50 = vld [vmem:[#allocation3 + $0xd0] ss:$2 sm:$0xff]  ;;  %v6561_v33 = vld [vmem:[#allocation3 + $0xd1] ss:$2 sm:$0xff]  ;;  %6502 = vst [vmem:[#allocation3 + $0xf8] sm:$0xff] %v6470_v28 }
 0x5fc   : > { %v6579_v52 = vmax.f32 %v6529_v50, %v6561_v33  ;;  %6501 = vst [vmem:[#allocation3 + $0xf0] sm:$0xff] %v6469_v0 }
 0x5fe   : > { %v6588_v18 = vmax.f32 %v6578_v10, %v6579_v52 }
 0x5ff   : > { %v6531_v22 = vld [vmem:[#allocation3 + $0xe0] ss:$2 sm:$0xff]  ;;  %v6563_v23 = vld [vmem:[#allocation3 + $0xe1] ss:$2 sm:$0xff] }
 0x600   : > { %6596 = vst [vmem:[%s11952_s19 + $0x30] sm:$0xff] %v6588_v18  ;;  %v6618_v57 = vmul.f32 %v6588_v18, %v6588_v18  ;;  %v6580_v62 = vmax.f32 %v6531_v22, %v6563_v23  ;;  %v6603_v30 = vadd.f32 %v6602_v27, %v6588_v18 }
 0x602   : > { %v6625_v55 = vadd.f32 %v6624_v29, %v6618_v57 }
 0x603   : > { %v6533_v56 = vld [vmem:[#allocation3 + $0xf0] ss:$2 sm:$0xff]  ;;  %v6565_v1 = vld [vmem:[#allocation3 + $0xf1] ss:$2 sm:$0xff] }
 0x604   : > { %v6581_v12 = vmax.f32 %v6533_v56, %v6565_v1 }
 0x606   : > { %v6589_v34 = vmax.f32 %v6580_v62, %v6581_v12 }
 0x608   : > { %6597 = vst [vmem:[%s11952_s19 + $0x38] sm:$0xff] %v6589_v34  ;;  %v6604_v58 = vadd.f32 %v6603_v30, %v6589_v34  ;;  %v6619_v35 = vmul.f32 %v6589_v34, %v6589_v34 }
 0x60a   : > { %v6605_v51 = vrot.slane %v6604_v58, 4  ;;  %v6626_v60 = vadd.f32 %v6625_v55, %v6619_v35 }
 0x60c   : > { %v6606_v45 = vadd.f32 %v6605_v51, %v6604_v58  ;;  %v6627_v24 = vrot.slane %v6626_v60, 4 }
 0x60e   : > { %v6607_v2 = vrot.slane %v6606_v45, 2  ;;  %v6628_v32 = vadd.f32 %v6627_v24, %v6626_v60 }
 0x610   : > { %v6608_v41 = vadd.f32 %v6607_v2, %v6606_v45  ;;  %v6629_v11 = vrot.slane %v6628_v32, 2 }
 0x612   : > { %v6609_v5 = vrot.slane %v6608_v41, 1  ;;  %v6630_v6 = vadd.f32 %v6629_v11, %v6628_v32 }
 0x614   : > { %v6610_v20 = vadd.f32 %v6609_v5, %v6608_v41  ;;  %v6631_v37 = vrot.slane %v6630_v6, 1 }
 0x616   : > { %6611 = vst [vmem:[%s208_s22] sm:$0x1] %v6610_v20  ;;  %v6632_v40 = vadd.f32 %v6631_v37, %v6630_v6 }
 0x618   : > { %6633 = vst [vmem:[%s208_s22 + $0x1] sm:$0x1] %v6632_v40 }
 0x619 PF: > { %s15_s15 = sadd.s32 1, %s10080_s15  }
 0x61a   : > { %p12_p4 = scmp.ge.s32.totalorder %s15_s15, 4  }
 0x61c   :  { %14 = sbr.rel (!%p12_p4) target bundleno = 1 (0x1), region = 125 }

</bundles_post_ra>
